<compile_context>
chip_gen: v7x
topology: tpu7x:2x2x1
jax: 0.10.0
libtpu: 0.0.40
codegen_flags: <defaults>
</compile_context>

<pallas_src>
import functools

import numpy as np
import jax
import jax.numpy as jnp
from jax import lax
from jax.experimental import pallas as pl
from jax.experimental.pallas import tpu as pltpu


def _round_up(x, m):
    return (x + m - 1) // m * m


_VMEM_LIMIT = 48 * 1024 * 1024  # fits v5e/v6e/v7x budgets with headroom


# ---------------------------------------------------------------------------
# Pallas kernel 1: tiled fused GEMM
#   out = [relu?](A @ W + b)   (bf16 MXU inputs, f32 VMEM accumulator)
#   optionally also emits relu(out) as a bf16 second output (feedstock for the
#   consumer conv's im2col -> the ReLU is done once per element, in-kernel).
# ---------------------------------------------------------------------------
def _gemm_kernel(a_ref, w_ref, b_ref, *rest, relu_out, emit_relu):
    if emit_relu:
        o_ref, orelu_ref, acc_ref = rest
    else:
        o_ref, acc_ref = rest
        orelu_ref = None
    k = pl.program_id(2)

    @pl.when(k == 0)
    def _init():
        acc_ref[...] = jnp.zeros_like(acc_ref)

    acc_ref[...] += jnp.dot(a_ref[...], w_ref[...],
                            preferred_element_type=jnp.float32)

    @pl.when(k == pl.num_programs(2) - 1)
    def _finalize():
        y = acc_ref[...] + b_ref[...].astype(jnp.float32)
        if relu_out:
            y = jnp.maximum(y, 0.0)
        o_ref[...] = y.astype(o_ref.dtype)
        if emit_relu:
            orelu_ref[...] = jnp.maximum(y, 0.0).astype(orelu_ref.dtype)


def _fused_gemm(a, w, b=None, *, relu_out=False, emit_relu=False,
                out_dtype=jnp.float32, cast_bf16=True):
    """a:(M,K) @ w:(K,N) + b:(N,) -> (M,N) [, relu-copy (M,N) bf16]."""
    M, K = a.shape
    K2, N = w.shape
    assert K == K2
    mxu_dtype = jnp.bfloat16 if cast_bf16 else jnp.float32
    mxu_bytes = 2 if cast_bf16 else 4

    TM = min(256, _round_up(M, 8))
    Mp = _round_up(M, TM)
    TN = min(256, _round_up(N, 128))     # lane-dense output (>=128 wide)
    Np = _round_up(N, TN)
    TK = min(512, _round_up(K, 128))
    Kp = _round_up(K, TK)

    a_p = jnp.pad(a.astype(mxu_dtype), ((0, Mp - M), (0, Kp - K)))
    w_p = jnp.pad(w.astype(mxu_dtype), ((0, Kp - K), (0, Np - N)))
    if b is None:
        b_p = jnp.zeros((1, Np), jnp.float32)
    else:
        b_p = jnp.pad(b.astype(jnp.float32).reshape(1, N),
                      ((0, 0), (0, Np - N)))

    out_shapes = [jax.ShapeDtypeStruct((Mp, Np), out_dtype)]
    out_specs = [pl.BlockSpec((TM, TN), lambda i, j, k: (i, j))]
    out_bytes = Mp * Np * jnp.dtype(out_dtype).itemsize
    if emit_relu:
        out_shapes.append(jax.ShapeDtypeStruct((Mp, Np), jnp.bfloat16))
        out_specs.append(pl.BlockSpec((TM, TN), lambda i, j, k: (i, j)))
        out_bytes += Mp * Np * 2

    cost = pl.CostEstimate(
        flops=2 * Mp * Np * Kp,
        transcendentals=0,
        bytes_accessed=(Mp * Kp + Kp * Np) * mxu_bytes + Np * 4 + out_bytes,
    )

    res = pl.pallas_call(
        functools.partial(_gemm_kernel, relu_out=relu_out, emit_relu=emit_relu),
        out_shape=tuple(out_shapes),
        grid=(Mp // TM, Np // TN, Kp // TK),
        in_specs=[
            pl.BlockSpec((TM, TK), lambda i, j, k: (i, k)),
            pl.BlockSpec((TK, TN), lambda i, j, k: (k, j)),
            pl.BlockSpec((1, TN), lambda i, j, k: (0, j)),
        ],
        out_specs=tuple(out_specs),
        scratch_shapes=[pltpu.VMEM((TM, TN), jnp.float32)],
        compiler_params=pltpu.CompilerParams(
            dimension_semantics=("parallel", "parallel", "arbitrary"),
            vmem_limit_bytes=_VMEM_LIMIT,
        ),
        cost_estimate=cost,
    )(a_p, w_p, b_p)

    y = res[0][:M, :N]
    if emit_relu:
        return y, res[1][:M, :N]
    return y


# ---------------------------------------------------------------------------
# Pallas kernel 2: fused residual layer (both convs of the block in one call)
#   out = x + relu(cols(relu(x)) @ W1) @ W2    [ + final stack ReLU ]
#   `cols` is the im2col of the *already-activated* input (done once by the
#   producer); `h` lives only in VMEM scratch -> no HBM round trip.
# ---------------------------------------------------------------------------
def _res_layer_kernel(cols_ref, w1_ref, w2_ref, xres_ref, *rest,
                      relu_out, emit_relu):
    if emit_relu:
        o_ref, orelu_ref, hacc_ref = rest
    else:
        o_ref, hacc_ref = rest
        orelu_ref = None
    k = pl.program_id(1)

    @pl.when(k == 0)
    def _init():
        hacc_ref[...] = jnp.zeros_like(hacc_ref)

    hacc_ref[...] += jnp.dot(cols_ref[...], w1_ref[...],
                             preferred_element_type=jnp.float32)

    @pl.when(k == pl.num_programs(1) - 1)
    def _finalize():
        h = jnp.maximum(hacc_ref[...], 0.0).astype(w2_ref.dtype)
        y = xres_ref[...].astype(jnp.float32) + jnp.dot(
            h, w2_ref[...], preferred_element_type=jnp.float32)
        if relu_out:
            y = jnp.maximum(y, 0.0)
        o_ref[...] = y.astype(o_ref.dtype)
        if emit_relu:
            orelu_ref[...] = jnp.maximum(y, 0.0).astype(orelu_ref.dtype)


def _fused_residual_layer(cols, w1, w2, xres, *, relu_out, emit_relu,
                          out_dtype=jnp.float32):
    M, K1 = cols.shape
    _, R = w1.shape
    R2, N = w2.shape
    assert R2 == R and xres.shape == (M, N)

    TM = min(256, _round_up(M, 8))
    Mp = _round_up(M, TM)
    Np = _round_up(N, 128)               # single lane-dense N tile
    Rp = _round_up(R, 128)
    TK = min(512, _round_up(K1, 128))
    Kp = _round_up(K1, TK)

    cols_p = jnp.pad(cols.astype(jnp.bfloat16), ((0, Mp - M), (0, Kp - K1)))
    w1_p = jnp.pad(w1.astype(jnp.bfloat16), ((0, Kp - K1), (0, Rp - R)))
    w2_p = jnp.pad(w2.astype(jnp.bfloat16), ((0, Rp - R), (0, Np - N)))
    x_p = jnp.pad(xres.astype(jnp.float32), ((0, Mp - M), (0, Np - N)))

    out_shapes = [jax.ShapeDtypeStruct((Mp, Np), out_dtype)]
    out_specs = [pl.BlockSpec((TM, Np), lambda i, k: (i, 0))]
    out_bytes = Mp * Np * jnp.dtype(out_dtype).itemsize
    if emit_relu:
        out_shapes.append(jax.ShapeDtypeStruct((Mp, Np), jnp.bfloat16))
        out_specs.append(pl.BlockSpec((TM, Np), lambda i, k: (i, 0)))
        out_bytes += Mp * Np * 2

    cost = pl.CostEstimate(
        flops=2 * Mp * Rp * Kp + 2 * Mp * Np * Rp,
        transcendentals=0,
        bytes_accessed=(Mp * Kp + Kp * Rp + Rp * Np) * 2
        + Mp * Np * 4 + out_bytes,
    )

    res = pl.pallas_call(
        functools.partial(_res_layer_kernel, relu_out=relu_out,
                          emit_relu=emit_relu),
        out_shape=tuple(out_shapes),
        grid=(Mp // TM, Kp // TK),
        in_specs=[
            pl.BlockSpec((TM, TK), lambda i, k: (i, k)),
            pl.BlockSpec((TK, Rp), lambda i, k: (k, 0)),
            pl.BlockSpec((Rp, Np), lambda i, k: (0, 0)),
            pl.BlockSpec((TM, Np), lambda i, k: (i, 0)),
        ],
        out_specs=tuple(out_specs),
        scratch_shapes=[pltpu.VMEM((TM, Rp), jnp.float32)],
        compiler_params=pltpu.CompilerParams(
            dimension_semantics=("parallel", "arbitrary"),
            vmem_limit_bytes=_VMEM_LIMIT,
        ),
        cost_estimate=cost,
    )(cols_p, w1_p, w2_p, x_p)

    y = res[0][:M, :N]
    if emit_relu:
        return y, res[1][:M, :N]
    return y


# ---------------------------------------------------------------------------
# JAX glue: im2col / dilation (pure data movement, static slicing only)
# ---------------------------------------------------------------------------
def _im2col(x_nhwc, kh, kw, stride, pad):
    x = jnp.pad(x_nhwc, ((0, 0), (pad, pad), (pad, pad), (0, 0)))
    n, hp, wp, c = x.shape
    oh = (hp - kh) // stride + 1
    ow = (wp - kw) // stride + 1
    patches = []
    for i in range(kh):
        for j in range(kw):
            patches.append(
                x[:, i:i + stride * oh:stride, j:j + stride * ow:stride, :])
    cols = jnp.stack(patches, axis=3)                # (N, oh, ow, kh*kw, C)
    cols = cols.reshape(n * oh * ow, kh * kw * c)    # row-major (kh, kw, C)
    return cols, (n, oh, ow)


def _conv2d(x_nhwc, w_hwio, bias, *, stride, pad, relu_out=False,
            emit_relu=False, out_dtype=jnp.float32):
    kh, kw, cin, cout = w_hwio.shape
    # bf16 *before* im2col -> half the HBM bytes for the inflated patch matrix.
    cols, (n, oh, ow) = _im2col(x_nhwc.astype(jnp.bfloat16), kh, kw, stride, pad)
    res = _fused_gemm(cols, w_hwio.reshape(kh * kw * cin, cout), bias,
                      relu_out=relu_out, emit_relu=emit_relu,
                      out_dtype=out_dtype)
    if emit_relu:
        y, yr = res
        return y.reshape(n, oh, ow, cout), yr.reshape(n, oh, ow, cout)
    return res.reshape(n, oh, ow, cout)


def _conv2d_transpose(x_nhwc, w_hwio, bias, *, relu_out=False,
                      out_dtype=jnp.float32):
    # ConvTranspose2d(k=4, s=2, p=1) == conv(dilate_2(x), k=4, s=1, pad=2)
    # (weights are stored directly in the equivalent forward-conv HWIO layout,
    #  i.e. spatially flipped / in-out transposed relative to PyTorch's).
    n, h, w, c = x_nhwc.shape
    xd = jnp.zeros((n, 2 * h - 1, 2 * w - 1, c), x_nhwc.dtype)
    xd = xd.at[:, ::2, ::2, :].set(x_nhwc)
    return _conv2d(xd, w_hwio, bias, stride=1, pad=2,
                   relu_out=relu_out, out_dtype=out_dtype)


def _conv1x1(x_nhwc, w_hwio, bias, *, relu_out=False, out_dtype=jnp.float32):
    n, h, w, c = x_nhwc.shape
    cout = w_hwio.shape[-1]
    y = _fused_gemm(x_nhwc.reshape(n * h * w, c), w_hwio.reshape(c, cout),
                    bias, relu_out=relu_out, out_dtype=out_dtype)
    return y.reshape(n, h, w, cout)


def _residual_stack(x_f32, x_relu_bf16, w1_list, w2_list):
    """Returns relu(ResidualStack(x)) as bf16 NHWC (the stack's final ReLU)."""
    n, h, w, c = x_f32.shape
    num_layers = len(w1_list)
    x, xr = x_f32, x_relu_bf16
    for l in range(num_layers):
        last = (l == num_layers - 1)
        cols, _ = _im2col(xr, 3, 3, 1, 1)
        r = w1_list[l].shape[-1]
        out = _fused_residual_layer(
            cols,
            w1_list[l].reshape(9 * c, r),
            w2_list[l].reshape(r, c),
            x.reshape(n * h * w, c),
            relu_out=last, emit_relu=not last,
            out_dtype=jnp.bfloat16 if last else jnp.float32)
        if last:
            xr = out.reshape(n, h, w, c)
        else:
            y, yr = out
            x = y.reshape(n, h, w, c)
            xr = yr.reshape(n, h, w, c)
    return xr


# ---------------------------------------------------------------------------
# Model stages (all NHWC internally)
# ---------------------------------------------------------------------------
def encoder_forward(x_nhwc, p):
    h1 = _conv2d(x_nhwc, p["enc_w1"], p["enc_b1"], stride=2, pad=1,
                 relu_out=True, out_dtype=jnp.bfloat16)
    h2 = _conv2d(h1, p["enc_w2"], p["enc_b2"], stride=2, pad=1,
                 relu_out=True, out_dtype=jnp.bfloat16)
    x3, x3_relu = _conv2d(h2, p["enc_w3"], p["enc_b3"], stride=1, pad=1,
                          relu_out=False, emit_relu=True,
                          out_dtype=jnp.float32)
    return _residual_stack(x3, x3_relu, p["enc_rw1"], p["enc_rw2"])


def vq_forward(z_e_nhwc, embedding, commitment_cost):
    n, h, w, d = z_e_nhwc.shape
    flat = z_e_nhwc.reshape(n * h * w, d).astype(jnp.float32)
    # argmin(|z|^2 + |e|^2 - 2 z.e) == argmin(-2 z.e + |e|^2); the heavy GEMM
    # runs in Pallas (f32 so the selected codes match the f32 reference).
    e_sq = jnp.sum(embedding ** 2, axis=1)
    scores = _fused_gemm(flat, -2.0 * embedding.T, e_sq,
                         cast_bf16=False, out_dtype=jnp.float32)
    idx = jnp.argmin(scores, axis=1)
    z_q_flat = jnp.take(embedding, idx, axis=0)
    loss = commitment_cost * jnp.mean((z_q_flat - flat) ** 2)
    counts = jnp.zeros((embedding.shape[0],), jnp.float32).at[idx].add(1.0)
    avg_probs = counts / flat.shape[0]
    perplexity = jnp.exp(-jnp.sum(avg_probs * jnp.log(avg_probs + 1e-10)))
    # straight-through z_q == z_q numerically in the forward pass
    return loss, z_q_flat.reshape(n, h, w, d), perplexity, idx


def decoder_forward(z_q_nhwc, p):
    x1, x1_relu = _conv2d(z_q_nhwc, p["dec_w1"], p["dec_b1"], stride=1, pad=1,
                          relu_out=False, emit_relu=True,
                          out_dtype=jnp.float32)
    h = _residual_stack(x1, x1_relu, p["dec_rw1"], p["dec_rw2"])
    h = _conv2d_transpose(h, p["dec_tw1"], p["dec_tb1"], relu_out=True,
                          out_dtype=jnp.bfloat16)
    return _conv2d_transpose(h, p["dec_tw2"], p["dec_tb2"], relu_out=False,
                             out_dtype=jnp.float32)


def vqvae_forward(x_nchw, params, commitment_cost):
    x = jnp.transpose(x_nchw, (0, 2, 3, 1))
    z = encoder_forward(x, params)
    z_e = _conv1x1(z, params["pre_vq_w"], params["pre_vq_b"])
    loss, z_q, perplexity, _ = vq_forward(z_e, params["embedding"],
                                          commitment_cost)
    recon = decoder_forward(z_q, params)
    return loss, jnp.transpose(recon, (0, 3, 1, 2)), perplexity


# ---------------------------------------------------------------------------
# Pure-JAX f32 reference (for correctness checks)
# ---------------------------------------------------------------------------
def _ref_conv(x, w, b, stride, pad, lhs_dilation=None):
    y = lax.conv_general_dilated(
        x, w, (stride, stride), [(pad, pad), (pad, pad)],
        lhs_dilation=lhs_dilation,
        dimension_numbers=("NHWC", "HWIO", "NHWC"))
    return y if b is None else y + b


def ref_residual_stack(x, w1s, w2s):
    for l in range(len(w1s)):
        h = jax.nn.relu(_ref_conv(jax.nn.relu(x), w1s[l], None, 1, 1))
        x = x + _ref_conv(h, w2s[l], None, 1, 0)
    return jax.nn.relu(x)


def ref_encoder_prevq(x_nhwc, p):
    x = jax.nn.relu(_ref_conv(x_nhwc, p["enc_w1"], p["enc_b1"], 2, 1))
    x = jax.nn.relu(_ref_conv(x, p["enc_w2"], p["enc_b2"], 2, 1))
    x = _ref_conv(x, p["enc_w3"], p["enc_b3"], 1, 1)
    x = ref_residual_stack(x, p["enc_rw1"], p["enc_rw2"])
    return _ref_conv(x, p["pre_vq_w"], p["pre_vq_b"], 1, 0)


def ref_vq(z_e_nhwc, embedding, commitment_cost):
    n, h, w, d = z_e_nhwc.shape
    flat = z_e_nhwc.reshape(-1, d).astype(jnp.float32)
    dist = (jnp.sum(flat ** 2, 1, keepdims=True) + jnp.sum(embedding ** 2, 1)
            - 2.0 * flat @ embedding.T)
    idx = jnp.argmin(dist, axis=1)
    z_q = jnp.take(embedding, idx, axis=0)
    loss = commitment_cost * jnp.mean((z_q - flat) ** 2)
    counts = jnp.zeros((embedding.shape[0],), jnp.float32).at[idx].add(1.0)
    p_ = counts / flat.shape[0]
    perp = jnp.exp(-jnp.sum(p_ * jnp.log(p_ + 1e-10)))
    return loss, z_q.reshape(n, h, w, d), perp


def ref_decoder(z_q_nhwc, p):
    x = _ref_conv(z_q_nhwc, p["dec_w1"], p["dec_b1"], 1, 1)
    x = ref_residual_stack(x, p["dec_rw1"], p["dec_rw2"])
    x = jax.nn.relu(_ref_conv(x, p["dec_tw1"], p["dec_tb1"], 1, 2,
                              lhs_dilation=(2, 2)))
    return _ref_conv(x, p["dec_tw2"], p["dec_tb2"], 1, 2, lhs_dilation=(2, 2))


# ---------------------------------------------------------------------------
# Deterministic synthetic parameters (HWIO conv layout)
# ---------------------------------------------------------------------------
def init_params(key, in_channels, num_hiddens, num_residual_layers,
                num_residual_hiddens, num_embeddings, embedding_dim):
    def conv_w(k, kh, kw, cin, cout):
        scale = float(np.sqrt(2.0 / (kh * kw * cin)))
        return scale * jax.random.normal(k, (kh, kw, cin, cout), jnp.float32)

    def bias(k, c):
        return 0.05 * jax.random.normal(k, (c,), jnp.float32)

    keys = iter(jax.random.split(key, 64))
    nh2 = num_hiddens // 2
    p = {}
    p["enc_w1"] = conv_w(next(keys), 4, 4, in_channels, nh2)
    p["enc_b1"] = bias(next(keys), nh2)
    p["enc_w2"] = conv_w(next(keys), 4, 4, nh2, num_hiddens)
    p["enc_b2"] = bias(next(keys), num_hiddens)
    p["enc_w3"] = conv_w(next(keys), 3, 3, num_hiddens, num_hiddens)
    p["enc_b3"] = bias(next(keys), num_hiddens)
    p["enc_rw1"] = [conv_w(next(keys), 3, 3, num_hiddens, num_residual_hiddens)
                    for _ in range(num_residual_layers)]
    p["enc_rw2"] = [conv_w(next(keys), 1, 1, num_residual_hiddens, num_hiddens)
                    for _ in range(num_residual_layers)]
    p["pre_vq_w"] = conv_w(next(keys), 1, 1, num_hiddens, embedding_dim)
    p["pre_vq_b"] = bias(next(keys), embedding_dim)
    p["embedding"] = jax.random.normal(next(keys),
                                       (num_embeddings, embedding_dim),
                                       jnp.float32)
    p["dec_w1"] = conv_w(next(keys), 3, 3, embedding_dim, num_hiddens)
    p["dec_b1"] = bias(next(keys), num_hiddens)
    p["dec_rw1"] = [conv_w(next(keys), 3, 3, num_hiddens, num_residual_hiddens)
                    for _ in range(num_residual_layers)]
    p["dec_rw2"] = [conv_w(next(keys), 1, 1, num_residual_hiddens, num_hiddens)
                    for _ in range(num_residual_layers)]
    p["dec_tw1"] = conv_w(next(keys), 4, 4, num_hiddens, nh2)
    p["dec_tb1"] = bias(next(keys), nh2)
    p["dec_tw2"] = conv_w(next(keys), 4, 4, nh2, 3)
    p["dec_tb2"] = bias(next(keys), 3)
    return p


if __name__ == "__main__":
    batch, spatial = 2, 16
    num_hiddens, num_residual_layers, num_residual_hiddens = 32, 2, 8
    num_embeddings, embedding_dim = 32, 16
    commitment_cost = 0.25

    key = jax.random.PRNGKey(0)
    kx, kp = jax.random.split(key)
    x_nchw = jax.random.normal(kx, (batch, 3, spatial, spatial), jnp.float32)
    params = init_params(kp, 3, num_hiddens, num_residual_layers,
                         num_residual_hiddens, num_embeddings, embedding_dim)

    # Full VQ-VAE forward: (loss, x_recon, perplexity), matching VQVAE.forward
    # in eval mode.  TODO(synk): training-mode EMA codebook updates not done.
    loss, recon, perplexity = jax.jit(vqvae_forward)(x_nchw, params,
                                                     commitment_cost)
    loss, recon, perplexity = jax.block_until_ready((loss, recon, perplexity))
    assert recon.shape == (batch, 3, spatial, spatial), recon.shape
    assert np.isfinite(float(loss)) and np.isfinite(float(perplexity))
    assert np.all(np.isfinite(np.asarray(recon)))

    # ----- stage-wise correctness vs pure-JAX f32 reference -----------------
    x_nhwc = jnp.transpose(x_nchw, (0, 2, 3, 1))

    # encoder + pre-VQ conv (bf16 MXU inputs, f32 accumulate -> loose tol)
    z = encoder_forward(x_nhwc, params)
    z_e = _conv1x1(z, params["pre_vq_w"], params["pre_vq_b"])
    z_e_ref = ref_encoder_prevq(x_nhwc, params)
    np.testing.assert_allclose(np.asarray(z_e), np.asarray(z_e_ref),
                               rtol=1e-1, atol=1e-1)

    # vector quantizer (same z_e fed to both paths)
    l_p, zq_p, perp_p, _ = vq_forward(z_e, params["embedding"],
                                      commitment_cost)
    l_r, zq_r, perp_r = ref_vq(z_e, params["embedding"], commitment_cost)
    np.testing.assert_allclose(np.asarray(zq_p), np.asarray(zq_r),
                               rtol=1e-5, atol=1e-5)
    np.testing.assert_allclose(float(l_p), float(l_r), rtol=1e-4, atol=1e-6)
    np.testing.assert_allclose(float(perp_p), float(perp_r),
                               rtol=1e-4, atol=1e-6)

    # decoder (same quantized latent fed to both paths)
    recon_p = decoder_forward(zq_p, params)
    recon_r = ref_decoder(zq_p, params)
    np.testing.assert_allclose(np.asarray(recon_p), np.asarray(recon_r),
                               rtol=1e-1, atol=1e-1)

    print("KERNEL_OK")
</pallas_src>

<mosaic_0001>
module attributes {stable_mosaic.version = 11 : i64} {
  func.func private @main(%arg0: i32) attributes {dimension_semantics = [#tpu.dimension_semantics<core_parallel>], iteration_bounds = array<i64: 2>, tpu.core_type = #tpu.core_type<sc_scalar_subcore>, window_params = []} {
    return
  }
}

module attributes {stable_mosaic.version = 11 : i64} {
  func.func private @main(%arg0: i32) attributes {dimension_semantics = [#tpu.dimension_semantics<core_parallel>], iteration_bounds = array<i64: 2>, tpu.core_type = #tpu.core_type<sc_scalar_subcore>, window_params = []} {
    return
  }
}

module attributes {stable_mosaic.version = 11 : i64} {
  func.func @_gemm_kernel(%arg0: i32, %arg1: i32, %arg2: i32, %arg3: memref<128x128xbf16, #tpu.memory_space<vmem>>, %arg4: memref<128x128xbf16, #tpu.memory_space<vmem>>, %arg5: memref<1x128xf32, #tpu.memory_space<vmem>>, %arg6: memref<128x128xbf16, #tpu.memory_space<vmem>>, %arg7: memref<128x128xf32, #tpu.memory_space<vmem>>) attributes {dimension_semantics = [#tpu.dimension_semantics<parallel>, #tpu.dimension_semantics<parallel>, #tpu.dimension_semantics<arbitrary>], iteration_bounds = array<i64: 1, 1, 1>, scalar_prefetch = 0 : i64, scratch_operands = 1 : i64, tpu.core_type = #tpu.core_type<tc>, window_params = [{transform_indices = @transform_0, window_bounds = array<i64: 128, 128>}, {transform_indices = @transform_1, window_bounds = array<i64: 128, 128>}, {transform_indices = @transform_2, window_bounds = array<i64: 1, 128>}, {transform_indices = @transform_3, window_bounds = array<i64: 128, 128>}]} {
    %c0_i32 = arith.constant 0 : i32
    %0 = arith.cmpi eq, %arg2, %c0_i32 : i32
    %1 = arith.extui %0 : i1 to i32
    %c0_i32_0 = arith.constant 0 : i32
    %2 = arith.cmpi ne, %1, %c0_i32_0 : i32
    scf.if %2 {
      %cst_10 = arith.constant 0.000000e+00 : f32
      %12 = vector.broadcast %cst_10 : f32 to vector<128x128xf32>
      %c0_11 = arith.constant 0 : index
      %c0_12 = arith.constant 0 : index
      %13 = vector.load %arg7[%c0_11, %c0_12] : memref<128x128xf32, #tpu.memory_space<vmem>>, vector<128x128xf32>
      tpu.vector_store %arg7[%c0_11, %c0_12], %12 {strides = array<i32>} : memref<128x128xf32, #tpu.memory_space<vmem>>, vector<128x128xf32>,
    } else {
    }
    %c0 = arith.constant 0 : index
    %c0_1 = arith.constant 0 : index
    %3 = vector.load %arg7[%c0, %c0_1] : memref<128x128xf32, #tpu.memory_space<vmem>>, vector<128x128xf32>
    %c0_2 = arith.constant 0 : index
    %c0_3 = arith.constant 0 : index
    %4 = vector.load %arg3[%c0_2, %c0_3] : memref<128x128xbf16, #tpu.memory_space<vmem>>, vector<128x128xbf16>
    %c0_4 = arith.constant 0 : index
    %c0_5 = arith.constant 0 : index
    %5 = vector.load %arg4[%c0_4, %c0_5] : memref<128x128xbf16, #tpu.memory_space<vmem>>, vector<128x128xbf16>
    %cst = arith.constant dense<0.000000e+00> : vector<128x128xf32>
    %6 = tpu.matmul %4, %5, %cst {dimension_numbers = #tpu.dot_dimension_numbers<[1], [0], [0], [1], [0, 0, 1, 1], [], []>} : vector<128x128xbf16>, vector<128x128xbf16>, vector<128x128xf32> -> vector<128x128xf32>
    %7 = arith.addf %3, %6 : vector<128x128xf32>
    %c0_6 = arith.constant 0 : index
    %c0_7 = arith.constant 0 : index
    %8 = vector.load %arg7[%c0_6, %c0_7] : memref<128x128xf32, #tpu.memory_space<vmem>>, vector<128x128xf32>
    tpu.vector_store %arg7[%c0_6, %c0_7], %7 {strides = array<i32>} : memref<128x128xf32, #tpu.memory_space<vmem>>, vector<128x128xf32>,
    %c0_i32_8 = arith.constant 0 : i32
    %9 = arith.cmpi eq, %arg2, %c0_i32_8 : i32
    %10 = arith.extui %9 : i1 to i32
    %c0_i32_9 = arith.constant 0 : i32
    %11 = arith.cmpi ne, %10, %c0_i32_9 : i32
    scf.if %11 {
      %c0_10 = arith.constant 0 : index
      %c0_11 = arith.constant 0 : index
      %12 = vector.load %arg7[%c0_10, %c0_11] : memref<128x128xf32, #tpu.memory_space<vmem>>, vector<128x128xf32>
      %c0_12 = arith.constant 0 : index
      %c0_13 = arith.constant 0 : index
      %13 = vector.load %arg5[%c0_12, %c0_13] : memref<1x128xf32, #tpu.memory_space<vmem>>, vector<1x128xf32>
      %14 = vector.broadcast %13 : vector<1x128xf32> to vector<128x128xf32>
      %15 = arith.addf %12, %14 : vector<128x128xf32>
      %cst_14 = arith.constant 0.000000e+00 : f32
      %16 = vector.broadcast %cst_14 : f32 to vector<128x128xf32>
      %17 = arith.maximumf %15, %16 : vector<128x128xf32>
      %18 = arith.truncf %17 : vector<128x128xf32> to vector<128x128xbf16>
      %c0_15 = arith.constant 0 : index
      %c0_16 = arith.constant 0 : index
      %19 = vector.load %arg6[%c0_15, %c0_16] : memref<128x128xbf16, #tpu.memory_space<vmem>>, vector<128x128xbf16>
      tpu.vector_store %arg6[%c0_15, %c0_16], %18 {strides = array<i32>} : memref<128x128xbf16, #tpu.memory_space<vmem>>, vector<128x128xbf16>,
    } else {
    }
    return
  }
  func.func @transform_0(%arg0: i32, %arg1: i32, %arg2: i32) -> (i32, i32) {
    %c0_i32 = arith.constant 0 : i32
    return %arg0, %arg2 : i32, i32
  }
  func.func @transform_1(%arg0: i32, %arg1: i32, %arg2: i32) -> (i32, i32) {
    %c0_i32 = arith.constant 0 : i32
    return %arg2, %arg1 : i32, i32
  }
  func.func @transform_2(%arg0: i32, %arg1: i32, %arg2: i32) -> (i32, i32) {
    %c0_i32 = arith.constant 0 : i32
    %c0_i32_0 = arith.constant 0 : i32
    return %c0_i32, %arg1 : i32, i32
  }
  func.func @transform_3(%arg0: i32, %arg1: i32, %arg2: i32) -> (i32, i32) {
    %c0_i32 = arith.constant 0 : i32
    return %arg0, %arg1 : i32, i32
  }
}

module attributes {stable_mosaic.version = 11 : i64} {
  func.func @_gemm_kernel(%arg0: i32, %arg1: i32, %arg2: i32, %arg3: memref<32x256xbf16, #tpu.memory_space<vmem>>, %arg4: memref<256x128xbf16, #tpu.memory_space<vmem>>, %arg5: memref<1x128xf32, #tpu.memory_space<vmem>>, %arg6: memref<32x128xbf16, #tpu.memory_space<vmem>>, %arg7: memref<32x128xf32, #tpu.memory_space<vmem>>) attributes {dimension_semantics = [#tpu.dimension_semantics<parallel>, #tpu.dimension_semantics<parallel>, #tpu.dimension_semantics<arbitrary>], iteration_bounds = array<i64: 1, 1, 1>, scalar_prefetch = 0 : i64, scratch_operands = 1 : i64, tpu.core_type = #tpu.core_type<tc>, window_params = [{transform_indices = @transform_0, window_bounds = array<i64: 32, 256>}, {transform_indices = @transform_1, window_bounds = array<i64: 256, 128>}, {transform_indices = @transform_2, window_bounds = array<i64: 1, 128>}, {transform_indices = @transform_3, window_bounds = array<i64: 32, 128>}]} {
    %c0_i32 = arith.constant 0 : i32
    %0 = arith.cmpi eq, %arg2, %c0_i32 : i32
    %1 = arith.extui %0 : i1 to i32
    %c0_i32_0 = arith.constant 0 : i32
    %2 = arith.cmpi ne, %1, %c0_i32_0 : i32
    scf.if %2 {
      %cst_10 = arith.constant 0.000000e+00 : f32
      %12 = vector.broadcast %cst_10 : f32 to vector<32x128xf32>
      %c0_11 = arith.constant 0 : index
      %c0_12 = arith.constant 0 : index
      %13 = vector.load %arg7[%c0_11, %c0_12] : memref<32x128xf32, #tpu.memory_space<vmem>>, vector<32x128xf32>
      tpu.vector_store %arg7[%c0_11, %c0_12], %12 {strides = array<i32>} : memref<32x128xf32, #tpu.memory_space<vmem>>, vector<32x128xf32>,
    } else {
    }
    %c0 = arith.constant 0 : index
    %c0_1 = arith.constant 0 : index
    %3 = vector.load %arg7[%c0, %c0_1] : memref<32x128xf32, #tpu.memory_space<vmem>>, vector<32x128xf32>
    %c0_2 = arith.constant 0 : index
    %c0_3 = arith.constant 0 : index
    %4 = vector.load %arg3[%c0_2, %c0_3] : memref<32x256xbf16, #tpu.memory_space<vmem>>, vector<32x256xbf16>
    %c0_4 = arith.constant 0 : index
    %c0_5 = arith.constant 0 : index
    %5 = vector.load %arg4[%c0_4, %c0_5] : memref<256x128xbf16, #tpu.memory_space<vmem>>, vector<256x128xbf16>
    %cst = arith.constant dense<0.000000e+00> : vector<32x128xf32>
    %6 = tpu.matmul %4, %5, %cst {dimension_numbers = #tpu.dot_dimension_numbers<[1], [0], [0], [1], [0, 0, 1, 1], [], []>} : vector<32x256xbf16>, vector<256x128xbf16>, vector<32x128xf32> -> vector<32x128xf32>
    %7 = arith.addf %3, %6 : vector<32x128xf32>
    %c0_6 = arith.constant 0 : index
    %c0_7 = arith.constant 0 : index
    %8 = vector.load %arg7[%c0_6, %c0_7] : memref<32x128xf32, #tpu.memory_space<vmem>>, vector<32x128xf32>
    tpu.vector_store %arg7[%c0_6, %c0_7], %7 {strides = array<i32>} : memref<32x128xf32, #tpu.memory_space<vmem>>, vector<32x128xf32>,
    %c0_i32_8 = arith.constant 0 : i32
    %9 = arith.cmpi eq, %arg2, %c0_i32_8 : i32
    %10 = arith.extui %9 : i1 to i32
    %c0_i32_9 = arith.constant 0 : i32
    %11 = arith.cmpi ne, %10, %c0_i32_9 : i32
    scf.if %11 {
      %c0_10 = arith.constant 0 : index
      %c0_11 = arith.constant 0 : index
      %12 = vector.load %arg7[%c0_10, %c0_11] : memref<32x128xf32, #tpu.memory_space<vmem>>, vector<32x128xf32>
      %c0_12 = arith.constant 0 : index
      %c0_13 = arith.constant 0 : index
      %13 = vector.load %arg5[%c0_12, %c0_13] : memref<1x128xf32, #tpu.memory_space<vmem>>, vector<1x128xf32>
      %14 = vector.broadcast %13 : vector<1x128xf32> to vector<32x128xf32>
      %15 = arith.addf %12, %14 : vector<32x128xf32>
      %cst_14 = arith.constant 0.000000e+00 : f32
      %16 = vector.broadcast %cst_14 : f32 to vector<32x128xf32>
      %17 = arith.maximumf %15, %16 : vector<32x128xf32>
      %18 = arith.truncf %17 : vector<32x128xf32> to vector<32x128xbf16>
      %c0_15 = arith.constant 0 : index
      %c0_16 = arith.constant 0 : index
      %19 = vector.load %arg6[%c0_15, %c0_16] : memref<32x128xbf16, #tpu.memory_space<vmem>>, vector<32x128xbf16>
      tpu.vector_store %arg6[%c0_15, %c0_16], %18 {strides = array<i32>} : memref<32x128xbf16, #tpu.memory_space<vmem>>, vector<32x128xbf16>,
    } else {
    }
    return
  }
  func.func @transform_0(%arg0: i32, %arg1: i32, %arg2: i32) -> (i32, i32) {
    %c0_i32 = arith.constant 0 : i32
    return %arg0, %arg2 : i32, i32
  }
  func.func @transform_1(%arg0: i32, %arg1: i32, %arg2: i32) -> (i32, i32) {
    %c0_i32 = arith.constant 0 : i32
    return %arg2, %arg1 : i32, i32
  }
  func.func @transform_2(%arg0: i32, %arg1: i32, %arg2: i32) -> (i32, i32) {
    %c0_i32 = arith.constant 0 : i32
    %c0_i32_0 = arith.constant 0 : i32
    return %c0_i32, %arg1 : i32, i32
  }
  func.func @transform_3(%arg0: i32, %arg1: i32, %arg2: i32) -> (i32, i32) {
    %c0_i32 = arith.constant 0 : i32
    return %arg0, %arg1 : i32, i32
  }
}

module attributes {stable_mosaic.version = 11 : i64} {
  func.func @_gemm_kernel(%arg0: i32, %arg1: i32, %arg2: i32, %arg3: memref<32x384xbf16, #tpu.memory_space<vmem>>, %arg4: memref<384x128xbf16, #tpu.memory_space<vmem>>, %arg5: memref<1x128xf32, #tpu.memory_space<vmem>>, %arg6: memref<32x128xf32, #tpu.memory_space<vmem>>, %arg7: memref<32x128xbf16, #tpu.memory_space<vmem>>, %arg8: memref<32x128xf32, #tpu.memory_space<vmem>>) attributes {dimension_semantics = [#tpu.dimension_semantics<parallel>, #tpu.dimension_semantics<parallel>, #tpu.dimension_semantics<arbitrary>], iteration_bounds = array<i64: 1, 1, 1>, scalar_prefetch = 0 : i64, scratch_operands = 1 : i64, tpu.core_type = #tpu.core_type<tc>, window_params = [{transform_indices = @transform_0, window_bounds = array<i64: 32, 384>}, {transform_indices = @transform_1, window_bounds = array<i64: 384, 128>}, {transform_indices = @transform_2, window_bounds = array<i64: 1, 128>}, {transform_indices = @transform_3, window_bounds = array<i64: 32, 128>}, {transform_indices = @transform_4, window_bounds = array<i64: 32, 128>}]} {
    %c0_i32 = arith.constant 0 : i32
    %0 = arith.cmpi eq, %arg2, %c0_i32 : i32
    %1 = arith.extui %0 : i1 to i32
    %c0_i32_0 = arith.constant 0 : i32
    %2 = arith.cmpi ne, %1, %c0_i32_0 : i32
    scf.if %2 {
      %cst_10 = arith.constant 0.000000e+00 : f32
      %12 = vector.broadcast %cst_10 : f32 to vector<32x128xf32>
      %c0_11 = arith.constant 0 : index
      %c0_12 = arith.constant 0 : index
      %13 = vector.load %arg8[%c0_11, %c0_12] : memref<32x128xf32, #tpu.memory_space<vmem>>, vector<32x128xf32>
      tpu.vector_store %arg8[%c0_11, %c0_12], %12 {strides = array<i32>} : memref<32x128xf32, #tpu.memory_space<vmem>>, vector<32x128xf32>,
    } else {
    }
    %c0 = arith.constant 0 : index
    %c0_1 = arith.constant 0 : index
    %3 = vector.load %arg8[%c0, %c0_1] : memref<32x128xf32, #tpu.memory_space<vmem>>, vector<32x128xf32>
    %c0_2 = arith.constant 0 : index
    %c0_3 = arith.constant 0 : index
    %4 = vector.load %arg3[%c0_2, %c0_3] : memref<32x384xbf16, #tpu.memory_space<vmem>>, vector<32x384xbf16>
    %c0_4 = arith.constant 0 : index
    %c0_5 = arith.constant 0 : index
    %5 = vector.load %arg4[%c0_4, %c0_5] : memref<384x128xbf16, #tpu.memory_space<vmem>>, vector<384x128xbf16>
    %cst = arith.constant dense<0.000000e+00> : vector<32x128xf32>
    %6 = tpu.matmul %4, %5, %cst {dimension_numbers = #tpu.dot_dimension_numbers<[1], [0], [0], [1], [0, 0, 1, 1], [], []>} : vector<32x384xbf16>, vector<384x128xbf16>, vector<32x128xf32> -> vector<32x128xf32>
    %7 = arith.addf %3, %6 : vector<32x128xf32>
    %c0_6 = arith.constant 0 : index
    %c0_7 = arith.constant 0 : index
    %8 = vector.load %arg8[%c0_6, %c0_7] : memref<32x128xf32, #tpu.memory_space<vmem>>, vector<32x128xf32>
    tpu.vector_store %arg8[%c0_6, %c0_7], %7 {strides = array<i32>} : memref<32x128xf32, #tpu.memory_space<vmem>>, vector<32x128xf32>,
    %c0_i32_8 = arith.constant 0 : i32
    %9 = arith.cmpi eq, %arg2, %c0_i32_8 : i32
    %10 = arith.extui %9 : i1 to i32
    %c0_i32_9 = arith.constant 0 : i32
    %11 = arith.cmpi ne, %10, %c0_i32_9 : i32
    scf.if %11 {
      %c0_10 = arith.constant 0 : index
      %c0_11 = arith.constant 0 : index
      %12 = vector.load %arg8[%c0_10, %c0_11] : memref<32x128xf32, #tpu.memory_space<vmem>>, vector<32x128xf32>
      %c0_12 = arith.constant 0 : index
      %c0_13 = arith.constant 0 : index
      %13 = vector.load %arg5[%c0_12, %c0_13] : memref<1x128xf32, #tpu.memory_space<vmem>>, vector<1x128xf32>
      %14 = vector.broadcast %13 : vector<1x128xf32> to vector<32x128xf32>
      %15 = arith.addf %12, %14 : vector<32x128xf32>
      %c0_14 = arith.constant 0 : index
      %c0_15 = arith.constant 0 : index
      %16 = vector.load %arg6[%c0_14, %c0_15] : memref<32x128xf32, #tpu.memory_space<vmem>>, vector<32x128xf32>
      tpu.vector_store %arg6[%c0_14, %c0_15], %15 {strides = array<i32>} : memref<32x128xf32, #tpu.memory_space<vmem>>, vector<32x128xf32>,
      %cst_16 = arith.constant 0.000000e+00 : f32
      %17 = vector.broadcast %cst_16 : f32 to vector<32x128xf32>
      %18 = arith.maximumf %15, %17 : vector<32x128xf32>
      %19 = arith.truncf %18 : vector<32x128xf32> to vector<32x128xbf16>
      %c0_17 = arith.constant 0 : index
      %c0_18 = arith.constant 0 : index
      %20 = vector.load %arg7[%c0_17, %c0_18] : memref<32x128xbf16, #tpu.memory_space<vmem>>, vector<32x128xbf16>
      tpu.vector_store %arg7[%c0_17, %c0_18], %19 {strides = array<i32>} : memref<32x128xbf16, #tpu.memory_space<vmem>>, vector<32x128xbf16>,
    } else {
    }
    return
  }
  func.func @transform_0(%arg0: i32, %arg1: i32, %arg2: i32) -> (i32, i32) {
    %c0_i32 = arith.constant 0 : i32
    return %arg0, %arg2 : i32, i32
  }
  func.func @transform_1(%arg0: i32, %arg1: i32, %arg2: i32) -> (i32, i32) {
    %c0_i32 = arith.constant 0 : i32
    return %arg2, %arg1 : i32, i32
  }
  func.func @transform_2(%arg0: i32, %arg1: i32, %arg2: i32) -> (i32, i32) {
    %c0_i32 = arith.constant 0 : i32
    %c0_i32_0 = arith.constant 0 : i32
    return %c0_i32, %arg1 : i32, i32
  }
  func.func @transform_3(%arg0: i32, %arg1: i32, %arg2: i32) -> (i32, i32) {
    %c0_i32 = arith.constant 0 : i32
    return %arg0, %arg1 : i32, i32
  }
  func.func @transform_4(%arg0: i32, %arg1: i32, %arg2: i32) -> (i32, i32) {
    %c0_i32 = arith.constant 0 : i32
    return %arg0, %arg1 : i32, i32
  }
}

module attributes {stable_mosaic.version = 11 : i64} {
  func.func @_res_layer_kernel(%arg0: i32, %arg1: i32, %arg2: memref<32x384xbf16, #tpu.memory_space<vmem>>, %arg3: memref<384x128xbf16, #tpu.memory_space<vmem>>, %arg4: memref<128x128xbf16, #tpu.memory_space<vmem>>, %arg5: memref<32x128xf32, #tpu.memory_space<vmem>>, %arg6: memref<32x128xbf16, #tpu.memory_space<vmem>>, %arg7: memref<32x128xf32, #tpu.memory_space<vmem>>) attributes {dimension_semantics = [#tpu.dimension_semantics<parallel>, #tpu.dimension_semantics<arbitrary>], iteration_bounds = array<i64: 1, 1>, scalar_prefetch = 0 : i64, scratch_operands = 1 : i64, tpu.core_type = #tpu.core_type<tc>, window_params = [{transform_indices = @transform_0, window_bounds = array<i64: 32, 384>}, {transform_indices = @transform_1, window_bounds = array<i64: 384, 128>}, {pipeline_mode = #tpu.pipeline_mode<synchronous>, transform_indices = @transform_2, window_bounds = array<i64: 128, 128>}, {transform_indices = @transform_3, window_bounds = array<i64: 32, 128>}, {transform_indices = @transform_4, window_bounds = array<i64: 32, 128>}]} {
    %c0_i32 = arith.constant 0 : i32
    %0 = arith.cmpi eq, %arg1, %c0_i32 : i32
    %1 = arith.extui %0 : i1 to i32
    %c0_i32_0 = arith.constant 0 : i32
    %2 = arith.cmpi ne, %1, %c0_i32_0 : i32
    scf.if %2 {
      %cst_10 = arith.constant 0.000000e+00 : f32
      %12 = vector.broadcast %cst_10 : f32 to vector<32x128xf32>
      %c0_11 = arith.constant 0 : index
      %c0_12 = arith.constant 0 : index
      %13 = vector.load %arg7[%c0_11, %c0_12] : memref<32x128xf32, #tpu.memory_space<vmem>>, vector<32x128xf32>
      tpu.vector_store %arg7[%c0_11, %c0_12], %12 {strides = array<i32>} : memref<32x128xf32, #tpu.memory_space<vmem>>, vector<32x128xf32>,
    } else {
    }
    %c0 = arith.constant 0 : index
    %c0_1 = arith.constant 0 : index
    %3 = vector.load %arg7[%c0, %c0_1] : memref<32x128xf32, #tpu.memory_space<vmem>>, vector<32x128xf32>
    %c0_2 = arith.constant 0 : index
    %c0_3 = arith.constant 0 : index
    %4 = vector.load %arg2[%c0_2, %c0_3] : memref<32x384xbf16, #tpu.memory_space<vmem>>, vector<32x384xbf16>
    %c0_4 = arith.constant 0 : index
    %c0_5 = arith.constant 0 : index
    %5 = vector.load %arg3[%c0_4, %c0_5] : memref<384x128xbf16, #tpu.memory_space<vmem>>, vector<384x128xbf16>
    %cst = arith.constant dense<0.000000e+00> : vector<32x128xf32>
    %6 = tpu.matmul %4, %5, %cst {dimension_numbers = #tpu.dot_dimension_numbers<[1], [0], [0], [1], [0, 0, 1, 1], [], []>} : vector<32x384xbf16>, vector<384x128xbf16>, vector<32x128xf32> -> vector<32x128xf32>
    %7 = arith.addf %3, %6 : vector<32x128xf32>
    %c0_6 = arith.constant 0 : index
    %c0_7 = arith.constant 0 : index
    %8 = vector.load %arg7[%c0_6, %c0_7] : memref<32x128xf32, #tpu.memory_space<vmem>>, vector<32x128xf32>
    tpu.vector_store %arg7[%c0_6, %c0_7], %7 {strides = array<i32>} : memref<32x128xf32, #tpu.memory_space<vmem>>, vector<32x128xf32>,
    %c0_i32_8 = arith.constant 0 : i32
    %9 = arith.cmpi eq, %arg1, %c0_i32_8 : i32
    %10 = arith.extui %9 : i1 to i32
    %c0_i32_9 = arith.constant 0 : i32
    %11 = arith.cmpi ne, %10, %c0_i32_9 : i32
    scf.if %11 {
      %c0_10 = arith.constant 0 : index
      %c0_11 = arith.constant 0 : index
      %12 = vector.load %arg7[%c0_10, %c0_11] : memref<32x128xf32, #tpu.memory_space<vmem>>, vector<32x128xf32>
      %cst_12 = arith.constant 0.000000e+00 : f32
      %13 = vector.broadcast %cst_12 : f32 to vector<32x128xf32>
      %14 = arith.maximumf %12, %13 : vector<32x128xf32>
      %15 = arith.truncf %14 : vector<32x128xf32> to vector<32x128xbf16>
      %c0_13 = arith.constant 0 : index
      %c0_14 = arith.constant 0 : index
      %16 = vector.load %arg5[%c0_13, %c0_14] : memref<32x128xf32, #tpu.memory_space<vmem>>, vector<32x128xf32>
      %c0_15 = arith.constant 0 : index
      %c0_16 = arith.constant 0 : index
      %17 = vector.load %arg4[%c0_15, %c0_16] : memref<128x128xbf16, #tpu.memory_space<vmem>>, vector<128x128xbf16>
      %cst_17 = arith.constant dense<0.000000e+00> : vector<32x128xf32>
      %18 = tpu.matmul %15, %17, %cst_17 {dimension_numbers = #tpu.dot_dimension_numbers<[1], [0], [0], [1], [0, 0, 1, 1], [], []>} : vector<32x128xbf16>, vector<128x128xbf16>, vector<32x128xf32> -> vector<32x128xf32>
      %19 = arith.addf %16, %18 : vector<32x128xf32>
      %cst_18 = arith.constant 0.000000e+00 : f32
      %20 = vector.broadcast %cst_18 : f32 to vector<32x128xf32>
      %21 = arith.maximumf %19, %20 : vector<32x128xf32>
      %22 = arith.truncf %21 : vector<32x128xf32> to vector<32x128xbf16>
      %c0_19 = arith.constant 0 : index
      %c0_20 = arith.constant 0 : index
      %23 = vector.load %arg6[%c0_19, %c0_20] : memref<32x128xbf16, #tpu.memory_space<vmem>>, vector<32x128xbf16>
      tpu.vector_store %arg6[%c0_19, %c0_20], %22 {strides = array<i32>} : memref<32x128xbf16, #tpu.memory_space<vmem>>, vector<32x128xbf16>,
    } else {
    }
    return
  }
  func.func @transform_0(%arg0: i32, %arg1: i32) -> (i32, i32) {
    %c0_i32 = arith.constant 0 : i32
    return %arg0, %arg1 : i32, i32
  }
  func.func @transform_1(%arg0: i32, %arg1: i32) -> (i32, i32) {
    %c0_i32 = arith.constant 0 : i32
    %c0_i32_0 = arith.constant 0 : i32
    return %arg1, %c0_i32 : i32, i32
  }
  func.func @transform_2(%arg0: i32, %arg1: i32) -> (i32, i32) {
    %c0_i32 = arith.constant 0 : i32
    %c0_i32_0 = arith.constant 0 : i32
    %c0_i32_1 = arith.constant 0 : i32
    return %c0_i32, %c0_i32_0 : i32, i32
  }
  func.func @transform_3(%arg0: i32, %arg1: i32) -> (i32, i32) {
    %c0_i32 = arith.constant 0 : i32
    %c0_i32_0 = arith.constant 0 : i32
    return %arg0, %c0_i32 : i32, i32
  }
  func.func @transform_4(%arg0: i32, %arg1: i32) -> (i32, i32) {
    %c0_i32 = arith.constant 0 : i32
    %c0_i32_0 = arith.constant 0 : i32
    return %arg0, %c0_i32 : i32, i32
  }
}

module attributes {stable_mosaic.version = 11 : i64} {
  func.func @_res_layer_kernel(%arg0: i32, %arg1: i32, %arg2: memref<32x384xbf16, #tpu.memory_space<vmem>>, %arg3: memref<384x128xbf16, #tpu.memory_space<vmem>>, %arg4: memref<128x128xbf16, #tpu.memory_space<vmem>>, %arg5: memref<32x128xf32, #tpu.memory_space<vmem>>, %arg6: memref<32x128xf32, #tpu.memory_space<vmem>>, %arg7: memref<32x128xbf16, #tpu.memory_space<vmem>>, %arg8: memref<32x128xf32, #tpu.memory_space<vmem>>) attributes {dimension_semantics = [#tpu.dimension_semantics<parallel>, #tpu.dimension_semantics<arbitrary>], iteration_bounds = array<i64: 1, 1>, scalar_prefetch = 0 : i64, scratch_operands = 1 : i64, tpu.core_type = #tpu.core_type<tc>, window_params = [{transform_indices = @transform_0, window_bounds = array<i64: 32, 384>}, {transform_indices = @transform_1, window_bounds = array<i64: 384, 128>}, {pipeline_mode = #tpu.pipeline_mode<synchronous>, transform_indices = @transform_2, window_bounds = array<i64: 128, 128>}, {transform_indices = @transform_3, window_bounds = array<i64: 32, 128>}, {transform_indices = @transform_4, window_bounds = array<i64: 32, 128>}, {transform_indices = @transform_5, window_bounds = array<i64: 32, 128>}]} {
    %c0_i32 = arith.constant 0 : i32
    %0 = arith.cmpi eq, %arg1, %c0_i32 : i32
    %1 = arith.extui %0 : i1 to i32
    %c0_i32_0 = arith.constant 0 : i32
    %2 = arith.cmpi ne, %1, %c0_i32_0 : i32
    scf.if %2 {
      %cst_10 = arith.constant 0.000000e+00 : f32
      %12 = vector.broadcast %cst_10 : f32 to vector<32x128xf32>
      %c0_11 = arith.constant 0 : index
      %c0_12 = arith.constant 0 : index
      %13 = vector.load %arg8[%c0_11, %c0_12] : memref<32x128xf32, #tpu.memory_space<vmem>>, vector<32x128xf32>
      tpu.vector_store %arg8[%c0_11, %c0_12], %12 {strides = array<i32>} : memref<32x128xf32, #tpu.memory_space<vmem>>, vector<32x128xf32>,
    } else {
    }
    %c0 = arith.constant 0 : index
    %c0_1 = arith.constant 0 : index
    %3 = vector.load %arg8[%c0, %c0_1] : memref<32x128xf32, #tpu.memory_space<vmem>>, vector<32x128xf32>
    %c0_2 = arith.constant 0 : index
    %c0_3 = arith.constant 0 : index
    %4 = vector.load %arg2[%c0_2, %c0_3] : memref<32x384xbf16, #tpu.memory_space<vmem>>, vector<32x384xbf16>
    %c0_4 = arith.constant 0 : index
    %c0_5 = arith.constant 0 : index
    %5 = vector.load %arg3[%c0_4, %c0_5] : memref<384x128xbf16, #tpu.memory_space<vmem>>, vector<384x128xbf16>
    %cst = arith.constant dense<0.000000e+00> : vector<32x128xf32>
    %6 = tpu.matmul %4, %5, %cst {dimension_numbers = #tpu.dot_dimension_numbers<[1], [0], [0], [1], [0, 0, 1, 1], [], []>} : vector<32x384xbf16>, vector<384x128xbf16>, vector<32x128xf32> -> vector<32x128xf32>
    %7 = arith.addf %3, %6 : vector<32x128xf32>
    %c0_6 = arith.constant 0 : index
    %c0_7 = arith.constant 0 : index
    %8 = vector.load %arg8[%c0_6, %c0_7] : memref<32x128xf32, #tpu.memory_space<vmem>>, vector<32x128xf32>
    tpu.vector_store %arg8[%c0_6, %c0_7], %7 {strides = array<i32>} : memref<32x128xf32, #tpu.memory_space<vmem>>, vector<32x128xf32>,
    %c0_i32_8 = arith.constant 0 : i32
    %9 = arith.cmpi eq, %arg1, %c0_i32_8 : i32
    %10 = arith.extui %9 : i1 to i32
    %c0_i32_9 = arith.constant 0 : i32
    %11 = arith.cmpi ne, %10, %c0_i32_9 : i32
    scf.if %11 {
      %c0_10 = arith.constant 0 : index
      %c0_11 = arith.constant 0 : index
      %12 = vector.load %arg8[%c0_10, %c0_11] : memref<32x128xf32, #tpu.memory_space<vmem>>, vector<32x128xf32>
      %cst_12 = arith.constant 0.000000e+00 : f32
      %13 = vector.broadcast %cst_12 : f32 to vector<32x128xf32>
      %14 = arith.maximumf %12, %13 : vector<32x128xf32>
      %15 = arith.truncf %14 : vector<32x128xf32> to vector<32x128xbf16>
      %c0_13 = arith.constant 0 : index
      %c0_14 = arith.constant 0 : index
      %16 = vector.load %arg5[%c0_13, %c0_14] : memref<32x128xf32, #tpu.memory_space<vmem>>, vector<32x128xf32>
      %c0_15 = arith.constant 0 : index
      %c0_16 = arith.constant 0 : index
      %17 = vector.load %arg4[%c0_15, %c0_16] : memref<128x128xbf16, #tpu.memory_space<vmem>>, vector<128x128xbf16>
      %cst_17 = arith.constant dense<0.000000e+00> : vector<32x128xf32>
      %18 = tpu.matmul %15, %17, %cst_17 {dimension_numbers = #tpu.dot_dimension_numbers<[1], [0], [0], [1], [0, 0, 1, 1], [], []>} : vector<32x128xbf16>, vector<128x128xbf16>, vector<32x128xf32> -> vector<32x128xf32>
      %19 = arith.addf %16, %18 : vector<32x128xf32>
      %c0_18 = arith.constant 0 : index
      %c0_19 = arith.constant 0 : index
      %20 = vector.load %arg6[%c0_18, %c0_19] : memref<32x128xf32, #tpu.memory_space<vmem>>, vector<32x128xf32>
      tpu.vector_store %arg6[%c0_18, %c0_19], %19 {strides = array<i32>} : memref<32x128xf32, #tpu.memory_space<vmem>>, vector<32x128xf32>,
      %cst_20 = arith.constant 0.000000e+00 : f32
      %21 = vector.broadcast %cst_20 : f32 to vector<32x128xf32>
      %22 = arith.maximumf %19, %21 : vector<32x128xf32>
      %23 = arith.truncf %22 : vector<32x128xf32> to vector<32x128xbf16>
      %c0_21 = arith.constant 0 : index
      %c0_22 = arith.constant 0 : index
      %24 = vector.load %arg7[%c0_21, %c0_22] : memref<32x128xbf16, #tpu.memory_space<vmem>>, vector<32x128xbf16>
      tpu.vector_store %arg7[%c0_21, %c0_22], %23 {strides = array<i32>} : memref<32x128xbf16, #tpu.memory_space<vmem>>, vector<32x128xbf16>,
    } else {
    }
    return
  }
  func.func @transform_0(%arg0: i32, %arg1: i32) -> (i32, i32) {
    %c0_i32 = arith.constant 0 : i32
    return %arg0, %arg1 : i32, i32
  }
  func.func @transform_1(%arg0: i32, %arg1: i32) -> (i32, i32) {
    %c0_i32 = arith.constant 0 : i32
    %c0_i32_0 = arith.constant 0 : i32
    return %arg1, %c0_i32 : i32, i32
  }
  func.func @transform_2(%arg0: i32, %arg1: i32) -> (i32, i32) {
    %c0_i32 = arith.constant 0 : i32
    %c0_i32_0 = arith.constant 0 : i32
    %c0_i32_1 = arith.constant 0 : i32
    return %c0_i32, %c0_i32_0 : i32, i32
  }
  func.func @transform_3(%arg0: i32, %arg1: i32) -> (i32, i32) {
    %c0_i32 = arith.constant 0 : i32
    %c0_i32_0 = arith.constant 0 : i32
    return %arg0, %c0_i32 : i32, i32
  }
  func.func @transform_4(%arg0: i32, %arg1: i32) -> (i32, i32) {
    %c0_i32 = arith.constant 0 : i32
    %c0_i32_0 = arith.constant 0 : i32
    return %arg0, %c0_i32 : i32, i32
  }
  func.func @transform_5(%arg0: i32, %arg1: i32) -> (i32, i32) {
    %c0_i32 = arith.constant 0 : i32
    %c0_i32_0 = arith.constant 0 : i32
    return %arg0, %c0_i32 : i32, i32
  }
}

module attributes {stable_mosaic.version = 11 : i64} {
  func.func @_gemm_kernel(%arg0: i32, %arg1: i32, %arg2: i32, %arg3: memref<32x128xbf16, #tpu.memory_space<vmem>>, %arg4: memref<128x128xbf16, #tpu.memory_space<vmem>>, %arg5: memref<1x128xf32, #tpu.memory_space<vmem>>, %arg6: memref<32x128xf32, #tpu.memory_space<vmem>>, %arg7: memref<32x128xf32, #tpu.memory_space<vmem>>) attributes {dimension_semantics = [#tpu.dimension_semantics<parallel>, #tpu.dimension_semantics<parallel>, #tpu.dimension_semantics<arbitrary>], iteration_bounds = array<i64: 1, 1, 1>, scalar_prefetch = 0 : i64, scratch_operands = 1 : i64, tpu.core_type = #tpu.core_type<tc>, window_params = [{transform_indices = @transform_0, window_bounds = array<i64: 32, 128>}, {transform_indices = @transform_1, window_bounds = array<i64: 128, 128>}, {transform_indices = @transform_2, window_bounds = array<i64: 1, 128>}, {transform_indices = @transform_3, window_bounds = array<i64: 32, 128>}]} {
    %c0_i32 = arith.constant 0 : i32
    %0 = arith.cmpi eq, %arg2, %c0_i32 : i32
    %1 = arith.extui %0 : i1 to i32
    %c0_i32_0 = arith.constant 0 : i32
    %2 = arith.cmpi ne, %1, %c0_i32_0 : i32
    scf.if %2 {
      %cst_10 = arith.constant 0.000000e+00 : f32
      %12 = vector.broadcast %cst_10 : f32 to vector<32x128xf32>
      %c0_11 = arith.constant 0 : index
      %c0_12 = arith.constant 0 : index
      %13 = vector.load %arg7[%c0_11, %c0_12] : memref<32x128xf32, #tpu.memory_space<vmem>>, vector<32x128xf32>
      tpu.vector_store %arg7[%c0_11, %c0_12], %12 {strides = array<i32>} : memref<32x128xf32, #tpu.memory_space<vmem>>, vector<32x128xf32>,
    } else {
    }
    %c0 = arith.constant 0 : index
    %c0_1 = arith.constant 0 : index
    %3 = vector.load %arg7[%c0, %c0_1] : memref<32x128xf32, #tpu.memory_space<vmem>>, vector<32x128xf32>
    %c0_2 = arith.constant 0 : index
    %c0_3 = arith.constant 0 : index
    %4 = vector.load %arg3[%c0_2, %c0_3] : memref<32x128xbf16, #tpu.memory_space<vmem>>, vector<32x128xbf16>
    %c0_4 = arith.constant 0 : index
    %c0_5 = arith.constant 0 : index
    %5 = vector.load %arg4[%c0_4, %c0_5] : memref<128x128xbf16, #tpu.memory_space<vmem>>, vector<128x128xbf16>
    %cst = arith.constant dense<0.000000e+00> : vector<32x128xf32>
    %6 = tpu.matmul %4, %5, %cst {dimension_numbers = #tpu.dot_dimension_numbers<[1], [0], [0], [1], [0, 0, 1, 1], [], []>} : vector<32x128xbf16>, vector<128x128xbf16>, vector<32x128xf32> -> vector<32x128xf32>
    %7 = arith.addf %3, %6 : vector<32x128xf32>
    %c0_6 = arith.constant 0 : index
    %c0_7 = arith.constant 0 : index
    %8 = vector.load %arg7[%c0_6, %c0_7] : memref<32x128xf32, #tpu.memory_space<vmem>>, vector<32x128xf32>
    tpu.vector_store %arg7[%c0_6, %c0_7], %7 {strides = array<i32>} : memref<32x128xf32, #tpu.memory_space<vmem>>, vector<32x128xf32>,
    %c0_i32_8 = arith.constant 0 : i32
    %9 = arith.cmpi eq, %arg2, %c0_i32_8 : i32
    %10 = arith.extui %9 : i1 to i32
    %c0_i32_9 = arith.constant 0 : i32
    %11 = arith.cmpi ne, %10, %c0_i32_9 : i32
    scf.if %11 {
      %c0_10 = arith.constant 0 : index
      %c0_11 = arith.constant 0 : index
      %12 = vector.load %arg7[%c0_10, %c0_11] : memref<32x128xf32, #tpu.memory_space<vmem>>, vector<32x128xf32>
      %c0_12 = arith.constant 0 : index
      %c0_13 = arith.constant 0 : index
      %13 = vector.load %arg5[%c0_12, %c0_13] : memref<1x128xf32, #tpu.memory_space<vmem>>, vector<1x128xf32>
      %14 = vector.broadcast %13 : vector<1x128xf32> to vector<32x128xf32>
      %15 = arith.addf %12, %14 : vector<32x128xf32>
      %c0_14 = arith.constant 0 : index
      %c0_15 = arith.constant 0 : index
      %16 = vector.load %arg6[%c0_14, %c0_15] : memref<32x128xf32, #tpu.memory_space<vmem>>, vector<32x128xf32>
      tpu.vector_store %arg6[%c0_14, %c0_15], %15 {strides = array<i32>} : memref<32x128xf32, #tpu.memory_space<vmem>>, vector<32x128xf32>,
    } else {
    }
    return
  }
  func.func @transform_0(%arg0: i32, %arg1: i32, %arg2: i32) -> (i32, i32) {
    %c0_i32 = arith.constant 0 : i32
    return %arg0, %arg2 : i32, i32
  }
  func.func @transform_1(%arg0: i32, %arg1: i32, %arg2: i32) -> (i32, i32) {
    %c0_i32 = arith.constant 0 : i32
    return %arg2, %arg1 : i32, i32
  }
  func.func @transform_2(%arg0: i32, %arg1: i32, %arg2: i32) -> (i32, i32) {
    %c0_i32 = arith.constant 0 : i32
    %c0_i32_0 = arith.constant 0 : i32
    return %c0_i32, %arg1 : i32, i32
  }
  func.func @transform_3(%arg0: i32, %arg1: i32, %arg2: i32) -> (i32, i32) {
    %c0_i32 = arith.constant 0 : i32
    return %arg0, %arg1 : i32, i32
  }
}

module attributes {stable_mosaic.version = 11 : i64} {
  func.func @_gemm_kernel(%arg0: i32, %arg1: i32, %arg2: i32, %arg3: memref<32x128xf32, #tpu.memory_space<vmem>>, %arg4: memref<128x128xf32, #tpu.memory_space<vmem>>, %arg5: memref<1x128xf32, #tpu.memory_space<vmem>>, %arg6: memref<32x128xf32, #tpu.memory_space<vmem>>, %arg7: memref<32x128xf32, #tpu.memory_space<vmem>>) attributes {dimension_semantics = [#tpu.dimension_semantics<parallel>, #tpu.dimension_semantics<parallel>, #tpu.dimension_semantics<arbitrary>], iteration_bounds = array<i64: 1, 1, 1>, scalar_prefetch = 0 : i64, scratch_operands = 1 : i64, tpu.core_type = #tpu.core_type<tc>, window_params = [{transform_indices = @transform_0, window_bounds = array<i64: 32, 128>}, {transform_indices = @transform_1, window_bounds = array<i64: 128, 128>}, {transform_indices = @transform_2, window_bounds = array<i64: 1, 128>}, {transform_indices = @transform_3, window_bounds = array<i64: 32, 128>}]} {
    %c0_i32 = arith.constant 0 : i32
    %0 = arith.cmpi eq, %arg2, %c0_i32 : i32
    %1 = arith.extui %0 : i1 to i32
    %c0_i32_0 = arith.constant 0 : i32
    %2 = arith.cmpi ne, %1, %c0_i32_0 : i32
    scf.if %2 {
      %cst_10 = arith.constant 0.000000e+00 : f32
      %12 = vector.broadcast %cst_10 : f32 to vector<32x128xf32>
      %c0_11 = arith.constant 0 : index
      %c0_12 = arith.constant 0 : index
      %13 = vector.load %arg7[%c0_11, %c0_12] : memref<32x128xf32, #tpu.memory_space<vmem>>, vector<32x128xf32>
      tpu.vector_store %arg7[%c0_11, %c0_12], %12 {strides = array<i32>} : memref<32x128xf32, #tpu.memory_space<vmem>>, vector<32x128xf32>,
    } else {
    }
    %c0 = arith.constant 0 : index
    %c0_1 = arith.constant 0 : index
    %3 = vector.load %arg7[%c0, %c0_1] : memref<32x128xf32, #tpu.memory_space<vmem>>, vector<32x128xf32>
    %c0_2 = arith.constant 0 : index
    %c0_3 = arith.constant 0 : index
    %4 = vector.load %arg3[%c0_2, %c0_3] : memref<32x128xf32, #tpu.memory_space<vmem>>, vector<32x128xf32>
    %c0_4 = arith.constant 0 : index
    %c0_5 = arith.constant 0 : index
    %5 = vector.load %arg4[%c0_4, %c0_5] : memref<128x128xf32, #tpu.memory_space<vmem>>, vector<128x128xf32>
    %cst = arith.constant dense<0.000000e+00> : vector<32x128xf32>
    %6 = tpu.matmul %4, %5, %cst {dimension_numbers = #tpu.dot_dimension_numbers<[1], [0], [0], [1], [0, 0, 1, 1], [], []>} : vector<32x128xf32>, vector<128x128xf32>, vector<32x128xf32> -> vector<32x128xf32>
    %7 = arith.addf %3, %6 : vector<32x128xf32>
    %c0_6 = arith.constant 0 : index
    %c0_7 = arith.constant 0 : index
    %8 = vector.load %arg7[%c0_6, %c0_7] : memref<32x128xf32, #tpu.memory_space<vmem>>, vector<32x128xf32>
    tpu.vector_store %arg7[%c0_6, %c0_7], %7 {strides = array<i32>} : memref<32x128xf32, #tpu.memory_space<vmem>>, vector<32x128xf32>,
    %c0_i32_8 = arith.constant 0 : i32
    %9 = arith.cmpi eq, %arg2, %c0_i32_8 : i32
    %10 = arith.extui %9 : i1 to i32
    %c0_i32_9 = arith.constant 0 : i32
    %11 = arith.cmpi ne, %10, %c0_i32_9 : i32
    scf.if %11 {
      %c0_10 = arith.constant 0 : index
      %c0_11 = arith.constant 0 : index
      %12 = vector.load %arg7[%c0_10, %c0_11] : memref<32x128xf32, #tpu.memory_space<vmem>>, vector<32x128xf32>
      %c0_12 = arith.constant 0 : index
      %c0_13 = arith.constant 0 : index
      %13 = vector.load %arg5[%c0_12, %c0_13] : memref<1x128xf32, #tpu.memory_space<vmem>>, vector<1x128xf32>
      %14 = vector.broadcast %13 : vector<1x128xf32> to vector<32x128xf32>
      %15 = arith.addf %12, %14 : vector<32x128xf32>
      %c0_14 = arith.constant 0 : index
      %c0_15 = arith.constant 0 : index
      %16 = vector.load %arg6[%c0_14, %c0_15] : memref<32x128xf32, #tpu.memory_space<vmem>>, vector<32x128xf32>
      tpu.vector_store %arg6[%c0_14, %c0_15], %15 {strides = array<i32>} : memref<32x128xf32, #tpu.memory_space<vmem>>, vector<32x128xf32>,
    } else {
    }
    return
  }
  func.func @transform_0(%arg0: i32, %arg1: i32, %arg2: i32) -> (i32, i32) {
    %c0_i32 = arith.constant 0 : i32
    return %arg0, %arg2 : i32, i32
  }
  func.func @transform_1(%arg0: i32, %arg1: i32, %arg2: i32) -> (i32, i32) {
    %c0_i32 = arith.constant 0 : i32
    return %arg2, %arg1 : i32, i32
  }
  func.func @transform_2(%arg0: i32, %arg1: i32, %arg2: i32) -> (i32, i32) {
    %c0_i32 = arith.constant 0 : i32
    %c0_i32_0 = arith.constant 0 : i32
    return %c0_i32, %arg1 : i32, i32
  }
  func.func @transform_3(%arg0: i32, %arg1: i32, %arg2: i32) -> (i32, i32) {
    %c0_i32 = arith.constant 0 : i32
    return %arg0, %arg1 : i32, i32
  }
}

module attributes {stable_mosaic.version = 11 : i64} {
  func.func @_gemm_kernel(%arg0: i32, %arg1: i32, %arg2: i32, %arg3: memref<32x256xbf16, #tpu.memory_space<vmem>>, %arg4: memref<256x128xbf16, #tpu.memory_space<vmem>>, %arg5: memref<1x128xf32, #tpu.memory_space<vmem>>, %arg6: memref<32x128xf32, #tpu.memory_space<vmem>>, %arg7: memref<32x128xbf16, #tpu.memory_space<vmem>>, %arg8: memref<32x128xf32, #tpu.memory_space<vmem>>) attributes {dimension_semantics = [#tpu.dimension_semantics<parallel>, #tpu.dimension_semantics<parallel>, #tpu.dimension_semantics<arbitrary>], iteration_bounds = array<i64: 1, 1, 1>, scalar_prefetch = 0 : i64, scratch_operands = 1 : i64, tpu.core_type = #tpu.core_type<tc>, window_params = [{transform_indices = @transform_0, window_bounds = array<i64: 32, 256>}, {transform_indices = @transform_1, window_bounds = array<i64: 256, 128>}, {transform_indices = @transform_2, window_bounds = array<i64: 1, 128>}, {transform_indices = @transform_3, window_bounds = array<i64: 32, 128>}, {transform_indices = @transform_4, window_bounds = array<i64: 32, 128>}]} {
    %c0_i32 = arith.constant 0 : i32
    %0 = arith.cmpi eq, %arg2, %c0_i32 : i32
    %1 = arith.extui %0 : i1 to i32
    %c0_i32_0 = arith.constant 0 : i32
    %2 = arith.cmpi ne, %1, %c0_i32_0 : i32
    scf.if %2 {
      %cst_10 = arith.constant 0.000000e+00 : f32
      %12 = vector.broadcast %cst_10 : f32 to vector<32x128xf32>
      %c0_11 = arith.constant 0 : index
      %c0_12 = arith.constant 0 : index
      %13 = vector.load %arg8[%c0_11, %c0_12] : memref<32x128xf32, #tpu.memory_space<vmem>>, vector<32x128xf32>
      tpu.vector_store %arg8[%c0_11, %c0_12], %12 {strides = array<i32>} : memref<32x128xf32, #tpu.memory_space<vmem>>, vector<32x128xf32>,
    } else {
    }
    %c0 = arith.constant 0 : index
    %c0_1 = arith.constant 0 : index
    %3 = vector.load %arg8[%c0, %c0_1] : memref<32x128xf32, #tpu.memory_space<vmem>>, vector<32x128xf32>
    %c0_2 = arith.constant 0 : index
    %c0_3 = arith.constant 0 : index
    %4 = vector.load %arg3[%c0_2, %c0_3] : memref<32x256xbf16, #tpu.memory_space<vmem>>, vector<32x256xbf16>
    %c0_4 = arith.constant 0 : index
    %c0_5 = arith.constant 0 : index
    %5 = vector.load %arg4[%c0_4, %c0_5] : memref<256x128xbf16, #tpu.memory_space<vmem>>, vector<256x128xbf16>
    %cst = arith.constant dense<0.000000e+00> : vector<32x128xf32>
    %6 = tpu.matmul %4, %5, %cst {dimension_numbers = #tpu.dot_dimension_numbers<[1], [0], [0], [1], [0, 0, 1, 1], [], []>} : vector<32x256xbf16>, vector<256x128xbf16>, vector<32x128xf32> -> vector<32x128xf32>
    %7 = arith.addf %3, %6 : vector<32x128xf32>
    %c0_6 = arith.constant 0 : index
    %c0_7 = arith.constant 0 : index
    %8 = vector.load %arg8[%c0_6, %c0_7] : memref<32x128xf32, #tpu.memory_space<vmem>>, vector<32x128xf32>
    tpu.vector_store %arg8[%c0_6, %c0_7], %7 {strides = array<i32>} : memref<32x128xf32, #tpu.memory_space<vmem>>, vector<32x128xf32>,
    %c0_i32_8 = arith.constant 0 : i32
    %9 = arith.cmpi eq, %arg2, %c0_i32_8 : i32
    %10 = arith.extui %9 : i1 to i32
    %c0_i32_9 = arith.constant 0 : i32
    %11 = arith.cmpi ne, %10, %c0_i32_9 : i32
    scf.if %11 {
      %c0_10 = arith.constant 0 : index
      %c0_11 = arith.constant 0 : index
      %12 = vector.load %arg8[%c0_10, %c0_11] : memref<32x128xf32, #tpu.memory_space<vmem>>, vector<32x128xf32>
      %c0_12 = arith.constant 0 : index
      %c0_13 = arith.constant 0 : index
      %13 = vector.load %arg5[%c0_12, %c0_13] : memref<1x128xf32, #tpu.memory_space<vmem>>, vector<1x128xf32>
      %14 = vector.broadcast %13 : vector<1x128xf32> to vector<32x128xf32>
      %15 = arith.addf %12, %14 : vector<32x128xf32>
      %c0_14 = arith.constant 0 : index
      %c0_15 = arith.constant 0 : index
      %16 = vector.load %arg6[%c0_14, %c0_15] : memref<32x128xf32, #tpu.memory_space<vmem>>, vector<32x128xf32>
      tpu.vector_store %arg6[%c0_14, %c0_15], %15 {strides = array<i32>} : memref<32x128xf32, #tpu.memory_space<vmem>>, vector<32x128xf32>,
      %cst_16 = arith.constant 0.000000e+00 : f32
      %17 = vector.broadcast %cst_16 : f32 to vector<32x128xf32>
      %18 = arith.maximumf %15, %17 : vector<32x128xf32>
      %19 = arith.truncf %18 : vector<32x128xf32> to vector<32x128xbf16>
      %c0_17 = arith.constant 0 : index
      %c0_18 = arith.constant 0 : index
      %20 = vector.load %arg7[%c0_17, %c0_18] : memref<32x128xbf16, #tpu.memory_space<vmem>>, vector<32x128xbf16>
      tpu.vector_store %arg7[%c0_17, %c0_18], %19 {strides = array<i32>} : memref<32x128xbf16, #tpu.memory_space<vmem>>, vector<32x128xbf16>,
    } else {
    }
    return
  }
  func.func @transform_0(%arg0: i32, %arg1: i32, %arg2: i32) -> (i32, i32) {
    %c0_i32 = arith.constant 0 : i32
    return %arg0, %arg2 : i32, i32
  }
  func.func @transform_1(%arg0: i32, %arg1: i32, %arg2: i32) -> (i32, i32) {
    %c0_i32 = arith.constant 0 : i32
    return %arg2, %arg1 : i32, i32
  }
  func.func @transform_2(%arg0: i32, %arg1: i32, %arg2: i32) -> (i32, i32) {
    %c0_i32 = arith.constant 0 : i32
    %c0_i32_0 = arith.constant 0 : i32
    return %c0_i32, %arg1 : i32, i32
  }
  func.func @transform_3(%arg0: i32, %arg1: i32, %arg2: i32) -> (i32, i32) {
    %c0_i32 = arith.constant 0 : i32
    return %arg0, %arg1 : i32, i32
  }
  func.func @transform_4(%arg0: i32, %arg1: i32, %arg2: i32) -> (i32, i32) {
    %c0_i32 = arith.constant 0 : i32
    return %arg0, %arg1 : i32, i32
  }
}

module attributes {stable_mosaic.version = 11 : i64} {
  func.func @_gemm_kernel(%arg0: i32, %arg1: i32, %arg2: i32, %arg3: memref<128x512xbf16, #tpu.memory_space<vmem>>, %arg4: memref<512x128xbf16, #tpu.memory_space<vmem>>, %arg5: memref<1x128xf32, #tpu.memory_space<vmem>>, %arg6: memref<128x128xbf16, #tpu.memory_space<vmem>>, %arg7: memref<128x128xf32, #tpu.memory_space<vmem>>) attributes {dimension_semantics = [#tpu.dimension_semantics<parallel>, #tpu.dimension_semantics<parallel>, #tpu.dimension_semantics<arbitrary>], iteration_bounds = array<i64: 1, 1, 1>, scalar_prefetch = 0 : i64, scratch_operands = 1 : i64, tpu.core_type = #tpu.core_type<tc>, window_params = [{transform_indices = @transform_0, window_bounds = array<i64: 128, 512>}, {transform_indices = @transform_1, window_bounds = array<i64: 512, 128>}, {transform_indices = @transform_2, window_bounds = array<i64: 1, 128>}, {transform_indices = @transform_3, window_bounds = array<i64: 128, 128>}]} {
    %c0_i32 = arith.constant 0 : i32
    %0 = arith.cmpi eq, %arg2, %c0_i32 : i32
    %1 = arith.extui %0 : i1 to i32
    %c0_i32_0 = arith.constant 0 : i32
    %2 = arith.cmpi ne, %1, %c0_i32_0 : i32
    scf.if %2 {
      %cst_10 = arith.constant 0.000000e+00 : f32
      %12 = vector.broadcast %cst_10 : f32 to vector<128x128xf32>
      %c0_11 = arith.constant 0 : index
      %c0_12 = arith.constant 0 : index
      %13 = vector.load %arg7[%c0_11, %c0_12] : memref<128x128xf32, #tpu.memory_space<vmem>>, vector<128x128xf32>
      tpu.vector_store %arg7[%c0_11, %c0_12], %12 {strides = array<i32>} : memref<128x128xf32, #tpu.memory_space<vmem>>, vector<128x128xf32>,
    } else {
    }
    %c0 = arith.constant 0 : index
    %c0_1 = arith.constant 0 : index
    %3 = vector.load %arg7[%c0, %c0_1] : memref<128x128xf32, #tpu.memory_space<vmem>>, vector<128x128xf32>
    %c0_2 = arith.constant 0 : index
    %c0_3 = arith.constant 0 : index
    %4 = vector.load %arg3[%c0_2, %c0_3] : memref<128x512xbf16, #tpu.memory_space<vmem>>, vector<128x512xbf16>
    %c0_4 = arith.constant 0 : index
    %c0_5 = arith.constant 0 : index
    %5 = vector.load %arg4[%c0_4, %c0_5] : memref<512x128xbf16, #tpu.memory_space<vmem>>, vector<512x128xbf16>
    %cst = arith.constant dense<0.000000e+00> : vector<128x128xf32>
    %6 = tpu.matmul %4, %5, %cst {dimension_numbers = #tpu.dot_dimension_numbers<[1], [0], [0], [1], [0, 0, 1, 1], [], []>} : vector<128x512xbf16>, vector<512x128xbf16>, vector<128x128xf32> -> vector<128x128xf32>
    %7 = arith.addf %3, %6 : vector<128x128xf32>
    %c0_6 = arith.constant 0 : index
    %c0_7 = arith.constant 0 : index
    %8 = vector.load %arg7[%c0_6, %c0_7] : memref<128x128xf32, #tpu.memory_space<vmem>>, vector<128x128xf32>
    tpu.vector_store %arg7[%c0_6, %c0_7], %7 {strides = array<i32>} : memref<128x128xf32, #tpu.memory_space<vmem>>, vector<128x128xf32>,
    %c0_i32_8 = arith.constant 0 : i32
    %9 = arith.cmpi eq, %arg2, %c0_i32_8 : i32
    %10 = arith.extui %9 : i1 to i32
    %c0_i32_9 = arith.constant 0 : i32
    %11 = arith.cmpi ne, %10, %c0_i32_9 : i32
    scf.if %11 {
      %c0_10 = arith.constant 0 : index
      %c0_11 = arith.constant 0 : index
      %12 = vector.load %arg7[%c0_10, %c0_11] : memref<128x128xf32, #tpu.memory_space<vmem>>, vector<128x128xf32>
      %c0_12 = arith.constant 0 : index
      %c0_13 = arith.constant 0 : index
      %13 = vector.load %arg5[%c0_12, %c0_13] : memref<1x128xf32, #tpu.memory_space<vmem>>, vector<1x128xf32>
      %14 = vector.broadcast %13 : vector<1x128xf32> to vector<128x128xf32>
      %15 = arith.addf %12, %14 : vector<128x128xf32>
      %cst_14 = arith.constant 0.000000e+00 : f32
      %16 = vector.broadcast %cst_14 : f32 to vector<128x128xf32>
      %17 = arith.maximumf %15, %16 : vector<128x128xf32>
      %18 = arith.truncf %17 : vector<128x128xf32> to vector<128x128xbf16>
      %c0_15 = arith.constant 0 : index
      %c0_16 = arith.constant 0 : index
      %19 = vector.load %arg6[%c0_15, %c0_16] : memref<128x128xbf16, #tpu.memory_space<vmem>>, vector<128x128xbf16>
      tpu.vector_store %arg6[%c0_15, %c0_16], %18 {strides = array<i32>} : memref<128x128xbf16, #tpu.memory_space<vmem>>, vector<128x128xbf16>,
    } else {
    }
    return
  }
  func.func @transform_0(%arg0: i32, %arg1: i32, %arg2: i32) -> (i32, i32) {
    %c0_i32 = arith.constant 0 : i32
    return %arg0, %arg2 : i32, i32
  }
  func.func @transform_1(%arg0: i32, %arg1: i32, %arg2: i32) -> (i32, i32) {
    %c0_i32 = arith.constant 0 : i32
    return %arg2, %arg1 : i32, i32
  }
  func.func @transform_2(%arg0: i32, %arg1: i32, %arg2: i32) -> (i32, i32) {
    %c0_i32 = arith.constant 0 : i32
    %c0_i32_0 = arith.constant 0 : i32
    return %c0_i32, %arg1 : i32, i32
  }
  func.func @transform_3(%arg0: i32, %arg1: i32, %arg2: i32) -> (i32, i32) {
    %c0_i32 = arith.constant 0 : i32
    return %arg0, %arg1 : i32, i32
  }
}

module attributes {stable_mosaic.version = 11 : i64} {
  func.func @_gemm_kernel(%arg0: i32, %arg1: i32, %arg2: i32, %arg3: memref<256x256xbf16, #tpu.memory_space<vmem>>, %arg4: memref<256x128xbf16, #tpu.memory_space<vmem>>, %arg5: memref<1x128xf32, #tpu.memory_space<vmem>>, %arg6: memref<256x128xf32, #tpu.memory_space<vmem>>, %arg7: memref<256x128xf32, #tpu.memory_space<vmem>>) attributes {dimension_semantics = [#tpu.dimension_semantics<parallel>, #tpu.dimension_semantics<parallel>, #tpu.dimension_semantics<arbitrary>], iteration_bounds = array<i64: 2, 1, 1>, scalar_prefetch = 0 : i64, scratch_operands = 1 : i64, tpu.core_type = #tpu.core_type<tc>, window_params = [{transform_indices = @transform_0, window_bounds = array<i64: 256, 256>}, {transform_indices = @transform_1, window_bounds = array<i64: 256, 128>}, {transform_indices = @transform_2, window_bounds = array<i64: 1, 128>}, {transform_indices = @transform_3, window_bounds = array<i64: 256, 128>}]} {
    %c0_i32 = arith.constant 0 : i32
    %0 = arith.cmpi eq, %arg2, %c0_i32 : i32
    %1 = arith.extui %0 : i1 to i32
    %c0_i32_0 = arith.constant 0 : i32
    %2 = arith.cmpi ne, %1, %c0_i32_0 : i32
    scf.if %2 {
      %cst_10 = arith.constant 0.000000e+00 : f32
      %12 = vector.broadcast %cst_10 : f32 to vector<256x128xf32>
      %c0_11 = arith.constant 0 : index
      %c0_12 = arith.constant 0 : index
      %13 = vector.load %arg7[%c0_11, %c0_12] : memref<256x128xf32, #tpu.memory_space<vmem>>, vector<256x128xf32>
      tpu.vector_store %arg7[%c0_11, %c0_12], %12 {strides = array<i32>} : memref<256x128xf32, #tpu.memory_space<vmem>>, vector<256x128xf32>,
    } else {
    }
    %c0 = arith.constant 0 : index
    %c0_1 = arith.constant 0 : index
    %3 = vector.load %arg7[%c0, %c0_1] : memref<256x128xf32, #tpu.memory_space<vmem>>, vector<256x128xf32>
    %c0_2 = arith.constant 0 : index
    %c0_3 = arith.constant 0 : index
    %4 = vector.load %arg3[%c0_2, %c0_3] : memref<256x256xbf16, #tpu.memory_space<vmem>>, vector<256x256xbf16>
    %c0_4 = arith.constant 0 : index
    %c0_5 = arith.constant 0 : index
    %5 = vector.load %arg4[%c0_4, %c0_5] : memref<256x128xbf16, #tpu.memory_space<vmem>>, vector<256x128xbf16>
    %cst = arith.constant dense<0.000000e+00> : vector<256x128xf32>
    %6 = tpu.matmul %4, %5, %cst {dimension_numbers = #tpu.dot_dimension_numbers<[1], [0], [0], [1], [0, 0, 1, 1], [], []>} : vector<256x256xbf16>, vector<256x128xbf16>, vector<256x128xf32> -> vector<256x128xf32>
    %7 = arith.addf %3, %6 : vector<256x128xf32>
    %c0_6 = arith.constant 0 : index
    %c0_7 = arith.constant 0 : index
    %8 = vector.load %arg7[%c0_6, %c0_7] : memref<256x128xf32, #tpu.memory_space<vmem>>, vector<256x128xf32>
    tpu.vector_store %arg7[%c0_6, %c0_7], %7 {strides = array<i32>} : memref<256x128xf32, #tpu.memory_space<vmem>>, vector<256x128xf32>,
    %c0_i32_8 = arith.constant 0 : i32
    %9 = arith.cmpi eq, %arg2, %c0_i32_8 : i32
    %10 = arith.extui %9 : i1 to i32
    %c0_i32_9 = arith.constant 0 : i32
    %11 = arith.cmpi ne, %10, %c0_i32_9 : i32
    scf.if %11 {
      %c0_10 = arith.constant 0 : index
      %c0_11 = arith.constant 0 : index
      %12 = vector.load %arg7[%c0_10, %c0_11] : memref<256x128xf32, #tpu.memory_space<vmem>>, vector<256x128xf32>
      %c0_12 = arith.constant 0 : index
      %c0_13 = arith.constant 0 : index
      %13 = vector.load %arg5[%c0_12, %c0_13] : memref<1x128xf32, #tpu.memory_space<vmem>>, vector<1x128xf32>
      %14 = vector.broadcast %13 : vector<1x128xf32> to vector<256x128xf32>
      %15 = arith.addf %12, %14 : vector<256x128xf32>
      %c0_14 = arith.constant 0 : index
      %c0_15 = arith.constant 0 : index
      %16 = vector.load %arg6[%c0_14, %c0_15] : memref<256x128xf32, #tpu.memory_space<vmem>>, vector<256x128xf32>
      tpu.vector_store %arg6[%c0_14, %c0_15], %15 {strides = array<i32>} : memref<256x128xf32, #tpu.memory_space<vmem>>, vector<256x128xf32>,
    } else {
    }
    return
  }
  func.func @transform_0(%arg0: i32, %arg1: i32, %arg2: i32) -> (i32, i32) {
    %c0_i32 = arith.constant 0 : i32
    return %arg0, %arg2 : i32, i32
  }
  func.func @transform_1(%arg0: i32, %arg1: i32, %arg2: i32) -> (i32, i32) {
    %c0_i32 = arith.constant 0 : i32
    return %arg2, %arg1 : i32, i32
  }
  func.func @transform_2(%arg0: i32, %arg1: i32, %arg2: i32) -> (i32, i32) {
    %c0_i32 = arith.constant 0 : i32
    %c0_i32_0 = arith.constant 0 : i32
    return %c0_i32, %arg1 : i32, i32
  }
  func.func @transform_3(%arg0: i32, %arg1: i32, %arg2: i32) -> (i32, i32) {
    %c0_i32 = arith.constant 0 : i32
    return %arg0, %arg1 : i32, i32
  }
}

</mosaic_0001>

<bundles_post_ra>
// kernel: vqvae_forward.12
= control target key start
LH: loop header
LB: loop body
LE: loop exit
PB: predicated region body
PF: predicated region fallthrough
CT: control target
= control target key end

     0   :  { %s721_s1 = inlined_call_operand.vmem [shape: bf16[128,128], index: 1, kind: input, shape index: {}]   ;;  %s722_s0 = inlined_call_operand.vmem [shape: bf16[128,128], index: 0, kind: input, shape index: {}]   ;;  %s723_s2 = inlined_call_operand.vmem [shape: f32[1,128], index: 2, kind: input, shape index: {}]   ;;  %s724_s3 = inlined_call_operand.vmem [shape: bf16[128,128], index: 3, kind: output, shape index: {}]  }
   0x1   :  { %v610_v0 = vld [vmem:[%s721_s1] sm:$0xff]   ;;  %v611_v1 = vld [vmem:[%s721_s1 + $0x8] sm:$0xff]   ;;  %v612_v2 = vld [vmem:[%s721_s1 + $0x10] sm:$0xff]  }
   0x2   :  { %562 = vmatprep.subr.bf16.mxu0 %v610_v0  ;;  %594 = vmatprep.subr.bf16.mxu1 %v610_v0  ;;  %v613_v3 = vld [vmem:[%s721_s1 + $0x18] sm:$0xff]   ;;  %v618_v4 = vld [vmem:[%s722_s0] sm:$0xff]   ;;  %v615_v7 = vld [vmem:[%s721_s1 + $0x28] sm:$0xff]  }
   0x3   :  { %563 = vmatpush3.bf16.msra.mxu0 %v610_v0  ;;  %602 = vmatpush3.bf16.msra.mxu1 %v610_v0  ;;  %v619_v5 = vld [vmem:[%s722_s0 + $0x20] sm:$0xff]   ;;  %v616_v8 = vld [vmem:[%s721_s1 + $0x30] sm:$0xff]   ;;  %v617_v9 = vld [vmem:[%s721_s1 + $0x38] sm:$0xff]  }
   0x4   :  { %564 = vmatprep.subr.bf16.mxu0 %v611_v1  ;;  %595 = vmatprep.subr.bf16.mxu1 %v611_v1  ;;  %v614_v6 = vld [vmem:[%s721_s1 + $0x20] sm:$0xff]   ;;  %v620_v10 = vld [vmem:[%s722_s0 + $0x8] sm:$0xff]   ;;  %v622_v12 = vld [vmem:[%s722_s0 + $0x10] sm:$0xff]  }
   0x5   :  { %578 = vmatprep.mubr.bf16.mxu0 %v618_v4  ;;  %586 = vmatprep.mubr.bf16.mxu1 %v619_v5  ;;  %v621_v11 = vld [vmem:[%s722_s0 + $0x28] sm:$0xff]   ;;  %v623_v13 = vld [vmem:[%s722_s0 + $0x30] sm:$0xff]   ;;  %v624_v14 = vld [vmem:[%s722_s0 + $0x18] sm:$0xff]  }
   0x6   :  { %v625_v15 = vld [vmem:[%s722_s0 + $0x38] sm:$0xff]   ;;  %v466_v16 = vld [vmem:[%s723_s2] ss:$0 sm:$0xff] }
   0x7   :  { %565 = vmatpush3.bf16.msra.mxu0 %v611_v1  ;;  %603 = vmatpush3.bf16.msra.mxu1 %v611_v1 }
   0x8   :  { %566 = vmatprep.subr.bf16.mxu0 %v612_v2  ;;  %596 = vmatprep.subr.bf16.mxu1 %v612_v2 }
   0xb   :  { %567 = vmatpush3.bf16.msra.mxu0 %v612_v2  ;;  %604 = vmatpush3.bf16.msra.mxu1 %v612_v2 }
   0xc   :  { %568 = vmatprep.subr.bf16.mxu0 %v613_v3  ;;  %597 = vmatprep.subr.bf16.mxu1 %v613_v3 }
   0xf   :  { %569 = vmatpush3.bf16.msra.mxu0 %v613_v3  ;;  %605 = vmatpush3.bf16.msra.mxu1 %v613_v3 }
  0x10   :  { %570 = vmatprep.subr.bf16.mxu0 %v614_v6  ;;  %598 = vmatprep.subr.bf16.mxu1 %v614_v6 }
  0x13   :  { %571 = vmatpush3.bf16.msra.mxu0 %v614_v6  ;;  %606 = vmatpush3.bf16.msra.mxu1 %v614_v6 }
  0x14   :  { %572 = vmatprep.subr.bf16.mxu0 %v615_v7  ;;  %599 = vmatprep.subr.bf16.mxu1 %v615_v7 }
  0x17   :  { %573 = vmatpush3.bf16.msra.mxu0 %v615_v7  ;;  %607 = vmatpush3.bf16.msra.mxu1 %v615_v7 }
  0x18   :  { %574 = vmatprep.subr.bf16.mxu0 %v616_v8  ;;  %600 = vmatprep.subr.bf16.mxu1 %v616_v8 }
  0x1b   :  { %575 = vmatpush3.bf16.msra.mxu0 %v616_v8  ;;  %608 = vmatpush3.bf16.msra.mxu1 %v616_v8 }
  0x1c   :  { %576 = vmatprep.subr.bf16.mxu0 %v617_v9  ;;  %601 = vmatprep.subr.bf16.mxu1 %v617_v9 }
  0x1f   :  { %577 = vmatpush3.bf16.msra.mxu0 %v617_v9  ;;  %609 = vmatpush3.bf16.msra.mxu1 %v617_v9 }
  0x22   :  { %579 = vmatmul.mubr.bf16.vlgmr.msra.gmra.mrb[0].mxu0 %v620_v10  ;;  %587 = vmatmul.mubr.bf16.vlgmr.msra.gmra.mrb[0].mxu1 %v621_v11 }
  0x23   :  { %582 = vmatprep.mubr.bf16.mxu0 %v622_v12  ;;  %590 = vmatprep.mubr.bf16.mxu1 %v623_v13 }
  0x2a   :  { %583 = vmatmul.mubr.bf16.gmra.mrb[4].mxu0 %v624_v14  ;;  %591 = vmatmul.mubr.bf16.gmra.mrb[4].mxu1 %v625_v15 }
  0xf5   :  { %v580_v17 = vpop.f32.mrb[0].mxu0  ;;  %v588_v18 = vpop.f32.mrb[0].mxu1 }
  0xf6   :  { %v336_v19 = vadd.f32 %v580_v17, %v466_v16  ;;  %v344_v20 = vadd.f32 %v588_v18, %v466_v16  ;;  %v213_v21 = vpop.f32.mrb[1].mxu0  ;;  %v245_v22 = vpop.f32.mrb[1].mxu1 }
  0xf7   :  { %v334_v23 = vadd.f32 %v466_v16, %v213_v21  ;;  %v342_v24 = vadd.f32 %v466_v16, %v245_v22  ;;  %v581_v25 = vpop.f32.mrb[2].mxu0  ;;  %v589_v26 = vpop.f32.mrb[2].mxu1 }
  0xf8   :  { %v337_v27 = vadd.f32 %v581_v25, %v466_v16  ;;  %v345_v28 = vadd.f32 %v589_v26, %v466_v16  ;;  %v216_v29 = vpop.f32.mrb[3].mxu0  ;;  %v248_v30 = vpop.f32.mrb[3].mxu1  ;;  %v352_v33 = vmax.f32 %v336_v19, 0.0  ;;  %v360_v34 = vmax.f32 %v344_v20, 0.0 }
  0xf9   :  { %v335_v31 = vadd.f32 %v466_v16, %v216_v29  ;;  %v343_v32 = vadd.f32 %v466_v16, %v248_v30  ;;  %v350_v37 = vmax.f32 %v334_v23, 0.0  ;;  %v358_v38 = vmax.f32 %v342_v24, 0.0 }
  0xfa   :  { %v353_v35 = vmax.f32 %v337_v27, 0.0  ;;  %v361_v36 = vmax.f32 %v345_v28, 0.0 }
  0xfb   :  { %v351_v39 = vmax.f32 %v335_v31, 0.0  ;;  %v359_v40 = vmax.f32 %v343_v32, 0.0 }
  0xfc   :  { %v507_v41 = vpack.c.bf16 %v353_v35, %v352_v33  ;;  %v527_v42 = vpack.c.bf16 %v361_v36, %v360_v34 }
  0xfd   :  { %v502_v43 = vpack.c.bf16 %v351_v39, %v350_v37  ;;  %v522_v44 = vpack.c.bf16 %v359_v40, %v358_v38  ;;  %v584_v45 = vpop.f32.mrb[4].mxu0  ;;  %v592_v46 = vpop.f32.mrb[4].mxu1 }
  0xfe   :  { %539 = vst [vmem:[%s724_s3 + $0x8] sm:$0xff] %v507_v41   ;;  %543 = vst [vmem:[%s724_s3 + $0x28] sm:$0xff] %v527_v42   ;;  %v340_v47 = vadd.f32 %v584_v45, %v466_v16  ;;  %v348_v48 = vadd.f32 %v592_v46, %v466_v16  ;;  %v229_v49 = vpop.f32.mrb[5].mxu0  ;;  %v261_v50 = vpop.f32.mrb[5].mxu1 }
  0xff   :  { %503 = vst [vmem:[%s724_s3] sm:$0xff] %v502_v43   ;;  %542 = vst [vmem:[%s724_s3 + $0x20] sm:$0xff] %v522_v44   ;;  %v338_v51 = vadd.f32 %v466_v16, %v229_v49  ;;  %v346_v52 = vadd.f32 %v466_v16, %v261_v50  ;;  %v585_v53 = vpop.f32.mrb[6].mxu0  ;;  %v593_v54 = vpop.f32.mrb[6].mxu1 }
 0x100   :  { %v341_v55 = vadd.f32 %v585_v53, %v466_v16  ;;  %v349_v56 = vadd.f32 %v593_v54, %v466_v16  ;;  %v232_v57 = vpop.f32.mrb[7].mxu0  ;;  %v264_v58 = vpop.f32.mrb[7].mxu1  ;;  %v356_v61 = vmax.f32 %v340_v47, 0.0  ;;  %v364_v62 = vmax.f32 %v348_v48, 0.0 }
 0x101   :  { %v339_v59 = vadd.f32 %v466_v16, %v232_v57  ;;  %v347_v60 = vadd.f32 %v466_v16, %v264_v58  ;;  %v354_v1 = vmax.f32 %v338_v51, 0.0  ;;  %v362_v2 = vmax.f32 %v346_v52, 0.0 }
 0x102   :  { %v357_v63 = vmax.f32 %v341_v55, 0.0  ;;  %v365_v0 = vmax.f32 %v349_v56, 0.0 }
 0x103   :  { %v355_v3 = vmax.f32 %v339_v59, 0.0  ;;  %v363_v4 = vmax.f32 %v347_v60, 0.0 }
 0x104   :  { %v517_v5 = vpack.c.bf16 %v357_v63, %v356_v61  ;;  %v537_v6 = vpack.c.bf16 %v365_v0, %v364_v62 }
 0x105   :  { %v512_v7 = vpack.c.bf16 %v355_v3, %v354_v1  ;;  %v532_v8 = vpack.c.bf16 %v363_v4, %v362_v2 }
 0x106   :  { %541 = vst [vmem:[%s724_s3 + $0x18] sm:$0xff] %v517_v5   ;;  %545 = vst [vmem:[%s724_s3 + $0x38] sm:$0xff] %v537_v6  }
 0x107   :  { %540 = vst [vmem:[%s724_s3 + $0x10] sm:$0xff] %v512_v7   ;;  %544 = vst [vmem:[%s724_s3 + $0x30] sm:$0xff] %v532_v8  }

// kernel: vqvae_forward.13
= control target key start
LH: loop header
LB: loop body
LE: loop exit
PB: predicated region body
PF: predicated region fallthrough
CT: control target
= control target key end

     0   :  { %s477_s1 = inlined_call_operand.vmem [shape: bf16[256,128], index: 1, kind: input, shape index: {}]   ;;  %s478_s0 = inlined_call_operand.vmem [shape: bf16[32,256], index: 0, kind: input, shape index: {}]   ;;  %s479_s2 = inlined_call_operand.vmem [shape: f32[1,128], index: 2, kind: input, shape index: {}]   ;;  %s480_s3 = inlined_call_operand.vmem [shape: bf16[32,128], index: 3, kind: output, shape index: {}]  }
   0x1   :  { %v366_v0 = vld [vmem:[%s477_s1 + $0x40] sm:$0xff]   ;;  %v368_v2 = vld [vmem:[%s477_s1 + $0x48] sm:$0xff]   ;;  %v370_v4 = vld [vmem:[%s477_s1 + $0x50] sm:$0xff]  }
   0x2   :  { %v367_v1 = vld [vmem:[%s477_s1] sm:$0xff]   ;;  %322 = vmatprep.subr.bf16.mxu0 %v366_v0  ;;  %350 = vmatprep.subr.bf16.mxu1 %v366_v0  ;;  %v369_v3 = vld [vmem:[%s477_s1 + $0x8] sm:$0xff]   ;;  %v371_v5 = vld [vmem:[%s477_s1 + $0x10] sm:$0xff]  }
   0x3   :  { %323 = vmatpush3.bf16.msra.mxu0 %v367_v1  ;;  %358 = vmatpush3.bf16.msra.mxu1 %v367_v1  ;;  %v372_v6 = vld [vmem:[%s477_s1 + $0x58] sm:$0xff]   ;;  %v374_v8 = vld [vmem:[%s477_s1 + $0x60] sm:$0xff]   ;;  %v376_v10 = vld [vmem:[%s477_s1 + $0x68] sm:$0xff]  }
   0x4   :  { %324 = vmatprep.subr.bf16.mxu0 %v368_v2  ;;  %351 = vmatprep.subr.bf16.mxu1 %v368_v2  ;;  %v373_v7 = vld [vmem:[%s477_s1 + $0x18] sm:$0xff]   ;;  %v375_v9 = vld [vmem:[%s477_s1 + $0x20] sm:$0xff]   ;;  %v377_v13 = vld [vmem:[%s477_s1 + $0x28] sm:$0xff]  }
   0x5   :  { %v384_v11 = vld [vmem:[%s478_s0 + $0x4] ss:$8 sps:$4 sm:$0xff]   ;;  %v387_v12 = vld [vmem:[%s478_s0 + $0x14] ss:$8 sps:$4 sm:$0xff]   ;;  %v382_v18 = vld [vmem:[%s478_s0] ss:$8 sps:$4 sm:$0xff]  }
   0x6   :  { %v378_v14 = vld [vmem:[%s477_s1 + $0x70] sm:$0xff]   ;;  %211 = vmatprep.mubr.bf16.mxu0 %v384_v11  ;;  %219 = vmatprep.mubr.bf16.mxu1 %v387_v12  ;;  %v380_v16 = vld [vmem:[%s477_s1 + $0x78] sm:$0xff]   ;;  %v302_v23 = vld [vmem:[%s479_s2] ss:$0 sm:$0xff] }
   0x7   :  { %325 = vmatpush3.bf16.msra.mxu0 %v369_v3  ;;  %359 = vmatpush3.bf16.msra.mxu1 %v369_v3  ;;  %v379_v15 = vld [vmem:[%s477_s1 + $0x30] sm:$0xff]   ;;  %v381_v17 = vld [vmem:[%s477_s1 + $0x38] sm:$0xff]  }
   0x8   :  { %326 = vmatprep.subr.bf16.mxu0 %v370_v4  ;;  %352 = vmatprep.subr.bf16.mxu1 %v370_v4  ;;  %v385_v19 = vld [vmem:[%s478_s0 + $0x10] ss:$8 sps:$4 sm:$0xff]  }
   0xb   :  { %327 = vmatpush3.bf16.msra.mxu0 %v371_v5  ;;  %360 = vmatpush3.bf16.msra.mxu1 %v371_v5 }
   0xc   :  { %328 = vmatprep.subr.bf16.mxu0 %v372_v6  ;;  %353 = vmatprep.subr.bf16.mxu1 %v372_v6 }
   0xf   :  { %329 = vmatpush3.bf16.msra.mxu0 %v373_v7  ;;  %361 = vmatpush3.bf16.msra.mxu1 %v373_v7 }
  0x10   :  { %330 = vmatprep.subr.bf16.mxu0 %v374_v8  ;;  %354 = vmatprep.subr.bf16.mxu1 %v374_v8 }
  0x13   :  { %331 = vmatpush3.bf16.msra.mxu0 %v375_v9  ;;  %362 = vmatpush3.bf16.msra.mxu1 %v375_v9 }
  0x14   :  { %332 = vmatprep.subr.bf16.mxu0 %v376_v10  ;;  %355 = vmatprep.subr.bf16.mxu1 %v376_v10 }
  0x17   :  { %333 = vmatpush3.bf16.msra.mxu0 %v377_v13  ;;  %363 = vmatpush3.bf16.msra.mxu1 %v377_v13 }
  0x18   :  { %334 = vmatprep.subr.bf16.mxu0 %v378_v14  ;;  %356 = vmatprep.subr.bf16.mxu1 %v378_v14 }
  0x1b   :  { %335 = vmatpush3.bf16.msra.mxu0 %v379_v15  ;;  %364 = vmatpush3.bf16.msra.mxu1 %v379_v15 }
  0x1c   :  { %336 = vmatprep.subr.bf16.mxu0 %v380_v16  ;;  %357 = vmatprep.subr.bf16.mxu1 %v380_v16 }
  0x1f   :  { %337 = vmatpush3.bf16.msra.mxu0 %v381_v17  ;;  %365 = vmatpush3.bf16.msra.mxu1 %v381_v17 }
  0x22   :  { %212 = vmatmul.mubr.bf16.vlgmr.msra.gmra.mrb[0].mxu0 %v382_v18  ;;  %220 = vmatmul.mubr.bf16.vlgmr.msra.gmra.mrb[0].mxu1 %v385_v19 }
  0xf5   :  { %v338_v20 = vpop.f32.mrb[0].mxu0  ;;  %v344_v21 = vpop.f32.mrb[0].mxu1 }
  0xf6   :  { %v339_v22 = vpop.f32.mrb[1].mxu0  ;;  %v345_v24 = vpop.f32.mrb[1].mxu1 }
  0xf7   :  { %v340_v25 = vadd.f32 %v339_v22, %v338_v20  ;;  %v346_v26 = vadd.f32 %v345_v24, %v344_v21  ;;  %v341_v27 = vpop.f32.mrb[2].mxu0  ;;  %v347_v28 = vpop.f32.mrb[2].mxu1 }
  0xf8   :  { %v342_v29 = vpop.f32.mrb[3].mxu0  ;;  %v348_v30 = vpop.f32.mrb[3].mxu1 }
  0xf9   :  { %v250_v31 = vadd.f32 %v340_v25, %v302_v23  ;;  %v252_v32 = vadd.f32 %v346_v26, %v302_v23  ;;  %v343_v33 = vadd.f32 %v342_v29, %v341_v27  ;;  %v349_v34 = vadd.f32 %v348_v30, %v347_v28 }
  0xfb   :  { %v251_v35 = vadd.f32 %v343_v33, %v302_v23  ;;  %v253_v36 = vadd.f32 %v349_v34, %v302_v23  ;;  %v254_v37 = vmax.f32 %v250_v31, 0.0  ;;  %v256_v38 = vmax.f32 %v252_v32, 0.0 }
  0xfd   :  { %v255_v39 = vmax.f32 %v251_v35, 0.0  ;;  %v257_v40 = vmax.f32 %v253_v36, 0.0 }
  0xff   :  { %v314_v41 = vpack.c.bf16 %v255_v39, %v254_v37  ;;  %v319_v42 = vpack.c.bf16 %v257_v40, %v256_v38 }
 0x101   :  { %315 = vst [vmem:[%s480_s3] sm:$0xff] %v314_v41   ;;  %321 = vst [vmem:[%s480_s3 + $0x8] sm:$0xff] %v319_v42  }

// kernel: vqvae_forward.14
= control target key start
LH: loop header
LB: loop body
LE: loop exit
PB: predicated region body
PF: predicated region fallthrough
CT: control target
= control target key end

     0   :  { %s697_s1 = inlined_call_operand.vmem [shape: bf16[384,128], index: 1, kind: input, shape index: {}]   ;;  %s698_s0 = inlined_call_operand.vmem [shape: bf16[32,384], index: 0, kind: input, shape index: {}]   ;;  %s699_s2 = inlined_call_operand.vmem [shape: f32[1,128], index: 2, kind: input, shape index: {}]   ;;  %s700_s3 = inlined_call_operand.vmem [shape: f32[32,128], index: 3, kind: output, shape index: {0}]   ;;  %s701_s4 = inlined_call_operand.vmem [shape: bf16[32,128], index: 4, kind: output, shape index: {1}]  }
   0x1   :  { %v529_v0 = vld [vmem:[%s697_s1 + $0x40] sm:$0xff]   ;;  %v532_v3 = vld [vmem:[%s697_s1 + $0x48] sm:$0xff]   ;;  %v535_v6 = vld [vmem:[%s697_s1 + $0x50] sm:$0xff]  }
   0x2   :  { %v530_v1 = vld [vmem:[%s697_s1] sm:$0xff]   ;;  %471 = vmatprep.subr.bf16.mxu0 %v529_v0  ;;  %v533_v4 = vld [vmem:[%s697_s1 + $0x8] sm:$0xff]   ;;  %v536_v7 = vld [vmem:[%s697_s1 + $0x10] sm:$0xff]  }
   0x3   :  { %v531_v2 = vld [vmem:[%s697_s1 + $0x80] sm:$0xff]   ;;  %472 = vmatpush3.bf16.msra.mxu0 %v530_v1  ;;  %v534_v5 = vld [vmem:[%s697_s1 + $0x88] sm:$0xff]   ;;  %v537_v8 = vld [vmem:[%s697_s1 + $0x90] sm:$0xff]  }
   0x4   :  { %509 = vmatprep.subr.bf16.mxu1 %v531_v2  ;;  %473 = vmatprep.subr.bf16.mxu0 %v532_v3  ;;  %v538_v9 = vld [vmem:[%s697_s1 + $0x58] sm:$0xff]   ;;  %v541_v12 = vld [vmem:[%s697_s1 + $0x60] sm:$0xff]   ;;  %v544_v15 = vld [vmem:[%s697_s1 + $0x68] sm:$0xff]  }
   0x5   :  { %510 = vmatpush3.bf16.msra.mxu1 %v531_v2  ;;  %v539_v10 = vld [vmem:[%s697_s1 + $0x18] sm:$0xff]   ;;  %v543_v13 = vld [vmem:[%s697_s1 + $0xa0] sm:$0xff]   ;;  %v546_v16 = vld [vmem:[%s697_s1 + $0xa8] sm:$0xff]  }
   0x6   :  { %511 = vmatprep.subr.bf16.mxu1 %v534_v5  ;;  %v540_v11 = vld [vmem:[%s697_s1 + $0x98] sm:$0xff]   ;;  %v542_v14 = vld [vmem:[%s697_s1 + $0x20] sm:$0xff]   ;;  %v545_v17 = vld [vmem:[%s697_s1 + $0x28] sm:$0xff]  }
   0x7   :  { %474 = vmatpush3.bf16.msra.mxu0 %v533_v4  ;;  %v547_v18 = vld [vmem:[%s697_s1 + $0x70] sm:$0xff]   ;;  %v550_v21 = vld [vmem:[%s697_s1 + $0x78] sm:$0xff]   ;;  %v553_v26 = vld [vmem:[%s698_s0] ss:$12 sps:$4 sm:$0xff]  }
   0x8   :  { %475 = vmatprep.subr.bf16.mxu0 %v535_v6  ;;  %v548_v19 = vld [vmem:[%s697_s1 + $0x30] sm:$0xff]   ;;  %v552_v22 = vld [vmem:[%s697_s1 + $0xb8] sm:$0xff]   ;;  %v557_v28 = vld [vmem:[%s698_s0 + $0x20] ss:$12 sps:$4 sm:$0xff]  }
   0x9   :  { %512 = vmatpush3.bf16.msra.mxu1 %v534_v5  ;;  %v549_v20 = vld [vmem:[%s697_s1 + $0xb0] sm:$0xff]   ;;  %v551_v25 = vld [vmem:[%s697_s1 + $0x38] sm:$0xff]   ;;  %v451_v37 = vld [vmem:[%s699_s2] ss:$0 sm:$0xff] }
   0xa   :  { %513 = vmatprep.subr.bf16.mxu1 %v537_v8  ;;  %v555_v23 = vld [vmem:[%s698_s0 + $0x4] ss:$12 sps:$4 sm:$0xff]   ;;  %v556_v24 = vld [vmem:[%s698_s0 + $0x8] ss:$12 sps:$4 sm:$0xff]  }
   0xb   :  { %476 = vmatpush3.bf16.msra.mxu0 %v536_v7  ;;  %293 = vmatprep.mubr.bf16.mxu0 %v555_v23  ;;  %v558_v27 = vld [vmem:[%s698_s0 + $0x1c] ss:$12 sps:$4 sm:$0xff]   ;;  %v560_v29 = vld [vmem:[%s698_s0 + $0x18] ss:$12 sps:$4 sm:$0xff]  }
   0xc   :  { %477 = vmatprep.subr.bf16.mxu0 %v538_v9  ;;  %525 = vmatprep.mubr.bf16.mxu1 %v556_v24 }
   0xd   :  { %514 = vmatpush3.bf16.msra.mxu1 %v537_v8 }
   0xe   :  { %515 = vmatprep.subr.bf16.mxu1 %v540_v11 }
   0xf   :  { %478 = vmatpush3.bf16.msra.mxu0 %v539_v10 }
  0x10   :  { %479 = vmatprep.subr.bf16.mxu0 %v541_v12 }
  0x11   :  { %516 = vmatpush3.bf16.msra.mxu1 %v540_v11 }
  0x12   :  { %517 = vmatprep.subr.bf16.mxu1 %v543_v13 }
  0x13   :  { %480 = vmatpush3.bf16.msra.mxu0 %v542_v14 }
  0x14   :  { %481 = vmatprep.subr.bf16.mxu0 %v544_v15 }
  0x15   :  { %518 = vmatpush3.bf16.msra.mxu1 %v543_v13 }
  0x16   :  { %519 = vmatprep.subr.bf16.mxu1 %v546_v16 }
  0x17   :  { %482 = vmatpush3.bf16.msra.mxu0 %v545_v17 }
  0x18   :  { %483 = vmatprep.subr.bf16.mxu0 %v547_v18 }
  0x19   :  { %520 = vmatpush3.bf16.msra.mxu1 %v546_v16 }
  0x1a   :  { %521 = vmatprep.subr.bf16.mxu1 %v549_v20 }
  0x1b   :  { %484 = vmatpush3.bf16.msra.mxu0 %v548_v19 }
  0x1c   :  { %485 = vmatprep.subr.bf16.mxu0 %v550_v21 }
  0x1d   :  { %522 = vmatpush3.bf16.msra.mxu1 %v549_v20 }
  0x1e   :  { %523 = vmatprep.subr.bf16.mxu1 %v552_v22 }
  0x1f   :  { %486 = vmatpush3.bf16.msra.mxu0 %v551_v25 }
  0x21   :  { %524 = vmatpush3.bf16.msra.mxu1 %v552_v22 }
  0x22   :  { %294 = vmatmul.mubr.bf16.vlgmr.msra.gmra.mrb[0].mxu0 %v553_v26 }
  0x23   :  { %301 = vmatprep.mubr.bf16.mxu0 %v558_v27 }
  0x24   :  { %526 = vmatmul.mubr.bf16.vlgmr.msra.gmra.mrb[0].mxu1 %v557_v28 }
  0x2a   :  { %302 = vmatmul.mubr.bf16.gmra.mrb[4].mxu0 %v560_v29 }
  0xf5   :  { %v487_v30 = vpop.f32.mrb[0].mxu0 }
  0xf6   :  { %v488_v31 = vpop.f32.mrb[1].mxu0 }
  0xf7   :  { %v489_v32 = vadd.f32 %v488_v31, %v487_v30  ;;  %v490_v33 = vpop.f32.mrb[2].mxu0  ;;  %v527_v34 = vpop.f32.mrb[0].mxu1 }
  0xf8   :  { %v491_v35 = vpop.f32.mrb[3].mxu0  ;;  %v344_v36 = vpop.f32.mrb[1].mxu1 }
  0xf9   :  { %v492_v38 = vadd.f32 %v491_v35, %v490_v33  ;;  %v345_v39 = vadd.f32 %v489_v32, %v344_v36  ;;  %v528_v40 = vpop.f32.mrb[2].mxu1 }
  0xfa   :  { %v347_v41 = vpop.f32.mrb[3].mxu1 }
  0xfb   :  { %v381_v42 = vadd.f32 %v451_v37, %v345_v39  ;;  %v348_v43 = vadd.f32 %v492_v38, %v347_v41 }
  0xfd   :  { %385 = vst [vmem:[%s700_s3] sm:$0xff] %v381_v42  ;;  %v382_v44 = vadd.f32 %v451_v37, %v348_v43  ;;  %v493_v45 = vpop.f32.mrb[4].mxu0  ;;  %v389_v47 = vmax.f32 %v381_v42, 0.0 }
  0xfe   :  { %v494_v46 = vpop.f32.mrb[5].mxu0 }
  0xff   :  { %386 = vst [vmem:[%s700_s3 + $0x8] sm:$0xff] %v382_v44  ;;  %v390_v48 = vmax.f32 %v382_v44, 0.0  ;;  %v495_v49 = vadd.f32 %v494_v46, %v493_v45  ;;  %v496_v50 = vpop.f32.mrb[6].mxu0 }
 0x100   :  { %v497_v51 = vpop.f32.mrb[7].mxu0 }
 0x101   :  { %v463_v52 = vpack.c.bf16 %v390_v48, %v389_v47  ;;  %v353_v53 = vadd.f32 %v527_v34, %v495_v49  ;;  %v498_v54 = vadd.f32 %v497_v51, %v496_v50 }
 0x103   :  { %464 = vst [vmem:[%s701_s4] sm:$0xff] %v463_v52   ;;  %v383_v55 = vadd.f32 %v451_v37, %v353_v53  ;;  %v356_v56 = vadd.f32 %v528_v40, %v498_v54 }
 0x105   :  { %387 = vst [vmem:[%s700_s3 + $0x10] sm:$0xff] %v383_v55  ;;  %v384_v57 = vadd.f32 %v451_v37, %v356_v56  ;;  %v391_v58 = vmax.f32 %v383_v55, 0.0 }
 0x107   :  { %388 = vst [vmem:[%s700_s3 + $0x18] sm:$0xff] %v384_v57  ;;  %v392_v59 = vmax.f32 %v384_v57, 0.0 }
 0x109   :  { %v468_v60 = vpack.c.bf16 %v392_v59, %v391_v58 }
 0x10b   :  { %470 = vst [vmem:[%s701_s4 + $0x8] sm:$0xff] %v468_v60  }

// kernel: vqvae_forward.16
= control target key start
LH: loop header
LB: loop body
LE: loop exit
PB: predicated region body
PF: predicated region fallthrough
CT: control target
= control target key end

     0   :  { %s872_s1 = inlined_call_operand.vmem [shape: bf16[384,128], index: 1, kind: input, shape index: {}]   ;;  %s873_s0 = inlined_call_operand.vmem [shape: bf16[32,384], index: 0, kind: input, shape index: {}]   ;;  %s874_s2 = inlined_call_operand.vmem [shape: bf16[128,128], index: 2, kind: input, shape index: {}]   ;;  %s875_s3 = inlined_call_operand.vmem [shape: f32[32,128], index: 3, kind: input, shape index: {}]   ;;  %s876_s4 = inlined_call_operand.vmem [shape: bf16[32,128], index: 4, kind: output, shape index: {}]  }
   0x1   :  { %v675_v0 = vld [vmem:[%s872_s1 + $0x40] sm:$0xff]   ;;  %v678_v3 = vld [vmem:[%s872_s1 + $0x48] sm:$0xff]   ;;  %v681_v6 = vld [vmem:[%s872_s1 + $0x50] sm:$0xff]  }
   0x2   :  { %v676_v1 = vld [vmem:[%s872_s1] sm:$0xff]   ;;  %587 = vmatprep.subr.bf16.mxu0 %v675_v0  ;;  %v679_v4 = vld [vmem:[%s872_s1 + $0x8] sm:$0xff]   ;;  %v682_v7 = vld [vmem:[%s872_s1 + $0x10] sm:$0xff]  }
   0x3   :  { %v677_v2 = vld [vmem:[%s872_s1 + $0x80] sm:$0xff]   ;;  %588 = vmatpush3.bf16.msra.mxu0 %v676_v1  ;;  %v680_v5 = vld [vmem:[%s872_s1 + $0x88] sm:$0xff]   ;;  %v683_v8 = vld [vmem:[%s872_s1 + $0x90] sm:$0xff]  }
   0x4   :  { %635 = vmatprep.subr.bf16.mxu1 %v677_v2  ;;  %589 = vmatprep.subr.bf16.mxu0 %v678_v3  ;;  %v684_v9 = vld [vmem:[%s872_s1 + $0x58] sm:$0xff]   ;;  %v687_v12 = vld [vmem:[%s872_s1 + $0x60] sm:$0xff]   ;;  %v690_v15 = vld [vmem:[%s872_s1 + $0x68] sm:$0xff]  }
   0x5   :  { %636 = vmatpush3.bf16.msra.mxu1 %v677_v2  ;;  %v685_v10 = vld [vmem:[%s872_s1 + $0x18] sm:$0xff]   ;;  %v689_v13 = vld [vmem:[%s872_s1 + $0xa0] sm:$0xff]   ;;  %v692_v16 = vld [vmem:[%s872_s1 + $0xa8] sm:$0xff]  }
   0x6   :  { %637 = vmatprep.subr.bf16.mxu1 %v680_v5  ;;  %v686_v11 = vld [vmem:[%s872_s1 + $0x98] sm:$0xff]   ;;  %v688_v14 = vld [vmem:[%s872_s1 + $0x20] sm:$0xff]   ;;  %v691_v17 = vld [vmem:[%s872_s1 + $0x28] sm:$0xff]  }
   0x7   :  { %590 = vmatpush3.bf16.msra.mxu0 %v679_v4  ;;  %v693_v18 = vld [vmem:[%s872_s1 + $0x70] sm:$0xff]   ;;  %v696_v21 = vld [vmem:[%s872_s1 + $0x78] sm:$0xff]   ;;  %v699_v26 = vld [vmem:[%s873_s0] ss:$12 sps:$4 sm:$0xff]  }
   0x8   :  { %591 = vmatprep.subr.bf16.mxu0 %v681_v6  ;;  %v694_v19 = vld [vmem:[%s872_s1 + $0x30] sm:$0xff]   ;;  %v698_v22 = vld [vmem:[%s872_s1 + $0xb8] sm:$0xff]   ;;  %v707_v27 = vld [vmem:[%s874_s2] sm:$0xff]  }
   0x9   :  { %638 = vmatpush3.bf16.msra.mxu1 %v680_v5  ;;  %v695_v20 = vld [vmem:[%s872_s1 + $0xb0] sm:$0xff]   ;;  %v697_v25 = vld [vmem:[%s872_s1 + $0x38] sm:$0xff]   ;;  %v703_v28 = vld [vmem:[%s873_s0 + $0x20] ss:$12 sps:$4 sm:$0xff]  }
   0xa   :  { %639 = vmatprep.subr.bf16.mxu1 %v683_v8  ;;  %v701_v23 = vld [vmem:[%s873_s0 + $0x4] ss:$12 sps:$4 sm:$0xff]   ;;  %v702_v24 = vld [vmem:[%s873_s0 + $0x8] ss:$12 sps:$4 sm:$0xff]   ;;  %v710_v33 = vld [vmem:[%s874_s2 + $0x18] sm:$0xff]  }
   0xb   :  { %592 = vmatpush3.bf16.msra.mxu0 %v682_v7  ;;  %294 = vmatprep.mubr.bf16.mxu0 %v701_v23  ;;  %v704_v29 = vld [vmem:[%s873_s0 + $0x1c] ss:$12 sps:$4 sm:$0xff]   ;;  %v709_v31 = vld [vmem:[%s874_s2 + $0x10] sm:$0xff]   ;;  %v706_v32 = vld [vmem:[%s873_s0 + $0x18] ss:$12 sps:$4 sm:$0xff]  }
   0xc   :  { %593 = vmatprep.subr.bf16.mxu0 %v684_v9  ;;  %651 = vmatprep.mubr.bf16.mxu1 %v702_v24  ;;  %v708_v30 = vld [vmem:[%s874_s2 + $0x8] sm:$0xff]   ;;  %v711_v34 = vld [vmem:[%s874_s2 + $0x20] sm:$0xff]   ;;  %v713_v36 = vld [vmem:[%s874_s2 + $0x30] sm:$0xff]  }
   0xd   :  { %640 = vmatpush3.bf16.msra.mxu1 %v683_v8  ;;  %v712_v35 = vld [vmem:[%s874_s2 + $0x28] sm:$0xff]   ;;  %v714_v37 = vld [vmem:[%s874_s2 + $0x38] sm:$0xff]   ;;  %v383_v0 = vld [vmem:[%s875_s3 + $0x10] sm:$0xff] }
   0xe   :  { %641 = vmatprep.subr.bf16.mxu1 %v686_v11  ;;  %v381_v1 = vld [vmem:[%s875_s3] sm:$0xff]  ;;  %v384_v3 = vld [vmem:[%s875_s3 + $0x18] sm:$0xff]  ;;  %v382_v6 = vld [vmem:[%s875_s3 + $0x8] sm:$0xff] }
   0xf   :  { %594 = vmatpush3.bf16.msra.mxu0 %v685_v10 }
  0x10   :  { %595 = vmatprep.subr.bf16.mxu0 %v687_v12 }
  0x11   :  { %642 = vmatpush3.bf16.msra.mxu1 %v686_v11 }
  0x12   :  { %643 = vmatprep.subr.bf16.mxu1 %v689_v13 }
  0x13   :  { %596 = vmatpush3.bf16.msra.mxu0 %v688_v14 }
  0x14   :  { %597 = vmatprep.subr.bf16.mxu0 %v690_v15 }
  0x15   :  { %644 = vmatpush3.bf16.msra.mxu1 %v689_v13 }
  0x16   :  { %645 = vmatprep.subr.bf16.mxu1 %v692_v16 }
  0x17   :  { %598 = vmatpush3.bf16.msra.mxu0 %v691_v17 }
  0x18   :  { %599 = vmatprep.subr.bf16.mxu0 %v693_v18 }
  0x19   :  { %646 = vmatpush3.bf16.msra.mxu1 %v692_v16 }
  0x1a   :  { %647 = vmatprep.subr.bf16.mxu1 %v695_v20 }
  0x1b   :  { %600 = vmatpush3.bf16.msra.mxu0 %v694_v19 }
  0x1c   :  { %601 = vmatprep.subr.bf16.mxu0 %v696_v21 }
  0x1d   :  { %648 = vmatpush3.bf16.msra.mxu1 %v695_v20 }
  0x1e   :  { %649 = vmatprep.subr.bf16.mxu1 %v698_v22 }
  0x1f   :  { %602 = vmatpush3.bf16.msra.mxu0 %v697_v25 }
  0x20   :  { %655 = vmatprep.subr.bf16.mxu0 %v707_v27 }
  0x21   :  { %650 = vmatpush3.bf16.msra.mxu1 %v698_v22 }
  0x22   :  { %295 = vmatmul.mubr.bf16.vlgmr.msra.gmra.mrb[0].mxu0 %v699_v26 }
  0x23   :  { %302 = vmatprep.mubr.bf16.mxu0 %v704_v29  ;;  %656 = vmatpush3.bf16.msra.mxu0 %v707_v27 }
  0x24   :  { %652 = vmatmul.mubr.bf16.vlgmr.msra.gmra.mrb[0].mxu1 %v703_v28  ;;  %657 = vmatprep.subr.bf16.mxu0 %v708_v30 }
  0x27   :  { %658 = vmatpush3.bf16.msra.mxu0 %v708_v30 }
  0x28   :  { %659 = vmatprep.subr.bf16.mxu0 %v709_v31 }
  0x2a   :  { %303 = vmatmul.mubr.bf16.gmra.mrb[4].mxu0 %v706_v32 }
  0x2b   :  { %660 = vmatpush3.bf16.msra.mxu0 %v709_v31 }
  0x2c   :  { %661 = vmatprep.subr.bf16.mxu0 %v710_v33 }
  0x2f   :  { %662 = vmatpush3.bf16.msra.mxu0 %v710_v33 }
  0x30   :  { %663 = vmatprep.subr.bf16.mxu0 %v711_v34 }
  0x33   :  { %664 = vmatpush3.bf16.msra.mxu0 %v711_v34 }
  0x34   :  { %665 = vmatprep.subr.bf16.mxu0 %v712_v35 }
  0x37   :  { %666 = vmatpush3.bf16.msra.mxu0 %v712_v35 }
  0x38   :  { %667 = vmatprep.subr.bf16.mxu0 %v713_v36 }
  0x3b   :  { %668 = vmatpush3.bf16.msra.mxu0 %v713_v36 }
  0x3c   :  { %669 = vmatprep.subr.bf16.mxu0 %v714_v37 }
  0x3f   :  { %670 = vmatpush3.bf16.msra.mxu0 %v714_v37 }
  0xf5   :  { %v603_v38 = vpop.f32.mrb[0].mxu0 }
  0xf6   :  { %v604_v39 = vpop.f32.mrb[1].mxu0 }
  0xf7   :  { %v605_v40 = vadd.f32 %v604_v39, %v603_v38  ;;  %v606_v41 = vpop.f32.mrb[2].mxu0  ;;  %v653_v42 = vpop.f32.mrb[0].mxu1 }
  0xf8   :  { %v607_v43 = vpop.f32.mrb[3].mxu0  ;;  %v345_v44 = vpop.f32.mrb[1].mxu1 }
  0xf9   :  { %v608_v45 = vadd.f32 %v607_v43, %v606_v41  ;;  %v346_v46 = vadd.f32 %v605_v40, %v345_v44  ;;  %v654_v47 = vpop.f32.mrb[2].mxu1 }
  0xfa   :  { %v348_v48 = vpop.f32.mrb[3].mxu1 }
  0xfb   :  { %v349_v49 = vadd.f32 %v608_v45, %v348_v48  ;;  %v375_v50 = vmax.f32 %v346_v46, 0.0 }
  0xfd   :  { %v376_v51 = vmax.f32 %v349_v49, 0.0  ;;  %v609_v52 = vpop.f32.mrb[4].mxu0 }
  0xfe   :  { %v610_v53 = vpop.f32.mrb[5].mxu0 }
  0xff   :  { %v379_v54 = vpack.c.bf16 %v376_v51, %v375_v50  ;;  %v611_v55 = vadd.f32 %v610_v53, %v609_v52  ;;  %v612_v56 = vpop.f32.mrb[6].mxu0 }
 0x100   :  { %v613_v57 = vpop.f32.mrb[7].mxu0 }
 0x101   :  { %v354_v58 = vadd.f32 %v653_v42, %v611_v55  ;;  %v614_v59 = vadd.f32 %v613_v57, %v612_v56  ;;  %671 = vmatprep.mubr.bf16.mxu0 %v379_v54 }
 0x103   :  { %v357_v60 = vadd.f32 %v654_v47, %v614_v59  ;;  %v377_v61 = vmax.f32 %v354_v58, 0.0 }
 0x105   :  { %v378_v62 = vmax.f32 %v357_v60, 0.0 }
 0x107   :  { %v380_v63 = vpack.c.bf16 %v378_v62, %v377_v61 }
 0x109   :  { %672 = vmatmul.mubr.bf16.vlgmr.msra.gmra.mrb[8].mxu0 %v380_v63 }
 0x1dc   :  { %v673_v2 = vpop.f32.mrb[8].mxu0 }
 0x1dd   :  { %v500_v4 = vadd.f32 %v673_v2, %v383_v0  ;;  %v483_v5 = vpop.f32.mrb[9].mxu0 }
 0x1de   :  { %v498_v7 = vadd.f32 %v483_v5, %v381_v1  ;;  %v674_v8 = vpop.f32.mrb[10].mxu0 }
 0x1df   :  { %v501_v9 = vadd.f32 %v674_v8, %v384_v3  ;;  %v486_v10 = vpop.f32.mrb[11].mxu0  ;;  %v504_v12 = vmax.f32 %v500_v4, 0.0 }
 0x1e0   :  { %v499_v11 = vadd.f32 %v486_v10, %v382_v6  ;;  %v502_v14 = vmax.f32 %v498_v7, 0.0 }
 0x1e1   :  { %v505_v13 = vmax.f32 %v501_v9, 0.0 }
 0x1e2   :  { %v503_v15 = vmax.f32 %v499_v11, 0.0 }
 0x1e3   :  { %v584_v16 = vpack.c.bf16 %v505_v13, %v504_v12 }
 0x1e4   :  { %v579_v17 = vpack.c.bf16 %v503_v15, %v502_v14 }
 0x1e5   :  { %586 = vst [vmem:[%s876_s4 + $0x8] sm:$0xff] %v584_v16  }
 0x1e6   :  { %580 = vst [vmem:[%s876_s4] sm:$0xff] %v579_v17  }

// kernel: vqvae_forward.17
= control target key start
LH: loop header
LB: loop body
LE: loop exit
PB: predicated region body
PF: predicated region fallthrough
CT: control target
= control target key end

     0   :  { %s306_s1 = inlined_call_operand.vmem [shape: bf16[128,128], index: 1, kind: input, shape index: {}]   ;;  %s307_s0 = inlined_call_operand.vmem [shape: bf16[32,128], index: 0, kind: input, shape index: {}]   ;;  %s308_s2 = inlined_call_operand.vmem [shape: f32[1,128], index: 2, kind: input, shape index: {}]   ;;  %s309_s3 = inlined_call_operand.vmem [shape: f32[32,128], index: 3, kind: output, shape index: {}]  }
   0x1   :  { %v231_v0 = vld [vmem:[%s306_s1] sm:$0xff]   ;;  %v232_v1 = vld [vmem:[%s306_s1 + $0x8] sm:$0xff]   ;;  %v233_v2 = vld [vmem:[%s306_s1 + $0x10] sm:$0xff]  }
   0x2   :  { %211 = vmatprep.subr.bf16.mxu0 %v231_v0  ;;  %v234_v3 = vld [vmem:[%s306_s1 + $0x18] sm:$0xff]   ;;  %v239_v4 = vld [vmem:[%s307_s0] sm:$0xff]   ;;  %v236_v6 = vld [vmem:[%s306_s1 + $0x28] sm:$0xff]  }
   0x3   :  { %212 = vmatpush3.bf16.msra.mxu0 %v231_v0  ;;  %227 = vmatprep.mubr.bf16.mxu0 %v239_v4  ;;  %v235_v5 = vld [vmem:[%s306_s1 + $0x20] sm:$0xff]   ;;  %v237_v7 = vld [vmem:[%s306_s1 + $0x30] sm:$0xff]   ;;  %v238_v8 = vld [vmem:[%s306_s1 + $0x38] sm:$0xff]  }
   0x4   :  { %213 = vmatprep.subr.bf16.mxu0 %v232_v1  ;;  %v240_v9 = vld [vmem:[%s307_s0 + $0x8] sm:$0xff]   ;;  %v200_v10 = vld [vmem:[%s308_s2] ss:$0 sm:$0xff] }
   0x7   :  { %214 = vmatpush3.bf16.msra.mxu0 %v232_v1 }
   0x8   :  { %215 = vmatprep.subr.bf16.mxu0 %v233_v2 }
   0xb   :  { %216 = vmatpush3.bf16.msra.mxu0 %v233_v2 }
   0xc   :  { %217 = vmatprep.subr.bf16.mxu0 %v234_v3 }
   0xf   :  { %218 = vmatpush3.bf16.msra.mxu0 %v234_v3 }
  0x10   :  { %219 = vmatprep.subr.bf16.mxu0 %v235_v5 }
  0x13   :  { %220 = vmatpush3.bf16.msra.mxu0 %v235_v5 }
  0x14   :  { %221 = vmatprep.subr.bf16.mxu0 %v236_v6 }
  0x17   :  { %222 = vmatpush3.bf16.msra.mxu0 %v236_v6 }
  0x18   :  { %223 = vmatprep.subr.bf16.mxu0 %v237_v7 }
  0x1b   :  { %224 = vmatpush3.bf16.msra.mxu0 %v237_v7 }
  0x1c   :  { %225 = vmatprep.subr.bf16.mxu0 %v238_v8 }
  0x1f   :  { %226 = vmatpush3.bf16.msra.mxu0 %v238_v8 }
  0x22   :  { %228 = vmatmul.mubr.bf16.vlgmr.msra.gmra.mrb[0].mxu0 %v240_v9 }
  0xf5   :  { %v229_v11 = vpop.f32.mrb[0].mxu0 }
  0xf6   :  { %v180_v12 = vadd.f32 %v229_v11, %v200_v10  ;;  %v141_v13 = vpop.f32.mrb[1].mxu0 }
  0xf7   :  { %v178_v14 = vadd.f32 %v200_v10, %v141_v13  ;;  %v230_v15 = vpop.f32.mrb[2].mxu0 }
  0xf8   :  { %184 = vst [vmem:[%s309_s3 + $0x10] sm:$0xff] %v180_v12  ;;  %v181_v16 = vadd.f32 %v230_v15, %v200_v10  ;;  %v144_v17 = vpop.f32.mrb[3].mxu0 }
  0xf9   :  { %182 = vst [vmem:[%s309_s3] sm:$0xff] %v178_v14  ;;  %v179_v18 = vadd.f32 %v200_v10, %v144_v17 }
  0xfa   :  { %185 = vst [vmem:[%s309_s3 + $0x18] sm:$0xff] %v181_v16 }
  0xfb   :  { %183 = vst [vmem:[%s309_s3 + $0x8] sm:$0xff] %v179_v18 }

// kernel: vqvae_forward.15
= control target key start
LH: loop header
LB: loop body
LE: loop exit
PB: predicated region body
PF: predicated region fallthrough
CT: control target
= control target key end

     0   :  { %s899_s1 = inlined_call_operand.vmem [shape: bf16[384,128], index: 1, kind: input, shape index: {}]   ;;  %s900_s0 = inlined_call_operand.vmem [shape: bf16[32,384], index: 0, kind: input, shape index: {}]   ;;  %s901_s2 = inlined_call_operand.vmem [shape: bf16[128,128], index: 2, kind: input, shape index: {}]   ;;  %s902_s3 = inlined_call_operand.vmem [shape: f32[32,128], index: 3, kind: input, shape index: {}]   ;;  %s903_s4 = inlined_call_operand.vmem [shape: f32[32,128], index: 4, kind: output, shape index: {0}]   ;;  %s904_s5 = inlined_call_operand.vmem [shape: bf16[32,128], index: 5, kind: output, shape index: {1}]  }
   0x1   :  { %v685_v0 = vld [vmem:[%s899_s1 + $0x40] sm:$0xff]   ;;  %v688_v3 = vld [vmem:[%s899_s1 + $0x48] sm:$0xff]   ;;  %v691_v6 = vld [vmem:[%s899_s1 + $0x50] sm:$0xff]  }
   0x2   :  { %v686_v1 = vld [vmem:[%s899_s1] sm:$0xff]   ;;  %597 = vmatprep.subr.bf16.mxu0 %v685_v0  ;;  %v689_v4 = vld [vmem:[%s899_s1 + $0x8] sm:$0xff]   ;;  %v692_v7 = vld [vmem:[%s899_s1 + $0x10] sm:$0xff]  }
   0x3   :  { %v687_v2 = vld [vmem:[%s899_s1 + $0x80] sm:$0xff]   ;;  %598 = vmatpush3.bf16.msra.mxu0 %v686_v1  ;;  %v690_v5 = vld [vmem:[%s899_s1 + $0x88] sm:$0xff]   ;;  %v693_v8 = vld [vmem:[%s899_s1 + $0x90] sm:$0xff]  }
   0x4   :  { %645 = vmatprep.subr.bf16.mxu1 %v687_v2  ;;  %599 = vmatprep.subr.bf16.mxu0 %v688_v3  ;;  %v694_v9 = vld [vmem:[%s899_s1 + $0x58] sm:$0xff]   ;;  %v697_v12 = vld [vmem:[%s899_s1 + $0x60] sm:$0xff]   ;;  %v700_v15 = vld [vmem:[%s899_s1 + $0x68] sm:$0xff]  }
   0x5   :  { %646 = vmatpush3.bf16.msra.mxu1 %v687_v2  ;;  %v695_v10 = vld [vmem:[%s899_s1 + $0x18] sm:$0xff]   ;;  %v699_v13 = vld [vmem:[%s899_s1 + $0xa0] sm:$0xff]   ;;  %v702_v16 = vld [vmem:[%s899_s1 + $0xa8] sm:$0xff]  }
   0x6   :  { %647 = vmatprep.subr.bf16.mxu1 %v690_v5  ;;  %v696_v11 = vld [vmem:[%s899_s1 + $0x98] sm:$0xff]   ;;  %v698_v14 = vld [vmem:[%s899_s1 + $0x20] sm:$0xff]   ;;  %v701_v17 = vld [vmem:[%s899_s1 + $0x28] sm:$0xff]  }
   0x7   :  { %600 = vmatpush3.bf16.msra.mxu0 %v689_v4  ;;  %v703_v18 = vld [vmem:[%s899_s1 + $0x70] sm:$0xff]   ;;  %v706_v21 = vld [vmem:[%s899_s1 + $0x78] sm:$0xff]   ;;  %v709_v26 = vld [vmem:[%s900_s0] ss:$12 sps:$4 sm:$0xff]  }
   0x8   :  { %601 = vmatprep.subr.bf16.mxu0 %v691_v6  ;;  %v704_v19 = vld [vmem:[%s899_s1 + $0x30] sm:$0xff]   ;;  %v708_v22 = vld [vmem:[%s899_s1 + $0xb8] sm:$0xff]   ;;  %v717_v27 = vld [vmem:[%s901_s2] sm:$0xff]  }
   0x9   :  { %648 = vmatpush3.bf16.msra.mxu1 %v690_v5  ;;  %v705_v20 = vld [vmem:[%s899_s1 + $0xb0] sm:$0xff]   ;;  %v707_v25 = vld [vmem:[%s899_s1 + $0x38] sm:$0xff]   ;;  %v713_v28 = vld [vmem:[%s900_s0 + $0x20] ss:$12 sps:$4 sm:$0xff]  }
   0xa   :  { %649 = vmatprep.subr.bf16.mxu1 %v693_v8  ;;  %v711_v23 = vld [vmem:[%s900_s0 + $0x4] ss:$12 sps:$4 sm:$0xff]   ;;  %v712_v24 = vld [vmem:[%s900_s0 + $0x8] ss:$12 sps:$4 sm:$0xff]   ;;  %v720_v33 = vld [vmem:[%s901_s2 + $0x18] sm:$0xff]  }
   0xb   :  { %602 = vmatpush3.bf16.msra.mxu0 %v692_v7  ;;  %296 = vmatprep.mubr.bf16.mxu0 %v711_v23  ;;  %v714_v29 = vld [vmem:[%s900_s0 + $0x1c] ss:$12 sps:$4 sm:$0xff]   ;;  %v719_v31 = vld [vmem:[%s901_s2 + $0x10] sm:$0xff]   ;;  %v716_v32 = vld [vmem:[%s900_s0 + $0x18] ss:$12 sps:$4 sm:$0xff]  }
   0xc   :  { %603 = vmatprep.subr.bf16.mxu0 %v694_v9  ;;  %661 = vmatprep.mubr.bf16.mxu1 %v712_v24  ;;  %v718_v30 = vld [vmem:[%s901_s2 + $0x8] sm:$0xff]   ;;  %v721_v34 = vld [vmem:[%s901_s2 + $0x20] sm:$0xff]   ;;  %v723_v36 = vld [vmem:[%s901_s2 + $0x30] sm:$0xff]  }
   0xd   :  { %650 = vmatpush3.bf16.msra.mxu1 %v693_v8  ;;  %v722_v35 = vld [vmem:[%s901_s2 + $0x28] sm:$0xff]   ;;  %v724_v37 = vld [vmem:[%s901_s2 + $0x38] sm:$0xff]   ;;  %v385_v0 = vld [vmem:[%s902_s3 + $0x10] sm:$0xff] }
   0xe   :  { %651 = vmatprep.subr.bf16.mxu1 %v696_v11  ;;  %v383_v1 = vld [vmem:[%s902_s3] sm:$0xff]  ;;  %v386_v3 = vld [vmem:[%s902_s3 + $0x18] sm:$0xff]  ;;  %v384_v6 = vld [vmem:[%s902_s3 + $0x8] sm:$0xff] }
   0xf   :  { %604 = vmatpush3.bf16.msra.mxu0 %v695_v10 }
  0x10   :  { %605 = vmatprep.subr.bf16.mxu0 %v697_v12 }
  0x11   :  { %652 = vmatpush3.bf16.msra.mxu1 %v696_v11 }
  0x12   :  { %653 = vmatprep.subr.bf16.mxu1 %v699_v13 }
  0x13   :  { %606 = vmatpush3.bf16.msra.mxu0 %v698_v14 }
  0x14   :  { %607 = vmatprep.subr.bf16.mxu0 %v700_v15 }
  0x15   :  { %654 = vmatpush3.bf16.msra.mxu1 %v699_v13 }
  0x16   :  { %655 = vmatprep.subr.bf16.mxu1 %v702_v16 }
  0x17   :  { %608 = vmatpush3.bf16.msra.mxu0 %v701_v17 }
  0x18   :  { %609 = vmatprep.subr.bf16.mxu0 %v703_v18 }
  0x19   :  { %656 = vmatpush3.bf16.msra.mxu1 %v702_v16 }
  0x1a   :  { %657 = vmatprep.subr.bf16.mxu1 %v705_v20 }
  0x1b   :  { %610 = vmatpush3.bf16.msra.mxu0 %v704_v19 }
  0x1c   :  { %611 = vmatprep.subr.bf16.mxu0 %v706_v21 }
  0x1d   :  { %658 = vmatpush3.bf16.msra.mxu1 %v705_v20 }
  0x1e   :  { %659 = vmatprep.subr.bf16.mxu1 %v708_v22 }
  0x1f   :  { %612 = vmatpush3.bf16.msra.mxu0 %v707_v25 }
  0x20   :  { %665 = vmatprep.subr.bf16.mxu0 %v717_v27 }
  0x21   :  { %660 = vmatpush3.bf16.msra.mxu1 %v708_v22 }
  0x22   :  { %297 = vmatmul.mubr.bf16.vlgmr.msra.gmra.mrb[0].mxu0 %v709_v26 }
  0x23   :  { %304 = vmatprep.mubr.bf16.mxu0 %v714_v29  ;;  %666 = vmatpush3.bf16.msra.mxu0 %v717_v27 }
  0x24   :  { %662 = vmatmul.mubr.bf16.vlgmr.msra.gmra.mrb[0].mxu1 %v713_v28  ;;  %667 = vmatprep.subr.bf16.mxu0 %v718_v30 }
  0x27   :  { %668 = vmatpush3.bf16.msra.mxu0 %v718_v30 }
  0x28   :  { %669 = vmatprep.subr.bf16.mxu0 %v719_v31 }
  0x2a   :  { %305 = vmatmul.mubr.bf16.gmra.mrb[4].mxu0 %v716_v32 }
  0x2b   :  { %670 = vmatpush3.bf16.msra.mxu0 %v719_v31 }
  0x2c   :  { %671 = vmatprep.subr.bf16.mxu0 %v720_v33 }
  0x2f   :  { %672 = vmatpush3.bf16.msra.mxu0 %v720_v33 }
  0x30   :  { %673 = vmatprep.subr.bf16.mxu0 %v721_v34 }
  0x33   :  { %674 = vmatpush3.bf16.msra.mxu0 %v721_v34 }
  0x34   :  { %675 = vmatprep.subr.bf16.mxu0 %v722_v35 }
  0x37   :  { %676 = vmatpush3.bf16.msra.mxu0 %v722_v35 }
  0x38   :  { %677 = vmatprep.subr.bf16.mxu0 %v723_v36 }
  0x3b   :  { %678 = vmatpush3.bf16.msra.mxu0 %v723_v36 }
  0x3c   :  { %679 = vmatprep.subr.bf16.mxu0 %v724_v37 }
  0x3f   :  { %680 = vmatpush3.bf16.msra.mxu0 %v724_v37 }
  0xf5   :  { %v613_v38 = vpop.f32.mrb[0].mxu0 }
  0xf6   :  { %v614_v39 = vpop.f32.mrb[1].mxu0 }
  0xf7   :  { %v615_v40 = vadd.f32 %v614_v39, %v613_v38  ;;  %v616_v41 = vpop.f32.mrb[2].mxu0  ;;  %v663_v42 = vpop.f32.mrb[0].mxu1 }
  0xf8   :  { %v617_v43 = vpop.f32.mrb[3].mxu0  ;;  %v347_v44 = vpop.f32.mrb[1].mxu1 }
  0xf9   :  { %v618_v45 = vadd.f32 %v617_v43, %v616_v41  ;;  %v348_v46 = vadd.f32 %v615_v40, %v347_v44  ;;  %v664_v47 = vpop.f32.mrb[2].mxu1 }
  0xfa   :  { %v350_v48 = vpop.f32.mrb[3].mxu1 }
  0xfb   :  { %v351_v49 = vadd.f32 %v618_v45, %v350_v48  ;;  %v377_v50 = vmax.f32 %v348_v46, 0.0 }
  0xfd   :  { %v378_v51 = vmax.f32 %v351_v49, 0.0  ;;  %v619_v52 = vpop.f32.mrb[4].mxu0 }
  0xfe   :  { %v620_v53 = vpop.f32.mrb[5].mxu0 }
  0xff   :  { %v381_v54 = vpack.c.bf16 %v378_v51, %v377_v50  ;;  %v621_v55 = vadd.f32 %v620_v53, %v619_v52  ;;  %v622_v56 = vpop.f32.mrb[6].mxu0 }
 0x100   :  { %v623_v57 = vpop.f32.mrb[7].mxu0 }
 0x101   :  { %v356_v58 = vadd.f32 %v663_v42, %v621_v55  ;;  %v624_v59 = vadd.f32 %v623_v57, %v622_v56  ;;  %681 = vmatprep.mubr.bf16.mxu0 %v381_v54 }
 0x103   :  { %v359_v60 = vadd.f32 %v664_v47, %v624_v59  ;;  %v379_v61 = vmax.f32 %v356_v58, 0.0 }
 0x105   :  { %v380_v62 = vmax.f32 %v359_v60, 0.0 }
 0x107   :  { %v382_v63 = vpack.c.bf16 %v380_v62, %v379_v61 }
 0x109   :  { %682 = vmatmul.mubr.bf16.vlgmr.msra.gmra.mrb[8].mxu0 %v382_v63 }
 0x1dc   :  { %v683_v2 = vpop.f32.mrb[8].mxu0 }
 0x1dd   :  { %v502_v4 = vadd.f32 %v683_v2, %v385_v0  ;;  %v485_v5 = vpop.f32.mrb[9].mxu0 }
 0x1de   :  { %v500_v7 = vadd.f32 %v485_v5, %v383_v1  ;;  %v684_v8 = vpop.f32.mrb[10].mxu0 }
 0x1df   :  { %506 = vst [vmem:[%s903_s4 + $0x10] sm:$0xff] %v502_v4  ;;  %v503_v9 = vadd.f32 %v684_v8, %v386_v3  ;;  %v488_v10 = vpop.f32.mrb[11].mxu0  ;;  %v510_v12 = vmax.f32 %v502_v4, 0.0 }
 0x1e0   :  { %504 = vst [vmem:[%s903_s4] sm:$0xff] %v500_v7  ;;  %v501_v11 = vadd.f32 %v488_v10, %v384_v6  ;;  %v508_v14 = vmax.f32 %v500_v7, 0.0 }
 0x1e1   :  { %507 = vst [vmem:[%s903_s4 + $0x18] sm:$0xff] %v503_v9  ;;  %v511_v13 = vmax.f32 %v503_v9, 0.0 }
 0x1e2   :  { %505 = vst [vmem:[%s903_s4 + $0x8] sm:$0xff] %v501_v11  ;;  %v509_v15 = vmax.f32 %v501_v11, 0.0 }
 0x1e3   :  { %v594_v16 = vpack.c.bf16 %v511_v13, %v510_v12 }
 0x1e4   :  { %v589_v17 = vpack.c.bf16 %v509_v15, %v508_v14 }
 0x1e5   :  { %596 = vst [vmem:[%s904_s5 + $0x8] sm:$0xff] %v594_v16  }
 0x1e6   :  { %590 = vst [vmem:[%s904_s5] sm:$0xff] %v589_v17  }

// kernel: vqvae_forward.18
= control target key start
LH: loop header
LB: loop body
LE: loop exit
PB: predicated region body
PF: predicated region fallthrough
CT: control target
= control target key end

     0   :  { %s367_s1 = inlined_call_operand.vmem [shape: f32[128,128], index: 1, kind: input, shape index: {}]   ;;  %s368_s0 = inlined_call_operand.vmem [shape: f32[32,128], index: 0, kind: input, shape index: {}]   ;;  %s369_s2 = inlined_call_operand.vmem [shape: f32[1,128], index: 2, kind: input, shape index: {}]   ;;  %s370_s3 = inlined_call_operand.vmem [shape: f32[32,128], index: 3, kind: output, shape index: {}]  }
   0x1   :  { %v30_v0 = vld [vmem:[%s367_s1] sm:$0xff]  ;;  %v31_v1 = vld [vmem:[%s367_s1 + $0x8] sm:$0xff]  ;;  %v32_v2 = vld [vmem:[%s367_s1 + $0x10] sm:$0xff] }
   0x2   :  { %v224_v3 = vpack.c.bf16 %v31_v1, %v30_v0  ;;  %v33_v4 = vld [vmem:[%s367_s1 + $0x18] sm:$0xff]  ;;  %v34_v6 = vld [vmem:[%s367_s1 + $0x20] sm:$0xff]  ;;  %v35_v7 = vld [vmem:[%s367_s1 + $0x28] sm:$0xff] }
   0x3   :  { %v228_v5 = vpack.c.bf16 %v33_v4, %v32_v2  ;;  %v232_v8 = vpack.c.bf16 %v35_v7, %v34_v6  ;;  %v26_v9 = vld [vmem:[%s368_s0] sm:$0xff]  ;;  %v28_v10 = vld [vmem:[%s368_s0 + $0x10] sm:$0xff]  ;;  %v37_v12 = vld [vmem:[%s367_s1 + $0x38] sm:$0xff] }
   0x4   :  { %225 = vmatprep.subr.bf16.mxu0 %v224_v3  ;;  %256 = vmatprep.subr.bf16.mxu1 %v224_v3  ;;  %v36_v11 = vld [vmem:[%s367_s1 + $0x30] sm:$0xff]  ;;  %v38_v14 = vld [vmem:[%s367_s1 + $0x40] sm:$0xff]  ;;  %v39_v15 = vld [vmem:[%s367_s1 + $0x48] sm:$0xff] }
   0x5   :  { %227 = vmatpush3.bf16.msra.mxu0 %v224_v3  ;;  %264 = vmatpush3.bf16.msra.mxu1 %v224_v3  ;;  %v236_v13 = vpack.c.bf16 %v37_v12, %v36_v11  ;;  %v240_v16 = vpack.c.bf16 %v39_v15, %v38_v14  ;;  %v40_v17 = vld [vmem:[%s367_s1 + $0x50] sm:$0xff]  ;;  %v41_v18 = vld [vmem:[%s367_s1 + $0x58] sm:$0xff]  ;;  %v42_v20 = vld [vmem:[%s367_s1 + $0x60] sm:$0xff] }
   0x6   :  { %229 = vmatprep.subr.bf16.mxu0 %v228_v5  ;;  %257 = vmatprep.subr.bf16.mxu1 %v228_v5  ;;  %v244_v19 = vpack.c.bf16 %v41_v18, %v40_v17  ;;  %v43_v21 = vld [vmem:[%s367_s1 + $0x68] sm:$0xff]  ;;  %v44_v23 = vld [vmem:[%s367_s1 + $0x70] sm:$0xff]  ;;  %v45_v24 = vld [vmem:[%s367_s1 + $0x78] sm:$0xff] }
   0x7   :  { %218 = vmatprep.mubr.f32.mxu0 %v26_v9  ;;  %221 = vmatprep.mubr.f32.mxu1 %v28_v10  ;;  %v248_v22 = vpack.c.bf16 %v43_v21, %v42_v20  ;;  %v252_v25 = vpack.c.bf16 %v45_v24, %v44_v23  ;;  %v27_v26 = vld [vmem:[%s368_s0 + $0x8] sm:$0xff]  ;;  %v29_v27 = vld [vmem:[%s368_s0 + $0x18] sm:$0xff]  ;;  %v165_v28 = vld [vmem:[%s369_s2] ss:$0 sm:$0xff] }
   0x9   :  { %231 = vmatpush3.bf16.msra.mxu0 %v228_v5  ;;  %265 = vmatpush3.bf16.msra.mxu1 %v228_v5 }
   0xa   :  { %233 = vmatprep.subr.bf16.mxu0 %v232_v8  ;;  %258 = vmatprep.subr.bf16.mxu1 %v232_v8 }
   0xd   :  { %235 = vmatpush3.bf16.msra.mxu0 %v232_v8  ;;  %266 = vmatpush3.bf16.msra.mxu1 %v232_v8 }
   0xe   :  { %237 = vmatprep.subr.bf16.mxu0 %v236_v13  ;;  %259 = vmatprep.subr.bf16.mxu1 %v236_v13 }
  0x11   :  { %239 = vmatpush3.bf16.msra.mxu0 %v236_v13  ;;  %267 = vmatpush3.bf16.msra.mxu1 %v236_v13 }
  0x12   :  { %241 = vmatprep.subr.bf16.mxu0 %v240_v16  ;;  %260 = vmatprep.subr.bf16.mxu1 %v240_v16 }
  0x15   :  { %243 = vmatpush3.bf16.msra.mxu0 %v240_v16  ;;  %268 = vmatpush3.bf16.msra.mxu1 %v240_v16 }
  0x16   :  { %245 = vmatprep.subr.bf16.mxu0 %v244_v19  ;;  %261 = vmatprep.subr.bf16.mxu1 %v244_v19 }
  0x19   :  { %247 = vmatpush3.bf16.msra.mxu0 %v244_v19  ;;  %269 = vmatpush3.bf16.msra.mxu1 %v244_v19 }
  0x1a   :  { %249 = vmatprep.subr.bf16.mxu0 %v248_v22  ;;  %262 = vmatprep.subr.bf16.mxu1 %v248_v22 }
  0x1d   :  { %251 = vmatpush3.bf16.msra.mxu0 %v248_v22  ;;  %270 = vmatpush3.bf16.msra.mxu1 %v248_v22 }
  0x1e   :  { %253 = vmatprep.subr.bf16.mxu0 %v252_v25  ;;  %263 = vmatprep.subr.bf16.mxu1 %v252_v25 }
  0x21   :  { %255 = vmatpush3.bf16.msra.mxu0 %v252_v25  ;;  %271 = vmatpush3.bf16.msra.mxu1 %v252_v25 }
  0x24   :  { %219 = vmatmul.mubr.f32.vlgmr.msra.gmra.mrb[0].mxu0 %v27_v26  ;;  %222 = vmatmul.mubr.f32.vlgmr.msra.gmra.mrb[0].mxu1 %v29_v27 }
  0xf7   :  { %v220_v29 = vpop.f32.mrb[0].mxu0  ;;  %v223_v30 = vpop.f32.mrb[0].mxu1 }
  0xf8   :  { %v154_v31 = vadd.f32 %v220_v29, %v165_v28  ;;  %v156_v32 = vadd.f32 %v223_v30, %v165_v28  ;;  %v112_v33 = vpop.f32.mrb[1].mxu0  ;;  %v122_v34 = vpop.f32.mrb[1].mxu1 }
  0xf9   :  { %v153_v35 = vadd.f32 %v165_v28, %v112_v33  ;;  %v155_v36 = vadd.f32 %v165_v28, %v122_v34 }
  0xfa   :  { %158 = vst [vmem:[%s370_s3 + $0x8] sm:$0xff] %v154_v31  ;;  %160 = vst [vmem:[%s370_s3 + $0x18] sm:$0xff] %v156_v32 }
  0xfb   :  { %157 = vst [vmem:[%s370_s3] sm:$0xff] %v153_v35  ;;  %159 = vst [vmem:[%s370_s3 + $0x10] sm:$0xff] %v155_v36 }

// kernel: vqvae_forward.19
= control target key start
LH: loop header
LB: loop body
LE: loop exit
PB: predicated region body
PF: predicated region fallthrough
CT: control target
= control target key end

     0   :  { %s504_s1 = inlined_call_operand.vmem [shape: bf16[256,128], index: 1, kind: input, shape index: {}]   ;;  %s505_s0 = inlined_call_operand.vmem [shape: bf16[32,256], index: 0, kind: input, shape index: {}]   ;;  %s506_s2 = inlined_call_operand.vmem [shape: f32[1,128], index: 2, kind: input, shape index: {}]   ;;  %s507_s3 = inlined_call_operand.vmem [shape: f32[32,128], index: 3, kind: output, shape index: {0}]   ;;  %s508_s4 = inlined_call_operand.vmem [shape: bf16[32,128], index: 4, kind: output, shape index: {1}]  }
   0x1   :  { %v376_v0 = vld [vmem:[%s504_s1 + $0x40] sm:$0xff]   ;;  %v378_v2 = vld [vmem:[%s504_s1 + $0x48] sm:$0xff]   ;;  %v380_v4 = vld [vmem:[%s504_s1 + $0x50] sm:$0xff]  }
   0x2   :  { %v377_v1 = vld [vmem:[%s504_s1] sm:$0xff]   ;;  %332 = vmatprep.subr.bf16.mxu0 %v376_v0  ;;  %360 = vmatprep.subr.bf16.mxu1 %v376_v0  ;;  %v379_v3 = vld [vmem:[%s504_s1 + $0x8] sm:$0xff]   ;;  %v381_v5 = vld [vmem:[%s504_s1 + $0x10] sm:$0xff]  }
   0x3   :  { %333 = vmatpush3.bf16.msra.mxu0 %v377_v1  ;;  %368 = vmatpush3.bf16.msra.mxu1 %v377_v1  ;;  %v382_v6 = vld [vmem:[%s504_s1 + $0x58] sm:$0xff]   ;;  %v384_v8 = vld [vmem:[%s504_s1 + $0x60] sm:$0xff]   ;;  %v386_v10 = vld [vmem:[%s504_s1 + $0x68] sm:$0xff]  }
   0x4   :  { %334 = vmatprep.subr.bf16.mxu0 %v378_v2  ;;  %361 = vmatprep.subr.bf16.mxu1 %v378_v2  ;;  %v383_v7 = vld [vmem:[%s504_s1 + $0x18] sm:$0xff]   ;;  %v385_v9 = vld [vmem:[%s504_s1 + $0x20] sm:$0xff]   ;;  %v387_v13 = vld [vmem:[%s504_s1 + $0x28] sm:$0xff]  }
   0x5   :  { %v394_v11 = vld [vmem:[%s505_s0 + $0x4] ss:$8 sps:$4 sm:$0xff]   ;;  %v397_v12 = vld [vmem:[%s505_s0 + $0x14] ss:$8 sps:$4 sm:$0xff]   ;;  %v392_v18 = vld [vmem:[%s505_s0] ss:$8 sps:$4 sm:$0xff]  }
   0x6   :  { %v388_v14 = vld [vmem:[%s504_s1 + $0x70] sm:$0xff]   ;;  %213 = vmatprep.mubr.bf16.mxu0 %v394_v11  ;;  %221 = vmatprep.mubr.bf16.mxu1 %v397_v12  ;;  %v390_v16 = vld [vmem:[%s504_s1 + $0x78] sm:$0xff]   ;;  %v312_v23 = vld [vmem:[%s506_s2] ss:$0 sm:$0xff] }
   0x7   :  { %335 = vmatpush3.bf16.msra.mxu0 %v379_v3  ;;  %369 = vmatpush3.bf16.msra.mxu1 %v379_v3  ;;  %v389_v15 = vld [vmem:[%s504_s1 + $0x30] sm:$0xff]   ;;  %v391_v17 = vld [vmem:[%s504_s1 + $0x38] sm:$0xff]  }
   0x8   :  { %336 = vmatprep.subr.bf16.mxu0 %v380_v4  ;;  %362 = vmatprep.subr.bf16.mxu1 %v380_v4  ;;  %v395_v19 = vld [vmem:[%s505_s0 + $0x10] ss:$8 sps:$4 sm:$0xff]  }
   0xb   :  { %337 = vmatpush3.bf16.msra.mxu0 %v381_v5  ;;  %370 = vmatpush3.bf16.msra.mxu1 %v381_v5 }
   0xc   :  { %338 = vmatprep.subr.bf16.mxu0 %v382_v6  ;;  %363 = vmatprep.subr.bf16.mxu1 %v382_v6 }
   0xf   :  { %339 = vmatpush3.bf16.msra.mxu0 %v383_v7  ;;  %371 = vmatpush3.bf16.msra.mxu1 %v383_v7 }
  0x10   :  { %340 = vmatprep.subr.bf16.mxu0 %v384_v8  ;;  %364 = vmatprep.subr.bf16.mxu1 %v384_v8 }
  0x13   :  { %341 = vmatpush3.bf16.msra.mxu0 %v385_v9  ;;  %372 = vmatpush3.bf16.msra.mxu1 %v385_v9 }
  0x14   :  { %342 = vmatprep.subr.bf16.mxu0 %v386_v10  ;;  %365 = vmatprep.subr.bf16.mxu1 %v386_v10 }
  0x17   :  { %343 = vmatpush3.bf16.msra.mxu0 %v387_v13  ;;  %373 = vmatpush3.bf16.msra.mxu1 %v387_v13 }
  0x18   :  { %344 = vmatprep.subr.bf16.mxu0 %v388_v14  ;;  %366 = vmatprep.subr.bf16.mxu1 %v388_v14 }
  0x1b   :  { %345 = vmatpush3.bf16.msra.mxu0 %v389_v15  ;;  %374 = vmatpush3.bf16.msra.mxu1 %v389_v15 }
  0x1c   :  { %346 = vmatprep.subr.bf16.mxu0 %v390_v16  ;;  %367 = vmatprep.subr.bf16.mxu1 %v390_v16 }
  0x1f   :  { %347 = vmatpush3.bf16.msra.mxu0 %v391_v17  ;;  %375 = vmatpush3.bf16.msra.mxu1 %v391_v17 }
  0x22   :  { %214 = vmatmul.mubr.bf16.vlgmr.msra.gmra.mrb[0].mxu0 %v392_v18  ;;  %222 = vmatmul.mubr.bf16.vlgmr.msra.gmra.mrb[0].mxu1 %v395_v19 }
  0xf5   :  { %v348_v20 = vpop.f32.mrb[0].mxu0  ;;  %v354_v21 = vpop.f32.mrb[0].mxu1 }
  0xf6   :  { %v349_v22 = vpop.f32.mrb[1].mxu0  ;;  %v355_v24 = vpop.f32.mrb[1].mxu1 }
  0xf7   :  { %v350_v25 = vadd.f32 %v349_v22, %v348_v20  ;;  %v356_v26 = vadd.f32 %v355_v24, %v354_v21  ;;  %v351_v27 = vpop.f32.mrb[2].mxu0  ;;  %v357_v28 = vpop.f32.mrb[2].mxu1 }
  0xf8   :  { %v352_v29 = vpop.f32.mrb[3].mxu0  ;;  %v358_v30 = vpop.f32.mrb[3].mxu1 }
  0xf9   :  { %v252_v31 = vadd.f32 %v350_v25, %v312_v23  ;;  %v254_v32 = vadd.f32 %v356_v26, %v312_v23  ;;  %v353_v33 = vadd.f32 %v352_v29, %v351_v27  ;;  %v359_v34 = vadd.f32 %v358_v30, %v357_v28 }
  0xfb   :  { %256 = vst [vmem:[%s507_s3] sm:$0xff] %v252_v31  ;;  %258 = vst [vmem:[%s507_s3 + $0x10] sm:$0xff] %v254_v32  ;;  %v253_v35 = vadd.f32 %v353_v33, %v312_v23  ;;  %v255_v36 = vadd.f32 %v359_v34, %v312_v23  ;;  %v260_v37 = vmax.f32 %v252_v31, 0.0  ;;  %v262_v38 = vmax.f32 %v254_v32, 0.0 }
  0xfd   :  { %257 = vst [vmem:[%s507_s3 + $0x8] sm:$0xff] %v253_v35  ;;  %v261_v39 = vmax.f32 %v253_v35, 0.0  ;;  %259 = vst [vmem:[%s507_s3 + $0x18] sm:$0xff] %v255_v36  ;;  %v263_v40 = vmax.f32 %v255_v36, 0.0 }
  0xff   :  { %v324_v41 = vpack.c.bf16 %v261_v39, %v260_v37  ;;  %v329_v42 = vpack.c.bf16 %v263_v40, %v262_v38 }
 0x101   :  { %325 = vst [vmem:[%s508_s4] sm:$0xff] %v324_v41   ;;  %331 = vst [vmem:[%s508_s4 + $0x8] sm:$0xff] %v329_v42  }

// kernel: vqvae_forward.22
= control target key start
LH: loop header
LB: loop body
LE: loop exit
PB: predicated region body
PF: predicated region fallthrough
CT: control target
= control target key end

     0   :  { %s1476_s1 = inlined_call_operand.vmem [shape: bf16[512,128], index: 1, kind: input, shape index: {}]   ;;  %s1477_s0 = inlined_call_operand.vmem [shape: bf16[128,512], index: 0, kind: input, shape index: {}]   ;;  %s1478_s2 = inlined_call_operand.vmem [shape: f32[1,128], index: 2, kind: input, shape index: {}]   ;;  %s1479_s3 = inlined_call_operand.vmem [shape: bf16[128,128], index: 3, kind: output, shape index: {}]  }
   0x1   :  { %v1139_v0 = vld [vmem:[%s1476_s1 + $0x40] sm:$0xff]   ;;  %v1143_v4 = vld [vmem:[%s1476_s1 + $0x48] sm:$0xff]   ;;  %v1147_v8 = vld [vmem:[%s1476_s1 + $0x50] sm:$0xff]  }
   0x2   :  { %v1140_v1 = vld [vmem:[%s1476_s1 + $0xc0] sm:$0xff]   ;;  %1011 = vmatprep.subr.bf16.mxu0 %v1139_v0  ;;  %v1144_v5 = vld [vmem:[%s1476_s1 + $0xc8] sm:$0xff]   ;;  %v1148_v9 = vld [vmem:[%s1476_s1 + $0xd0] sm:$0xff]  }
   0x3   :  { %v1141_v2 = vld [vmem:[%s1476_s1] sm:$0xff]   ;;  %1075 = vmatprep.subr.bf16.mxu1 %v1140_v1  ;;  %v1145_v6 = vld [vmem:[%s1476_s1 + $0x8] sm:$0xff]   ;;  %v1149_v10 = vld [vmem:[%s1476_s1 + $0x10] sm:$0xff]  }
   0x4   :  { %v1142_v3 = vld [vmem:[%s1476_s1 + $0x80] sm:$0xff]   ;;  %1012 = vmatpush3.bf16.msra.mxu0 %v1141_v2  ;;  %v1146_v7 = vld [vmem:[%s1476_s1 + $0x88] sm:$0xff]   ;;  %v1150_v11 = vld [vmem:[%s1476_s1 + $0x90] sm:$0xff]  }
   0x5   :  { %1076 = vmatpush3.bf16.msra.mxu1 %v1142_v3  ;;  %1013 = vmatprep.subr.bf16.mxu0 %v1143_v4  ;;  %v1151_v12 = vld [vmem:[%s1476_s1 + $0x58] sm:$0xff]   ;;  %v1155_v16 = vld [vmem:[%s1476_s1 + $0x60] sm:$0xff]   ;;  %v1159_v20 = vld [vmem:[%s1476_s1 + $0x68] sm:$0xff]  }
   0x6   :  { %1077 = vmatprep.subr.bf16.mxu1 %v1144_v5  ;;  %v1152_v13 = vld [vmem:[%s1476_s1 + $0xd8] sm:$0xff]   ;;  %v1156_v17 = vld [vmem:[%s1476_s1 + $0xe0] sm:$0xff]   ;;  %v1160_v21 = vld [vmem:[%s1476_s1 + $0xe8] sm:$0xff]  }
   0x7   :  { %v1153_v14 = vld [vmem:[%s1476_s1 + $0x18] sm:$0xff]   ;;  %v1157_v18 = vld [vmem:[%s1476_s1 + $0x20] sm:$0xff]   ;;  %v1161_v22 = vld [vmem:[%s1476_s1 + $0x28] sm:$0xff]  }
   0x8   :  { %1014 = vmatpush3.bf16.msra.mxu0 %v1145_v6  ;;  %v1154_v15 = vld [vmem:[%s1476_s1 + $0x98] sm:$0xff]   ;;  %v1158_v19 = vld [vmem:[%s1476_s1 + $0xa0] sm:$0xff]   ;;  %v1162_v23 = vld [vmem:[%s1476_s1 + $0xa8] sm:$0xff]  }
   0x9   :  { %1078 = vmatpush3.bf16.msra.mxu1 %v1146_v7  ;;  %1015 = vmatprep.subr.bf16.mxu0 %v1147_v8  ;;  %v1163_v24 = vld [vmem:[%s1476_s1 + $0x70] sm:$0xff]   ;;  %v1167_v28 = vld [vmem:[%s1476_s1 + $0x78] sm:$0xff]  }
   0xa   :  { %1079 = vmatprep.subr.bf16.mxu1 %v1148_v9  ;;  %v1164_v25 = vld [vmem:[%s1476_s1 + $0xf0] sm:$0xff]   ;;  %v1168_v29 = vld [vmem:[%s1476_s1 + $0xf8] sm:$0xff]   ;;  %v1434_v9 = vld [vmem:[%s1478_s2] ss:$0 sm:$0xff] }
   0xb   :  { %v1165_v26 = vld [vmem:[%s1476_s1 + $0x30] sm:$0xff]   ;;  %v1169_v30 = vld [vmem:[%s1476_s1 + $0x38] sm:$0xff]  }
   0xc   :  { %1016 = vmatpush3.bf16.msra.mxu0 %v1149_v10  ;;  %v1166_v27 = vld [vmem:[%s1476_s1 + $0xb0] sm:$0xff]   ;;  %v1170_v31 = vld [vmem:[%s1476_s1 + $0xb8] sm:$0xff]  }
   0xd   :  { %1080 = vmatpush3.bf16.msra.mxu1 %v1150_v11  ;;  %1017 = vmatprep.subr.bf16.mxu0 %v1151_v12  ;;  %v1171_v32 = vld [vmem:[%s1477_s0] ss:$16 sps:$4 sm:$0xff]   ;;  %v1173_v33 = vld [vmem:[%s1477_s0 + $0x4] ss:$16 sps:$4 sm:$0xff]   ;;  %v1174_v34 = vld [vmem:[%s1477_s0 + $0x8] ss:$16 sps:$4 sm:$0xff]  }
   0xe   :  { %1081 = vmatprep.subr.bf16.mxu1 %v1152_v13  ;;  %v1176_v35 = vld [vmem:[%s1477_s0 + $0xc] ss:$16 sps:$4 sm:$0xff]   ;;  %531 = vmatprep.mubr.bf16.mxu0 %v1173_v33  ;;  %v1177_v36 = vld [vmem:[%s1477_s0 + $0x24] ss:$16 sps:$4 sm:$0xff]   ;;  %v1181_v38 = vld [vmem:[%s1477_s0 + $0x20] ss:$16 sps:$4 sm:$0xff]  }
   0xf   :  { %628 = vmatprep.mubr.bf16.mxu1 %v1176_v35  ;;  %v1179_v37 = vld [vmem:[%s1477_s0 + $0x2c] ss:$16 sps:$4 sm:$0xff]   ;;  %v1182_v39 = vld [vmem:[%s1477_s0 + $0x28] ss:$16 sps:$4 sm:$0xff]   ;;  %v1183_v40 = vld [vmem:[%s1477_s0 + $0x44] ss:$16 sps:$4 sm:$0xff]  }
  0x10   :  { %1018 = vmatpush3.bf16.msra.mxu0 %v1153_v14  ;;  %v1185_v41 = vld [vmem:[%s1477_s0 + $0x4c] ss:$16 sps:$4 sm:$0xff]   ;;  %v1187_v42 = vld [vmem:[%s1477_s0 + $0x40] ss:$16 sps:$4 sm:$0xff]   ;;  %v1188_v43 = vld [vmem:[%s1477_s0 + $0x48] ss:$16 sps:$4 sm:$0xff]  }
  0x11   :  { %1082 = vmatpush3.bf16.msra.mxu1 %v1154_v15  ;;  %1019 = vmatprep.subr.bf16.mxu0 %v1155_v16  ;;  %v1189_v44 = vld [vmem:[%s1477_s0 + $0x64] ss:$16 sps:$4 sm:$0xff]   ;;  %v1191_v45 = vld [vmem:[%s1477_s0 + $0x6c] ss:$16 sps:$4 sm:$0xff]   ;;  %v1193_v46 = vld [vmem:[%s1477_s0 + $0x60] ss:$16 sps:$4 sm:$0xff]  }
  0x12   :  { %1083 = vmatprep.subr.bf16.mxu1 %v1156_v17  ;;  %v1194_v47 = vld [vmem:[%s1477_s0 + $0x68] ss:$16 sps:$4 sm:$0xff]   ;;  %v1195_v48 = vld [vmem:[%s1477_s0 + $0x84] ss:$16 sps:$4 sm:$0xff]   ;;  %v1197_v49 = vld [vmem:[%s1477_s0 + $0x8c] ss:$16 sps:$4 sm:$0xff]  }
  0x13   :  { %v1199_v50 = vld [vmem:[%s1477_s0 + $0x80] ss:$16 sps:$4 sm:$0xff]   ;;  %v1200_v51 = vld [vmem:[%s1477_s0 + $0x88] ss:$16 sps:$4 sm:$0xff]   ;;  %v1201_v52 = vld [vmem:[%s1477_s0 + $0xa4] ss:$16 sps:$4 sm:$0xff]  }
  0x14   :  { %1020 = vmatpush3.bf16.msra.mxu0 %v1157_v18  ;;  %v1203_v53 = vld [vmem:[%s1477_s0 + $0xac] ss:$16 sps:$4 sm:$0xff]   ;;  %v1205_v54 = vld [vmem:[%s1477_s0 + $0xa0] ss:$16 sps:$4 sm:$0xff]   ;;  %v1206_v55 = vld [vmem:[%s1477_s0 + $0xa8] ss:$16 sps:$4 sm:$0xff]  }
  0x15   :  { %1084 = vmatpush3.bf16.msra.mxu1 %v1158_v19  ;;  %1021 = vmatprep.subr.bf16.mxu0 %v1159_v20  ;;  %v1207_v56 = vld [vmem:[%s1477_s0 + $0xc4] ss:$16 sps:$4 sm:$0xff]   ;;  %v1209_v57 = vld [vmem:[%s1477_s0 + $0xcc] ss:$16 sps:$4 sm:$0xff]   ;;  %v1211_v58 = vld [vmem:[%s1477_s0 + $0xc0] ss:$16 sps:$4 sm:$0xff]  }
  0x16   :  { %1085 = vmatprep.subr.bf16.mxu1 %v1160_v21  ;;  %v1212_v59 = vld [vmem:[%s1477_s0 + $0xc8] ss:$16 sps:$4 sm:$0xff]   ;;  %v1213_v60 = vld [vmem:[%s1477_s0 + $0xe4] ss:$16 sps:$4 sm:$0xff]   ;;  %v1215_v61 = vld [vmem:[%s1477_s0 + $0xec] ss:$16 sps:$4 sm:$0xff]  }
  0x17   :  { %v1217_v62 = vld [vmem:[%s1477_s0 + $0xe0] ss:$16 sps:$4 sm:$0xff]   ;;  %v1218_v63 = vld [vmem:[%s1477_s0 + $0xe8] ss:$16 sps:$4 sm:$0xff]  }
  0x18   :  { %1022 = vmatpush3.bf16.msra.mxu0 %v1161_v22 }
  0x19   :  { %1086 = vmatpush3.bf16.msra.mxu1 %v1162_v23  ;;  %1023 = vmatprep.subr.bf16.mxu0 %v1163_v24 }
  0x1a   :  { %1087 = vmatprep.subr.bf16.mxu1 %v1164_v25 }
  0x1c   :  { %1024 = vmatpush3.bf16.msra.mxu0 %v1165_v26 }
  0x1d   :  { %1088 = vmatpush3.bf16.msra.mxu1 %v1166_v27  ;;  %1025 = vmatprep.subr.bf16.mxu0 %v1167_v28 }
  0x1e   :  { %1089 = vmatprep.subr.bf16.mxu1 %v1168_v29 }
  0x20   :  { %1026 = vmatpush3.bf16.msra.mxu0 %v1169_v30 }
  0x21   :  { %1090 = vmatpush3.bf16.msra.mxu1 %v1170_v31 }
  0x23   :  { %532 = vmatmul.mubr.bf16.vlgmr.msra.gmra.mrb[0].mxu0 %v1171_v32 }
  0x24   :  { %629 = vmatmul.mubr.bf16.vlgmr.msra.gmra.mrb[0].mxu1 %v1174_v34  ;;  %539 = vmatprep.mubr.bf16.mxu0 %v1177_v36 }
  0x25   :  { %636 = vmatprep.mubr.bf16.mxu1 %v1179_v37 }
  0x2b   :  { %540 = vmatmul.mubr.bf16.gmra.mrb[4].mxu0 %v1181_v38 }
  0x2c   :  { %637 = vmatmul.mubr.bf16.gmra.mrb[4].mxu1 %v1182_v39  ;;  %547 = vmatprep.mubr.bf16.mxu0 %v1183_v40 }
  0x2d   :  { %644 = vmatprep.mubr.bf16.mxu1 %v1185_v41 }
  0x33   :  { %548 = vmatmul.mubr.bf16.gmra.mrb[8].mxu0 %v1187_v42 }
  0x34   :  { %645 = vmatmul.mubr.bf16.gmra.mrb[8].mxu1 %v1188_v43  ;;  %555 = vmatprep.mubr.bf16.mxu0 %v1189_v44 }
  0x35   :  { %652 = vmatprep.mubr.bf16.mxu1 %v1191_v45 }
  0x3b   :  { %556 = vmatmul.mubr.bf16.gmra.mrb[12].mxu0 %v1193_v46 }
  0x3c   :  { %653 = vmatmul.mubr.bf16.gmra.mrb[12].mxu1 %v1194_v47  ;;  %563 = vmatprep.mubr.bf16.mxu0 %v1195_v48 }
  0x3d   :  { %660 = vmatprep.mubr.bf16.mxu1 %v1197_v49 }
  0x43   :  { %564 = vmatmul.mubr.bf16.gmra.mrb[16].mxu0 %v1199_v50 }
  0x44   :  { %661 = vmatmul.mubr.bf16.gmra.mrb[16].mxu1 %v1200_v51  ;;  %571 = vmatprep.mubr.bf16.mxu0 %v1201_v52 }
  0x45   :  { %668 = vmatprep.mubr.bf16.mxu1 %v1203_v53 }
  0x4b   :  { %572 = vmatmul.mubr.bf16.gmra.mrb[20].mxu0 %v1205_v54 }
  0x4c   :  { %669 = vmatmul.mubr.bf16.gmra.mrb[20].mxu1 %v1206_v55  ;;  %579 = vmatprep.mubr.bf16.mxu0 %v1207_v56 }
  0x4d   :  { %676 = vmatprep.mubr.bf16.mxu1 %v1209_v57 }
  0x53   :  { %580 = vmatmul.mubr.bf16.gmra.mrb[24].mxu0 %v1211_v58 }
  0x54   :  { %677 = vmatmul.mubr.bf16.gmra.mrb[24].mxu1 %v1212_v59  ;;  %587 = vmatprep.mubr.bf16.mxu0 %v1213_v60 }
  0x55   :  { %684 = vmatprep.mubr.bf16.mxu1 %v1215_v61 }
  0x5b   :  { %588 = vmatmul.mubr.bf16.gmra.mrb[28].mxu0 %v1217_v62 }
  0x5c   :  { %685 = vmatmul.mubr.bf16.gmra.mrb[28].mxu1 %v1218_v63 }
  0xf6   :  { %v1027_v0 = vpop.f32.mrb[0].mxu0 }
  0xf7   :  { %v1091_v1 = vpop.f32.mrb[0].mxu1  ;;  %v1028_v2 = vpop.f32.mrb[1].mxu0 }
  0xf8   :  { %v1029_v3 = vadd.f32 %v1028_v2, %v1027_v0  ;;  %v1092_v4 = vpop.f32.mrb[1].mxu1  ;;  %v1030_v5 = vpop.f32.mrb[2].mxu0 }
  0xf9   :  { %v1093_v6 = vadd.f32 %v1092_v4, %v1091_v1  ;;  %v1094_v7 = vpop.f32.mrb[2].mxu1  ;;  %v1031_v8 = vpop.f32.mrb[3].mxu0 }
  0xfa   :  { %v1032_v10 = vadd.f32 %v1031_v8, %v1030_v5  ;;  %v1095_v11 = vpop.f32.mrb[3].mxu1 }
  0xfb   :  { %v631_v12 = vadd.f32 %v1093_v6, %v1029_v3  ;;  %v1096_v13 = vadd.f32 %v1095_v11, %v1094_v7 }
  0xfd   :  { %v751_v14 = vadd.f32 %v1434_v9, %v631_v12  ;;  %v634_v15 = vadd.f32 %v1096_v13, %v1032_v10 }
  0xfe   :  { %v1033_v16 = vpop.f32.mrb[4].mxu0 }
  0xff   :  { %v752_v17 = vadd.f32 %v1434_v9, %v634_v15  ;;  %v1097_v18 = vpop.f32.mrb[4].mxu1  ;;  %v1034_v19 = vpop.f32.mrb[5].mxu0  ;;  %v767_v23 = vmax.f32 %v751_v14, 0.0 }
 0x100   :  { %v1035_v20 = vadd.f32 %v1034_v19, %v1033_v16  ;;  %v1098_v21 = vpop.f32.mrb[5].mxu1  ;;  %v1036_v22 = vpop.f32.mrb[6].mxu0 }
 0x101   :  { %v768_v24 = vmax.f32 %v752_v17, 0.0  ;;  %v1099_v25 = vadd.f32 %v1098_v21, %v1097_v18  ;;  %v1100_v26 = vpop.f32.mrb[6].mxu1  ;;  %v1037_v27 = vpop.f32.mrb[7].mxu0 }
 0x102   :  { %v1038_v28 = vadd.f32 %v1037_v27, %v1036_v22  ;;  %v1101_v29 = vpop.f32.mrb[7].mxu1 }
 0x103   :  { %v967_v30 = vpack.c.bf16 %v768_v24, %v767_v23  ;;  %v639_v31 = vadd.f32 %v1099_v25, %v1035_v20  ;;  %v1102_v32 = vadd.f32 %v1101_v29, %v1100_v26 }
 0x105   :  { %968 = vst [vmem:[%s1479_s3] sm:$0xff] %v967_v30   ;;  %v753_v33 = vadd.f32 %v1434_v9, %v639_v31  ;;  %v642_v34 = vadd.f32 %v1102_v32, %v1038_v28 }
 0x106   :  { %v1039_v35 = vpop.f32.mrb[8].mxu0 }
 0x107   :  { %v754_v36 = vadd.f32 %v1434_v9, %v642_v34  ;;  %v1103_v37 = vpop.f32.mrb[8].mxu1  ;;  %v1040_v38 = vpop.f32.mrb[9].mxu0  ;;  %v769_v42 = vmax.f32 %v753_v33, 0.0 }
 0x108   :  { %v1041_v39 = vadd.f32 %v1040_v38, %v1039_v35  ;;  %v1104_v40 = vpop.f32.mrb[9].mxu1  ;;  %v1042_v41 = vpop.f32.mrb[10].mxu0 }
 0x109   :  { %v770_v43 = vmax.f32 %v754_v36, 0.0  ;;  %v1105_v44 = vadd.f32 %v1104_v40, %v1103_v37  ;;  %v1106_v45 = vpop.f32.mrb[10].mxu1  ;;  %v1043_v46 = vpop.f32.mrb[11].mxu0 }
 0x10a   :  { %v1044_v47 = vadd.f32 %v1043_v46, %v1042_v41  ;;  %v1107_v48 = vpop.f32.mrb[11].mxu1 }
 0x10b   :  { %v972_v49 = vpack.c.bf16 %v770_v43, %v769_v42  ;;  %v647_v50 = vadd.f32 %v1105_v44, %v1041_v39  ;;  %v1108_v51 = vadd.f32 %v1107_v48, %v1106_v45 }
 0x10d   :  { %1004 = vst [vmem:[%s1479_s3 + $0x8] sm:$0xff] %v972_v49   ;;  %v755_v52 = vadd.f32 %v1434_v9, %v647_v50  ;;  %v650_v53 = vadd.f32 %v1108_v51, %v1044_v47 }
 0x10e   :  { %v1045_v54 = vpop.f32.mrb[12].mxu0 }
 0x10f   :  { %v756_v55 = vadd.f32 %v1434_v9, %v650_v53  ;;  %v1109_v56 = vpop.f32.mrb[12].mxu1  ;;  %v1046_v57 = vpop.f32.mrb[13].mxu0  ;;  %v771_v61 = vmax.f32 %v755_v52, 0.0 }
 0x110   :  { %v1047_v58 = vadd.f32 %v1046_v57, %v1045_v54  ;;  %v1110_v59 = vpop.f32.mrb[13].mxu1  ;;  %v1048_v60 = vpop.f32.mrb[14].mxu0 }
 0x111   :  { %v772_v62 = vmax.f32 %v756_v55, 0.0  ;;  %v1111_v63 = vadd.f32 %v1110_v59, %v1109_v56  ;;  %v1112_v0 = vpop.f32.mrb[14].mxu1  ;;  %v1049_v1 = vpop.f32.mrb[15].mxu0 }
 0x112   :  { %v1050_v2 = vadd.f32 %v1049_v1, %v1048_v60  ;;  %v1113_v3 = vpop.f32.mrb[15].mxu1 }
 0x113   :  { %v977_v4 = vpack.c.bf16 %v772_v62, %v771_v61  ;;  %v655_v5 = vadd.f32 %v1111_v63, %v1047_v58  ;;  %v1114_v6 = vadd.f32 %v1113_v3, %v1112_v0 }
 0x115   :  { %1005 = vst [vmem:[%s1479_s3 + $0x10] sm:$0xff] %v977_v4   ;;  %v757_v7 = vadd.f32 %v1434_v9, %v655_v5  ;;  %v658_v8 = vadd.f32 %v1114_v6, %v1050_v2 }
 0x116   :  { %v1051_v10 = vpop.f32.mrb[16].mxu0 }
 0x117   :  { %v758_v11 = vadd.f32 %v1434_v9, %v658_v8  ;;  %v1115_v12 = vpop.f32.mrb[16].mxu1  ;;  %v1052_v13 = vpop.f32.mrb[17].mxu0  ;;  %v773_v17 = vmax.f32 %v757_v7, 0.0 }
 0x118   :  { %v1053_v14 = vadd.f32 %v1052_v13, %v1051_v10  ;;  %v1116_v15 = vpop.f32.mrb[17].mxu1  ;;  %v1054_v16 = vpop.f32.mrb[18].mxu0 }
 0x119   :  { %v774_v18 = vmax.f32 %v758_v11, 0.0  ;;  %v1117_v19 = vadd.f32 %v1116_v15, %v1115_v12  ;;  %v1118_v20 = vpop.f32.mrb[18].mxu1  ;;  %v1055_v21 = vpop.f32.mrb[19].mxu0 }
 0x11a   :  { %v1056_v22 = vadd.f32 %v1055_v21, %v1054_v16  ;;  %v1119_v23 = vpop.f32.mrb[19].mxu1 }
 0x11b   :  { %v982_v24 = vpack.c.bf16 %v774_v18, %v773_v17  ;;  %v663_v25 = vadd.f32 %v1117_v19, %v1053_v14  ;;  %v1120_v26 = vadd.f32 %v1119_v23, %v1118_v20 }
 0x11d   :  { %1006 = vst [vmem:[%s1479_s3 + $0x18] sm:$0xff] %v982_v24   ;;  %v759_v27 = vadd.f32 %v1434_v9, %v663_v25  ;;  %v666_v28 = vadd.f32 %v1120_v26, %v1056_v22 }
 0x11e   :  { %v1057_v29 = vpop.f32.mrb[20].mxu0 }
 0x11f   :  { %v760_v30 = vadd.f32 %v1434_v9, %v666_v28  ;;  %v1121_v31 = vpop.f32.mrb[20].mxu1  ;;  %v1058_v32 = vpop.f32.mrb[21].mxu0  ;;  %v775_v36 = vmax.f32 %v759_v27, 0.0 }
 0x120   :  { %v1059_v33 = vadd.f32 %v1058_v32, %v1057_v29  ;;  %v1122_v34 = vpop.f32.mrb[21].mxu1  ;;  %v1060_v35 = vpop.f32.mrb[22].mxu0 }
 0x121   :  { %v776_v37 = vmax.f32 %v760_v30, 0.0  ;;  %v1123_v38 = vadd.f32 %v1122_v34, %v1121_v31  ;;  %v1124_v39 = vpop.f32.mrb[22].mxu1  ;;  %v1061_v40 = vpop.f32.mrb[23].mxu0 }
 0x122   :  { %v1062_v41 = vadd.f32 %v1061_v40, %v1060_v35  ;;  %v1125_v42 = vpop.f32.mrb[23].mxu1 }
 0x123   :  { %v987_v43 = vpack.c.bf16 %v776_v37, %v775_v36  ;;  %v671_v44 = vadd.f32 %v1123_v38, %v1059_v33  ;;  %v1126_v45 = vadd.f32 %v1125_v42, %v1124_v39 }
 0x125   :  { %1007 = vst [vmem:[%s1479_s3 + $0x20] sm:$0xff] %v987_v43   ;;  %v761_v46 = vadd.f32 %v1434_v9, %v671_v44  ;;  %v674_v47 = vadd.f32 %v1126_v45, %v1062_v41 }
 0x126   :  { %v1063_v48 = vpop.f32.mrb[24].mxu0 }
 0x127   :  { %v762_v49 = vadd.f32 %v1434_v9, %v674_v47  ;;  %v1127_v50 = vpop.f32.mrb[24].mxu1  ;;  %v1064_v51 = vpop.f32.mrb[25].mxu0  ;;  %v777_v55 = vmax.f32 %v761_v46, 0.0 }
 0x128   :  { %v1065_v52 = vadd.f32 %v1064_v51, %v1063_v48  ;;  %v1128_v53 = vpop.f32.mrb[25].mxu1  ;;  %v1066_v54 = vpop.f32.mrb[26].mxu0 }
 0x129   :  { %v778_v56 = vmax.f32 %v762_v49, 0.0  ;;  %v1129_v57 = vadd.f32 %v1128_v53, %v1127_v50  ;;  %v1130_v58 = vpop.f32.mrb[26].mxu1  ;;  %v1067_v59 = vpop.f32.mrb[27].mxu0 }
 0x12a   :  { %v1068_v60 = vadd.f32 %v1067_v59, %v1066_v54  ;;  %v1131_v61 = vpop.f32.mrb[27].mxu1 }
 0x12b   :  { %v992_v62 = vpack.c.bf16 %v778_v56, %v777_v55  ;;  %v679_v63 = vadd.f32 %v1129_v57, %v1065_v52  ;;  %v1132_v0 = vadd.f32 %v1131_v61, %v1130_v58 }
 0x12d   :  { %1008 = vst [vmem:[%s1479_s3 + $0x28] sm:$0xff] %v992_v62   ;;  %v763_v1 = vadd.f32 %v1434_v9, %v679_v63  ;;  %v682_v2 = vadd.f32 %v1132_v0, %v1068_v60 }
 0x12e   :  { %v1069_v3 = vpop.f32.mrb[28].mxu0 }
 0x12f   :  { %v764_v4 = vadd.f32 %v1434_v9, %v682_v2  ;;  %v1133_v5 = vpop.f32.mrb[28].mxu1  ;;  %v1070_v6 = vpop.f32.mrb[29].mxu0  ;;  %v779_v11 = vmax.f32 %v763_v1, 0.0 }
 0x130   :  { %v1071_v7 = vadd.f32 %v1070_v6, %v1069_v3  ;;  %v1134_v8 = vpop.f32.mrb[29].mxu1  ;;  %v1072_v10 = vpop.f32.mrb[30].mxu0 }
 0x131   :  { %v780_v12 = vmax.f32 %v764_v4, 0.0  ;;  %v1135_v13 = vadd.f32 %v1134_v8, %v1133_v5  ;;  %v1136_v14 = vpop.f32.mrb[30].mxu1  ;;  %v1073_v15 = vpop.f32.mrb[31].mxu0 }
 0x132   :  { %v1074_v16 = vadd.f32 %v1073_v15, %v1072_v10  ;;  %v1137_v17 = vpop.f32.mrb[31].mxu1 }
 0x133   :  { %v997_v18 = vpack.c.bf16 %v780_v12, %v779_v11  ;;  %v687_v19 = vadd.f32 %v1135_v13, %v1071_v7  ;;  %v1138_v20 = vadd.f32 %v1137_v17, %v1136_v14 }
 0x135   :  { %1009 = vst [vmem:[%s1479_s3 + $0x30] sm:$0xff] %v997_v18   ;;  %v765_v21 = vadd.f32 %v1434_v9, %v687_v19  ;;  %v690_v22 = vadd.f32 %v1138_v20, %v1074_v16 }
 0x137   :  { %v766_v23 = vadd.f32 %v1434_v9, %v690_v22  ;;  %v781_v24 = vmax.f32 %v765_v21, 0.0 }
 0x139   :  { %v782_v25 = vmax.f32 %v766_v23, 0.0 }
 0x13b   :  { %v1002_v26 = vpack.c.bf16 %v782_v25, %v781_v24 }
 0x13d   :  { %1010 = vst [vmem:[%s1479_s3 + $0x38] sm:$0xff] %v1002_v26  }

// kernel: vqvae_forward.23
= control target key start
LH: loop header
LB: loop body
LE: loop exit
PB: predicated region body
PF: predicated region fallthrough
CT: control target
= control target key end

     0   :  { %s1425_s12 = smov 0   ;;  %s1427_s13 = smov 0   ;;  %s1618_s0 = inlined_call_operand.vmem [shape: bf16[512,256], index: 0, kind: input, shape index: {}]   ;;  %s1619_s1 = inlined_call_operand.vmem [shape: bf16[256,128], index: 1, kind: input, shape index: {}]   ;;  %s1620_s2 = inlined_call_operand.vmem [shape: f32[1,128], index: 2, kind: input, shape index: {}]   ;;  %s1621_s3 = inlined_call_operand.vmem [shape: f32[512,128], index: 3, kind: output, shape index: {}]  }
   0x1   :  { %s1429_s14 = smov 0  }
   0x2 LB: > { %s32_s15 = sadd.s32 1, %s1399_s13  ;;  %p1107_p0 = scmp.ge.s32.totalorder %s1403_s14, 1  ;;  %s1403_s14 = sphi %s1429_s14, %s13_s14   ;;  %s1399_s13 = sphi %s1427_s13, %s1623_s13   ;;  %s1395_s12 = sphi %s1425_s12, %s1622_s12  }
   0x3   : > { %p34_p1 = scmp.ge.s32.totalorder %s32_s15, 2  ;;  %p191_p2 = scmp.lt.s32.totalorder %s1403_s14, 3 }
   0x5   : > { %s1625_s15 = smov (%p34_p1, %s32_s15), 0  ;;  %p192_p3 = pnand %p1107_p0, %p191_p2 }
   0x6   : > { %v1317_v0 = vld [vmem:[%s1619_s1 + $0x40] sm:$0xff] (!%p192_p3)   ;;  %s1108_s18 = sshll.u32 (!%p192_p3), %s1395_s12, 5  ;;  %v1319_v2 = vld [vmem:[%s1619_s1 + $0x48] sm:$0xff] (!%p192_p3)   ;;  %v1321_v4 = vld [vmem:[%s1619_s1 + $0x50] sm:$0xff] (!%p192_p3)  }
   0x7   : > { %195 = sbr.rel (%p192_p3) target bundleno = 315 (0x13b), region = 32  ;;  %v1318_v1 = vld [vmem:[%s1619_s1] sm:$0xff] (!%p192_p3)   ;;  %1165 = vmatprep.subr.bf16.mxu0 (!%p192_p3), %v1317_v0  ;;  %1277 = vmatprep.subr.bf16.mxu1 (!%p192_p3), %v1317_v0  ;;  %v1320_v3 = vld [vmem:[%s1619_s1 + $0x8] sm:$0xff] (!%p192_p3)   ;;  %p236_p4 = scmp.lt.s32.totalorder (!%p192_p3), %s1108_s18, 63  ;;  %v1322_v5 = vld [vmem:[%s1619_s1 + $0x10] sm:$0xff] (!%p192_p3)  }
   0x8   : > { %1166 = vmatpush3.bf16.msra.mxu0 (!%p192_p3), %v1318_v1  ;;  %1285 = vmatpush3.bf16.msra.mxu1 (!%p192_p3), %v1318_v1  ;;  %v1323_v6 = vld [vmem:[%s1619_s1 + $0x58] sm:$0xff] (!%p192_p3)   ;;  %v1325_v8 = vld [vmem:[%s1619_s1 + $0x60] sm:$0xff] (!%p192_p3)   ;;  %v1327_v10 = vld [vmem:[%s1619_s1 + $0x68] sm:$0xff] (!%p192_p3)  }
   0x9   : > { %1167 = vmatprep.subr.bf16.mxu0 (!%p192_p3), %v1319_v2  ;;  %1278 = vmatprep.subr.bf16.mxu1 (!%p192_p3), %v1319_v2  ;;  %v1324_v7 = vld [vmem:[%s1619_s1 + $0x18] sm:$0xff] (!%p192_p3)   ;;  %v1326_v9 = vld [vmem:[%s1619_s1 + $0x20] sm:$0xff] (!%p192_p3)   ;;  %v1328_v13 = vld [vmem:[%s1619_s1 + $0x28] sm:$0xff] (!%p192_p3)  }
   0xa   : > { %v1329_v14 = vld [vmem:[%s1619_s1 + $0x70] sm:$0xff] (!%p192_p3)   ;;  %v1331_v16 = vld [vmem:[%s1619_s1 + $0x78] sm:$0xff] (!%p192_p3)   ;;  %v1536_v51 = vld [vmem:[%s1620_s2] ss:$0 sm:$0xff] (!%p192_p3) }
   0xb   : > { %v1330_v15 = vld [vmem:[%s1619_s1 + $0x30] sm:$0xff] (!%p192_p3)   ;;  %v1332_v17 = vld [vmem:[%s1619_s1 + $0x38] sm:$0xff] (!%p192_p3)  }
   0xc   : > { %1168 = vmatpush3.bf16.msra.mxu0 (!%p192_p3), %v1320_v3  ;;  %1286 = vmatpush3.bf16.msra.mxu1 (!%p192_p3), %v1320_v3 }
   0xd   : > { %1169 = vmatprep.subr.bf16.mxu0 (!%p192_p3), %v1321_v4  ;;  %1279 = vmatprep.subr.bf16.mxu1 (!%p192_p3), %v1321_v4 }
   0xe   : > { %s1627_s18 = smov (!%p236_p4, %s1108_s18), 63 }
   0xf   : > { %s1164_s6 = sshll.u32 %s1627_s18, 3 }
  0x10   : > { %1170 = vmatpush3.bf16.msra.mxu0 %v1322_v5  ;;  %1287 = vmatpush3.bf16.msra.mxu1 %v1322_v5  ;;  %s1478_s11 = scalar_lea.vmem %s1618_s0, %s1164_s6  ;;  %s1543_s8 = scalar_lea.vmem %s1621_s3, %s1164_s6 }
  0x11   : > { %1171 = vmatprep.subr.bf16.mxu0 %v1323_v6  ;;  %1280 = vmatprep.subr.bf16.mxu1 %v1323_v6  ;;  %v1335_v11 = vld [vmem:[%s1478_s11 + $0x4] ss:$8 sps:$4 sm:$0xff]   ;;  %v1333_v18 = vld [vmem:[%s1478_s11] ss:$8 sps:$4 sm:$0xff]   ;;  %v1339_v20 = vld [vmem:[%s1478_s11 + $0x14] ss:$8 sps:$4 sm:$0xff]  }
  0x12   : > { %v1338_v12 = vld [vmem:[%s1478_s11 + $0x84] ss:$8 sps:$4 sm:$0xff]   ;;  %688 = vmatprep.mubr.bf16.mxu0 %v1335_v11  ;;  %v1336_v19 = vld [vmem:[%s1478_s11 + $0x80] ss:$8 sps:$4 sm:$0xff]   ;;  %v1341_v21 = vld [vmem:[%s1478_s11 + $0x94] ss:$8 sps:$4 sm:$0xff]  }
  0x13   : > { %752 = vmatprep.mubr.bf16.mxu1 %v1338_v12  ;;  %v1343_v22 = vld [vmem:[%s1478_s11 + $0x10] ss:$8 sps:$4 sm:$0xff]   ;;  %v1345_v24 = vld [vmem:[%s1478_s11 + $0x24] ss:$8 sps:$4 sm:$0xff]   ;;  %v1349_v26 = vld [vmem:[%s1478_s11 + $0x20] ss:$8 sps:$4 sm:$0xff]  }
  0x14   : > { %1172 = vmatpush3.bf16.msra.mxu0 %v1324_v7  ;;  %1288 = vmatpush3.bf16.msra.mxu1 %v1324_v7  ;;  %v1344_v23 = vld [vmem:[%s1478_s11 + $0x90] ss:$8 sps:$4 sm:$0xff]   ;;  %v1347_v25 = vld [vmem:[%s1478_s11 + $0xa4] ss:$8 sps:$4 sm:$0xff]   ;;  %v1350_v27 = vld [vmem:[%s1478_s11 + $0xa0] ss:$8 sps:$4 sm:$0xff]  }
  0x15   : > { %1173 = vmatprep.subr.bf16.mxu0 %v1325_v8  ;;  %1281 = vmatprep.subr.bf16.mxu1 %v1325_v8  ;;  %v1351_v28 = vld [vmem:[%s1478_s11 + $0x34] ss:$8 sps:$4 sm:$0xff]   ;;  %v1355_v30 = vld [vmem:[%s1478_s11 + $0x30] ss:$8 sps:$4 sm:$0xff]   ;;  %v1357_v32 = vld [vmem:[%s1478_s11 + $0x44] ss:$8 sps:$4 sm:$0xff]  }
  0x16   : > { %v1353_v29 = vld [vmem:[%s1478_s11 + $0xb4] ss:$8 sps:$4 sm:$0xff]   ;;  %v1356_v31 = vld [vmem:[%s1478_s11 + $0xb0] ss:$8 sps:$4 sm:$0xff]   ;;  %v1359_v33 = vld [vmem:[%s1478_s11 + $0xc4] ss:$8 sps:$4 sm:$0xff]  }
  0x17   : > { %v1361_v34 = vld [vmem:[%s1478_s11 + $0x40] ss:$8 sps:$4 sm:$0xff]   ;;  %v1363_v36 = vld [vmem:[%s1478_s11 + $0x54] ss:$8 sps:$4 sm:$0xff]   ;;  %v1367_v38 = vld [vmem:[%s1478_s11 + $0x50] ss:$8 sps:$4 sm:$0xff]  }
  0x18   : > { %1174 = vmatpush3.bf16.msra.mxu0 %v1326_v9  ;;  %1289 = vmatpush3.bf16.msra.mxu1 %v1326_v9  ;;  %v1362_v35 = vld [vmem:[%s1478_s11 + $0xc0] ss:$8 sps:$4 sm:$0xff]   ;;  %v1365_v37 = vld [vmem:[%s1478_s11 + $0xd4] ss:$8 sps:$4 sm:$0xff]   ;;  %v1368_v39 = vld [vmem:[%s1478_s11 + $0xd0] ss:$8 sps:$4 sm:$0xff]  }
  0x19   : > { %1175 = vmatprep.subr.bf16.mxu0 %v1327_v10  ;;  %1282 = vmatprep.subr.bf16.mxu1 %v1327_v10  ;;  %v1369_v40 = vld [vmem:[%s1478_s11 + $0x64] ss:$8 sps:$4 sm:$0xff]   ;;  %v1373_v42 = vld [vmem:[%s1478_s11 + $0x60] ss:$8 sps:$4 sm:$0xff]   ;;  %v1375_v44 = vld [vmem:[%s1478_s11 + $0x74] ss:$8 sps:$4 sm:$0xff]  }
  0x1a   : > { %v1371_v41 = vld [vmem:[%s1478_s11 + $0xe4] ss:$8 sps:$4 sm:$0xff]   ;;  %v1374_v43 = vld [vmem:[%s1478_s11 + $0xe0] ss:$8 sps:$4 sm:$0xff]   ;;  %v1377_v45 = vld [vmem:[%s1478_s11 + $0xf4] ss:$8 sps:$4 sm:$0xff]  }
  0x1b   : > { %v1379_v46 = vld [vmem:[%s1478_s11 + $0x70] ss:$8 sps:$4 sm:$0xff]  }
  0x1c   : > { %1176 = vmatpush3.bf16.msra.mxu0 %v1328_v13  ;;  %1290 = vmatpush3.bf16.msra.mxu1 %v1328_v13  ;;  %v1380_v47 = vld [vmem:[%s1478_s11 + $0xf0] ss:$8 sps:$4 sm:$0xff]  }
  0x1d   : > { %1177 = vmatprep.subr.bf16.mxu0 %v1329_v14  ;;  %1283 = vmatprep.subr.bf16.mxu1 %v1329_v14 }
  0x20   : > { %1178 = vmatpush3.bf16.msra.mxu0 %v1330_v15  ;;  %1291 = vmatpush3.bf16.msra.mxu1 %v1330_v15 }
  0x21   : > { %1179 = vmatprep.subr.bf16.mxu0 %v1331_v16  ;;  %1284 = vmatprep.subr.bf16.mxu1 %v1331_v16 }
  0x24   : > { %1180 = vmatpush3.bf16.msra.mxu0 %v1332_v17  ;;  %1292 = vmatpush3.bf16.msra.mxu1 %v1332_v17 }
  0x27   : > { %689 = vmatmul.mubr.bf16.vlgmr.msra.gmra.mrb[0].mxu0 %v1333_v18  ;;  %753 = vmatmul.mubr.bf16.vlgmr.msra.gmra.mrb[0].mxu1 %v1336_v19 }
  0x28   : > { %696 = vmatprep.mubr.bf16.mxu0 %v1339_v20  ;;  %760 = vmatprep.mubr.bf16.mxu1 %v1341_v21 }
  0x2f   : > { %697 = vmatmul.mubr.bf16.gmra.mrb[4].mxu0 %v1343_v22  ;;  %761 = vmatmul.mubr.bf16.gmra.mrb[4].mxu1 %v1344_v23 }
  0x30   : > { %704 = vmatprep.mubr.bf16.mxu0 %v1345_v24  ;;  %768 = vmatprep.mubr.bf16.mxu1 %v1347_v25 }
  0x37   : > { %705 = vmatmul.mubr.bf16.gmra.mrb[8].mxu0 %v1349_v26  ;;  %769 = vmatmul.mubr.bf16.gmra.mrb[8].mxu1 %v1350_v27 }
  0x38   : > { %712 = vmatprep.mubr.bf16.mxu0 %v1351_v28  ;;  %776 = vmatprep.mubr.bf16.mxu1 %v1353_v29 }
  0x3f   : > { %713 = vmatmul.mubr.bf16.gmra.mrb[12].mxu0 %v1355_v30  ;;  %777 = vmatmul.mubr.bf16.gmra.mrb[12].mxu1 %v1356_v31 }
  0x40   : > { %720 = vmatprep.mubr.bf16.mxu0 %v1357_v32  ;;  %784 = vmatprep.mubr.bf16.mxu1 %v1359_v33 }
  0x47   : > { %721 = vmatmul.mubr.bf16.gmra.mrb[16].mxu0 %v1361_v34  ;;  %785 = vmatmul.mubr.bf16.gmra.mrb[16].mxu1 %v1362_v35 }
  0x48   : > { %728 = vmatprep.mubr.bf16.mxu0 %v1363_v36  ;;  %792 = vmatprep.mubr.bf16.mxu1 %v1365_v37 }
  0x4f   : > { %729 = vmatmul.mubr.bf16.gmra.mrb[20].mxu0 %v1367_v38  ;;  %793 = vmatmul.mubr.bf16.gmra.mrb[20].mxu1 %v1368_v39 }
  0x50   : > { %736 = vmatprep.mubr.bf16.mxu0 %v1369_v40  ;;  %800 = vmatprep.mubr.bf16.mxu1 %v1371_v41 }
  0x57   : > { %737 = vmatmul.mubr.bf16.gmra.mrb[24].mxu0 %v1373_v42  ;;  %801 = vmatmul.mubr.bf16.gmra.mrb[24].mxu1 %v1374_v43 }
  0x58   : > { %744 = vmatprep.mubr.bf16.mxu0 %v1375_v44  ;;  %808 = vmatprep.mubr.bf16.mxu1 %v1377_v45 }
  0x5f   : > { %745 = vmatmul.mubr.bf16.gmra.mrb[28].mxu0 %v1379_v46  ;;  %809 = vmatmul.mubr.bf16.gmra.mrb[28].mxu1 %v1380_v47 }
  0xfa   : > { %v1181_v48 = vpop.f32.mrb[0].mxu0  ;;  %v1229_v49 = vpop.f32.mrb[0].mxu1 }
  0xfb   : > { %v1182_v50 = vpop.f32.mrb[1].mxu0  ;;  %v1230_v52 = vpop.f32.mrb[1].mxu1 }
  0xfc   : > { %v1183_v53 = vadd.f32 %v1182_v50, %v1181_v48  ;;  %v1231_v54 = vadd.f32 %v1230_v52, %v1229_v49  ;;  %v1184_v55 = vpop.f32.mrb[2].mxu0  ;;  %v1232_v56 = vpop.f32.mrb[2].mxu1 }
  0xfd   : > { %v1185_v57 = vpop.f32.mrb[3].mxu0  ;;  %v1233_v58 = vpop.f32.mrb[3].mxu1 }
  0xfe   : > { %v923_v59 = vadd.f32 %v1183_v53, %v1536_v51  ;;  %v939_v60 = vadd.f32 %v1231_v54, %v1536_v51  ;;  %v1186_v61 = vadd.f32 %v1185_v57, %v1184_v55  ;;  %v1234_v62 = vadd.f32 %v1233_v58, %v1232_v56 }
 0x100   : > { %955 = vst [vmem:[%s1543_s8] sm:$0xff] %v923_v59  ;;  %971 = vst [vmem:[%s1543_s8 + $0x80] sm:$0xff] %v939_v60  ;;  %v924_v63 = vadd.f32 %v1186_v61, %v1536_v51  ;;  %v940_v0 = vadd.f32 %v1234_v62, %v1536_v51 }
 0x102   : > { %956 = vst [vmem:[%s1543_s8 + $0x8] sm:$0xff] %v924_v63  ;;  %972 = vst [vmem:[%s1543_s8 + $0x88] sm:$0xff] %v940_v0  ;;  %v1187_v1 = vpop.f32.mrb[4].mxu0  ;;  %v1235_v2 = vpop.f32.mrb[4].mxu1 }
 0x103   : > { %v1188_v3 = vpop.f32.mrb[5].mxu0  ;;  %v1236_v4 = vpop.f32.mrb[5].mxu1 }
 0x104   : > { %v1189_v5 = vadd.f32 %v1188_v3, %v1187_v1  ;;  %v1237_v6 = vadd.f32 %v1236_v4, %v1235_v2  ;;  %v1190_v7 = vpop.f32.mrb[6].mxu0  ;;  %v1238_v8 = vpop.f32.mrb[6].mxu1 }
 0x105   : > { %v1191_v9 = vpop.f32.mrb[7].mxu0  ;;  %v1239_v10 = vpop.f32.mrb[7].mxu1 }
 0x106   : > { %v925_v11 = vadd.f32 %v1189_v5, %v1536_v51  ;;  %v941_v12 = vadd.f32 %v1237_v6, %v1536_v51  ;;  %v1192_v13 = vadd.f32 %v1191_v9, %v1190_v7  ;;  %v1240_v14 = vadd.f32 %v1239_v10, %v1238_v8 }
 0x108   : > { %957 = vst [vmem:[%s1543_s8 + $0x10] sm:$0xff] %v925_v11  ;;  %973 = vst [vmem:[%s1543_s8 + $0x90] sm:$0xff] %v941_v12  ;;  %v926_v15 = vadd.f32 %v1192_v13, %v1536_v51  ;;  %v942_v16 = vadd.f32 %v1240_v14, %v1536_v51 }
 0x10a   : > { %958 = vst [vmem:[%s1543_s8 + $0x18] sm:$0xff] %v926_v15  ;;  %974 = vst [vmem:[%s1543_s8 + $0x98] sm:$0xff] %v942_v16  ;;  %v1193_v17 = vpop.f32.mrb[8].mxu0  ;;  %v1241_v18 = vpop.f32.mrb[8].mxu1 }
 0x10b   : > { %v1194_v19 = vpop.f32.mrb[9].mxu0  ;;  %v1242_v20 = vpop.f32.mrb[9].mxu1 }
 0x10c   : > { %v1195_v21 = vadd.f32 %v1194_v19, %v1193_v17  ;;  %v1243_v22 = vadd.f32 %v1242_v20, %v1241_v18  ;;  %v1196_v23 = vpop.f32.mrb[10].mxu0  ;;  %v1244_v24 = vpop.f32.mrb[10].mxu1 }
 0x10d   : > { %v1197_v25 = vpop.f32.mrb[11].mxu0  ;;  %v1245_v26 = vpop.f32.mrb[11].mxu1 }
 0x10e   : > { %v927_v27 = vadd.f32 %v1195_v21, %v1536_v51  ;;  %v943_v28 = vadd.f32 %v1243_v22, %v1536_v51  ;;  %v1198_v29 = vadd.f32 %v1197_v25, %v1196_v23  ;;  %v1246_v30 = vadd.f32 %v1245_v26, %v1244_v24 }
 0x110   : > { %959 = vst [vmem:[%s1543_s8 + $0x20] sm:$0xff] %v927_v27  ;;  %975 = vst [vmem:[%s1543_s8 + $0xa0] sm:$0xff] %v943_v28  ;;  %v928_v31 = vadd.f32 %v1198_v29, %v1536_v51  ;;  %v944_v32 = vadd.f32 %v1246_v30, %v1536_v51 }
 0x112   : > { %960 = vst [vmem:[%s1543_s8 + $0x28] sm:$0xff] %v928_v31  ;;  %976 = vst [vmem:[%s1543_s8 + $0xa8] sm:$0xff] %v944_v32  ;;  %v1199_v33 = vpop.f32.mrb[12].mxu0  ;;  %v1247_v34 = vpop.f32.mrb[12].mxu1 }
 0x113   : > { %v1200_v35 = vpop.f32.mrb[13].mxu0  ;;  %v1248_v36 = vpop.f32.mrb[13].mxu1 }
 0x114   : > { %v1201_v37 = vadd.f32 %v1200_v35, %v1199_v33  ;;  %v1249_v38 = vadd.f32 %v1248_v36, %v1247_v34  ;;  %v1202_v39 = vpop.f32.mrb[14].mxu0  ;;  %v1250_v40 = vpop.f32.mrb[14].mxu1 }
 0x115   : > { %v1203_v41 = vpop.f32.mrb[15].mxu0  ;;  %v1251_v42 = vpop.f32.mrb[15].mxu1 }
 0x116   : > { %v929_v43 = vadd.f32 %v1201_v37, %v1536_v51  ;;  %v945_v44 = vadd.f32 %v1249_v38, %v1536_v51  ;;  %v1204_v45 = vadd.f32 %v1203_v41, %v1202_v39  ;;  %v1252_v46 = vadd.f32 %v1251_v42, %v1250_v40 }
 0x118   : > { %961 = vst [vmem:[%s1543_s8 + $0x30] sm:$0xff] %v929_v43  ;;  %977 = vst [vmem:[%s1543_s8 + $0xb0] sm:$0xff] %v945_v44  ;;  %v930_v47 = vadd.f32 %v1204_v45, %v1536_v51  ;;  %v946_v48 = vadd.f32 %v1252_v46, %v1536_v51 }
 0x11a   : > { %962 = vst [vmem:[%s1543_s8 + $0x38] sm:$0xff] %v930_v47  ;;  %978 = vst [vmem:[%s1543_s8 + $0xb8] sm:$0xff] %v946_v48  ;;  %v1205_v49 = vpop.f32.mrb[16].mxu0  ;;  %v1253_v50 = vpop.f32.mrb[16].mxu1 }
 0x11b   : > { %v1206_v52 = vpop.f32.mrb[17].mxu0  ;;  %v1254_v53 = vpop.f32.mrb[17].mxu1 }
 0x11c   : > { %v1207_v54 = vadd.f32 %v1206_v52, %v1205_v49  ;;  %v1255_v55 = vadd.f32 %v1254_v53, %v1253_v50  ;;  %v1208_v56 = vpop.f32.mrb[18].mxu0  ;;  %v1256_v57 = vpop.f32.mrb[18].mxu1 }
 0x11d   : > { %v1209_v58 = vpop.f32.mrb[19].mxu0  ;;  %v1257_v59 = vpop.f32.mrb[19].mxu1 }
 0x11e   : > { %v931_v60 = vadd.f32 %v1207_v54, %v1536_v51  ;;  %v947_v61 = vadd.f32 %v1255_v55, %v1536_v51  ;;  %v1210_v62 = vadd.f32 %v1209_v58, %v1208_v56  ;;  %v1258_v63 = vadd.f32 %v1257_v59, %v1256_v57 }
 0x120   : > { %963 = vst [vmem:[%s1543_s8 + $0x40] sm:$0xff] %v931_v60  ;;  %979 = vst [vmem:[%s1543_s8 + $0xc0] sm:$0xff] %v947_v61  ;;  %v932_v0 = vadd.f32 %v1210_v62, %v1536_v51  ;;  %v948_v1 = vadd.f32 %v1258_v63, %v1536_v51 }
 0x122   : > { %964 = vst [vmem:[%s1543_s8 + $0x48] sm:$0xff] %v932_v0  ;;  %980 = vst [vmem:[%s1543_s8 + $0xc8] sm:$0xff] %v948_v1  ;;  %v1211_v2 = vpop.f32.mrb[20].mxu0  ;;  %v1259_v3 = vpop.f32.mrb[20].mxu1 }
 0x123   : > { %v1212_v4 = vpop.f32.mrb[21].mxu0  ;;  %v1260_v5 = vpop.f32.mrb[21].mxu1 }
 0x124   : > { %v1213_v6 = vadd.f32 %v1212_v4, %v1211_v2  ;;  %v1261_v7 = vadd.f32 %v1260_v5, %v1259_v3  ;;  %v1214_v8 = vpop.f32.mrb[22].mxu0  ;;  %v1262_v9 = vpop.f32.mrb[22].mxu1 }
 0x125   : > { %v1215_v10 = vpop.f32.mrb[23].mxu0  ;;  %v1263_v11 = vpop.f32.mrb[23].mxu1 }
 0x126   : > { %v933_v12 = vadd.f32 %v1213_v6, %v1536_v51  ;;  %v949_v13 = vadd.f32 %v1261_v7, %v1536_v51  ;;  %v1216_v14 = vadd.f32 %v1215_v10, %v1214_v8  ;;  %v1264_v15 = vadd.f32 %v1263_v11, %v1262_v9 }
 0x128   : > { %965 = vst [vmem:[%s1543_s8 + $0x50] sm:$0xff] %v933_v12  ;;  %981 = vst [vmem:[%s1543_s8 + $0xd0] sm:$0xff] %v949_v13  ;;  %v934_v16 = vadd.f32 %v1216_v14, %v1536_v51  ;;  %v950_v17 = vadd.f32 %v1264_v15, %v1536_v51 }
 0x12a   : > { %966 = vst [vmem:[%s1543_s8 + $0x58] sm:$0xff] %v934_v16  ;;  %982 = vst [vmem:[%s1543_s8 + $0xd8] sm:$0xff] %v950_v17  ;;  %v1217_v18 = vpop.f32.mrb[24].mxu0  ;;  %v1265_v19 = vpop.f32.mrb[24].mxu1 }
 0x12b   : > { %v1218_v20 = vpop.f32.mrb[25].mxu0  ;;  %v1266_v21 = vpop.f32.mrb[25].mxu1 }
 0x12c   : > { %v1219_v22 = vadd.f32 %v1218_v20, %v1217_v18  ;;  %v1267_v23 = vadd.f32 %v1266_v21, %v1265_v19  ;;  %v1220_v24 = vpop.f32.mrb[26].mxu0  ;;  %v1268_v25 = vpop.f32.mrb[26].mxu1 }
 0x12d   : > { %v1221_v26 = vpop.f32.mrb[27].mxu0  ;;  %v1269_v27 = vpop.f32.mrb[27].mxu1 }
 0x12e   : > { %v935_v28 = vadd.f32 %v1219_v22, %v1536_v51  ;;  %v951_v29 = vadd.f32 %v1267_v23, %v1536_v51  ;;  %v1222_v30 = vadd.f32 %v1221_v26, %v1220_v24  ;;  %v1270_v31 = vadd.f32 %v1269_v27, %v1268_v25 }
 0x130   : > { %967 = vst [vmem:[%s1543_s8 + $0x60] sm:$0xff] %v935_v28  ;;  %983 = vst [vmem:[%s1543_s8 + $0xe0] sm:$0xff] %v951_v29  ;;  %v936_v32 = vadd.f32 %v1222_v30, %v1536_v51  ;;  %v952_v33 = vadd.f32 %v1270_v31, %v1536_v51 }
 0x132   : > { %968 = vst [vmem:[%s1543_s8 + $0x68] sm:$0xff] %v936_v32  ;;  %984 = vst [vmem:[%s1543_s8 + $0xe8] sm:$0xff] %v952_v33  ;;  %v1223_v34 = vpop.f32.mrb[28].mxu0  ;;  %v1271_v35 = vpop.f32.mrb[28].mxu1 }
 0x133   : > { %v1224_v36 = vpop.f32.mrb[29].mxu0  ;;  %v1272_v37 = vpop.f32.mrb[29].mxu1 }
 0x134   : > { %v1225_v38 = vadd.f32 %v1224_v36, %v1223_v34  ;;  %v1273_v39 = vadd.f32 %v1272_v37, %v1271_v35  ;;  %v1226_v40 = vpop.f32.mrb[30].mxu0  ;;  %v1274_v41 = vpop.f32.mrb[30].mxu1 }
 0x135   : > { %v1227_v42 = vpop.f32.mrb[31].mxu0  ;;  %v1275_v43 = vpop.f32.mrb[31].mxu1 }
 0x136   : > { %v937_v44 = vadd.f32 %v1225_v38, %v1536_v51  ;;  %v953_v45 = vadd.f32 %v1273_v39, %v1536_v51  ;;  %v1228_v46 = vadd.f32 %v1227_v42, %v1226_v40  ;;  %v1276_v47 = vadd.f32 %v1275_v43, %v1274_v41 }
 0x138   : > { %969 = vst [vmem:[%s1543_s8 + $0x70] sm:$0xff] %v937_v44  ;;  %985 = vst [vmem:[%s1543_s8 + $0xf0] sm:$0xff] %v953_v45  ;;  %v938_v48 = vadd.f32 %v1228_v46, %v1536_v51  ;;  %v954_v49 = vadd.f32 %v1276_v47, %v1536_v51 }
 0x13a   : > { %970 = vst [vmem:[%s1543_s8 + $0x78] sm:$0xff] %v938_v48  ;;  %986 = vst [vmem:[%s1543_s8 + $0xf8] sm:$0xff] %v954_v49 }
 0x13b PF: > { %s13_s14 = sadd.s32 1, %s1403_s14   ;;  %s1622_s12 = smov %s1399_s13 }
 0x13c   : > { %p10_p5 = scmp.ge.s32.totalorder %s13_s14, 4   ;;  %s1623_s13 = smov %s1625_s15 }
 0x13e   :  { %12 = sbr.rel (!%p10_p5) target bundleno = 2 (0x2), region = 76 }

</bundles_post_ra>
